<compile_context>
chip_gen: v5e
topology: v5e:2x2
jax: 0.10.0
libtpu: 0.0.40
codegen_flags: <defaults>
</compile_context>

<pallas_src>
import functools

import jax
import jax.numpy as jnp
from jax import lax
from jax.experimental import pallas as pl
from jax.experimental.pallas import tpu as pltpu

# Conservative scoped-VMEM budget that is valid on v5e/v6e (128 MiB phys) and
# v7x (64 MiB phys / 32 MiB scoped default).
_VMEM_LIMIT = 32 * 1024 * 1024


# ---------------------------------------------------------------------------
# Kernel 1: char-CNN + fused BiLSTM input projection (row-tiled, parallel)
# ---------------------------------------------------------------------------

def encode_project_kernel(char_e_ref, form_e_ref, conv_w_ref, conv_b_ref,
                          wih_form_ref, wih_char_ref, b_ih_ref, gx_ref):
    """One row tile of: char CNN -> [form_e | char_feat] @ [W_ih_f | W_ih_b] + b.

    char_e_ref : (tm, W, C)      bf16   char embeddings per token
    form_e_ref : (tm, E)         bf16   form embeddings per token
    conv_w_ref : (window, C, F)  bf16   Conv1d taps
    conv_b_ref : (1, F)          f32
    wih_form   : (E, 8H)         bf16   input-proj rows that multiply form_e
    wih_char   : (F, 8H)         bf16   input-proj rows that multiply char_feat
    b_ih_ref   : (1, 8H)         f32    [b_ih_fwd | b_ih_bwd]
    gx_ref     : (tm, 8H)        f32    pre-activation gates, both directions
    """
    tm, W, C = char_e_ref.shape
    window = conv_w_ref.shape[0]
    wout = W - window + 1

    # Conv1d as `window` shifted-slice matmuls accumulated in VMEM
    # (no HBM-side unfold / 3x blowup).
    s = None
    for j in range(window):                               # static unroll
        tap = lax.dot_general(
            char_e_ref[:, j:j + wout, :], conv_w_ref[j],
            dimension_numbers=(((2,), (0,)), ((), ())),
            preferred_element_type=jnp.float32)            # (tm, wout, F)
        s = tap if s is None else s + tap
    s = jnp.maximum(s + conv_b_ref[...], 0.0)              # bias + ReLU
    char_feat = jnp.max(s, axis=1)                         # max-pool -> (tm, F)

    # enc_in = [form_e | char_feat]; project with both directions' W_ih at once
    # (lane-dense 8H-wide output, single pass over the rows).
    gx = jnp.dot(form_e_ref[...], wih_form_ref[...],
                 preferred_element_type=jnp.float32)
    gx = gx + jnp.dot(char_feat.astype(jnp.bfloat16), wih_char_ref[...],
                      preferred_element_type=jnp.float32)
    gx_ref[...] = gx + b_ih_ref[...]


def encode_project(char_e, form_e, conv_w, conv_b, wih_form, wih_char, b_ih,
                   *, tile_m=512):
    M, W, C = char_e.shape
    E = form_e.shape[1]
    window, _, F = conv_w.shape
    G2 = wih_form.shape[1]                                 # 8H (both directions)

    tm = min(tile_m, max(8, ((M + 7) // 8) * 8))           # multiple of 8 sublanes
    MP = pl.cdiv(M, tm) * tm
    if MP != M:
        char_e = jnp.pad(char_e, ((0, MP - M), (0, 0), (0, 0)))
        form_e = jnp.pad(form_e, ((0, MP - M), (0, 0)))

    gx = pl.pallas_call(
        encode_project_kernel,
        out_shape=jax.ShapeDtypeStruct((MP, G2), jnp.float32),
        grid=(MP // tm,),
        in_specs=[
            pl.BlockSpec((tm, W, C), lambda i: (i, 0, 0)),
            pl.BlockSpec((tm, E), lambda i: (i, 0)),
            pl.BlockSpec((window, C, F), lambda i: (0, 0, 0)),
            pl.BlockSpec((1, F), lambda i: (0, 0)),
            pl.BlockSpec((E, G2), lambda i: (0, 0)),
            pl.BlockSpec((F, G2), lambda i: (0, 0)),
            pl.BlockSpec((1, G2), lambda i: (0, 0)),
        ],
        out_specs=pl.BlockSpec((tm, G2), lambda i: (i, 0)),
        compiler_params=pltpu.CompilerParams(
            dimension_semantics=("parallel",),
            vmem_limit_bytes=_VMEM_LIMIT),
    )(char_e, form_e, conv_w, conv_b, wih_form, wih_char, b_ih)
    return gx[:M]


# ---------------------------------------------------------------------------
# Kernel 2: fused bidirectional LSTM recurrence + linear tag head
# ---------------------------------------------------------------------------

def bilstm_tag_kernel(gx_ref, whh_ref, tag_w_ref, tag_b_ref, out_ref,
                      hs_f_ref, hs_b_ref, *, seq_len, batch):
    """Both LSTM directions in one serial loop, tag head as epilogue.

    gx_ref   : (T*B, 8H) f32  time-major rows (t, b); [:, :4H] fwd, [:, 4H:] bwd
    whh_ref  : (2H, 8H)  f32  block-diag(W_hh_fwd, W_hh_bwd)
    tag_w_ref: (2H, NP)  f32  tag-head weight, N padded to 128 lanes
    tag_b_ref: (1, NP)   f32
    out_ref  : (T*B, NP) f32  tag scores (time-major rows, lane-dense)
    hs_f/hs_b: (T*B, H)  f32  VMEM scratch hidden states per direction
    """
    T, B = seq_len, batch
    G2 = gx_ref.shape[1]
    H4 = G2 // 2
    H = H4 // 4
    whh = whh_ref[...]                                     # hoisted VMEM load

    def step(t, carry):
        hf, cf, hb, cb = carry
        rt = T - 1 - t                                     # in-kernel time reversal
        # One MXU op covers both directions' recurrent term (block-diagonal W_hh).
        r = jnp.dot(jnp.concatenate([hf, hb], axis=-1), whh,
                    preferred_element_type=jnp.float32)    # (B, 8H)
        gf = gx_ref[pl.ds(t * B, B), pl.ds(0, H4)] + r[:, :H4]
        gb = gx_ref[pl.ds(rt * B, B), pl.ds(H4, H4)] + r[:, H4:]
        # PyTorch gate order i, f, g, o; fwd/bwd chains interleaved for ILP.
        i_f = jax.nn.sigmoid(gf[:, 0 * H:1 * H])
        i_b = jax.nn.sigmoid(gb[:, 0 * H:1 * H])
        f_f = jax.nn.sigmoid(gf[:, 1 * H:2 * H])
        f_b = jax.nn.sigmoid(gb[:, 1 * H:2 * H])
        g_f = jnp.tanh(gf[:, 2 * H:3 * H])
        g_b = jnp.tanh(gb[:, 2 * H:3 * H])
        o_f = jax.nn.sigmoid(gf[:, 3 * H:4 * H])
        o_b = jax.nn.sigmoid(gb[:, 3 * H:4 * H])
        cf_n = f_f * cf + i_f * g_f
        cb_n = f_b * cb + i_b * g_b
        hf_n = o_f * jnp.tanh(cf_n)
        hb_n = o_b * jnp.tanh(cb_n)
        hs_f_ref[pl.ds(t * B, B), :] = hf_n
        hs_b_ref[pl.ds(rt * B, B), :] = hb_n
        return hf_n, cf_n, hb_n, cb_n

    z = jnp.zeros((B, H), jnp.float32)
    lax.fori_loop(0, T, step, (z, z, z, z), unroll=True)

    # Fused tag head: scores = [hs_f | hs_b] @ tag_w + tag_b  (NP=128 lane-dense).
    scores = jnp.dot(hs_f_ref[...], tag_w_ref[:H, :],
                     preferred_element_type=jnp.float32)
    scores = scores + jnp.dot(hs_b_ref[...], tag_w_ref[H:, :],
                              preferred_element_type=jnp.float32)
    out_ref[...] = scores + tag_b_ref[...]


def bilstm_tag(gx, whh_bd, tag_w_pad, tag_b_pad, *, batch):
    M, G2 = gx.shape
    T = M // batch
    H = G2 // 8
    NP = tag_w_pad.shape[1]
    flops = 2 * T * batch * (2 * H) * G2 + 2 * M * (2 * H) * NP
    transcendentals = 10 * T * batch * H * 2
    bytes_accessed = 4 * (gx.size + whh_bd.size + tag_w_pad.size
                          + tag_b_pad.size + M * NP)
    # TODO(synk): on v7x (2 TCs/chip) the two directions could instead be split
    # across cores via a grid=(2,) "parallel" dimension (one direction per TC).
    return pl.pallas_call(
        functools.partial(bilstm_tag_kernel, seq_len=T, batch=batch),
        out_shape=jax.ShapeDtypeStruct((M, NP), jnp.float32),
        scratch_shapes=[pltpu.VMEM((M, H), jnp.float32),
                        pltpu.VMEM((M, H), jnp.float32)],
        cost_estimate=pl.CostEstimate(flops=int(flops),
                                      transcendentals=int(transcendentals),
                                      bytes_accessed=int(bytes_accessed)),
        compiler_params=pltpu.CompilerParams(vmem_limit_bytes=_VMEM_LIMIT),
    )(gx, whh_bd, tag_w_pad, tag_b_pad)


# ---------------------------------------------------------------------------
# Parameters
# ---------------------------------------------------------------------------

def init_params(key, *, n_words, n_chars, n_tags, emb_dim, char_emb_dim,
                num_filters, window_size, dim):
    ks = jax.random.split(key, 12)
    input_dim = emb_dim + num_filters
    tagger_input_dim = 2 * dim                             # bi=True

    def unif(k, shape, scale):
        return jax.random.uniform(k, shape, jnp.float32, -scale, scale)

    return dict(
        form_emb=unif(ks[0], (n_words, emb_dim), 0.1).at[0].set(0.0),     # padding_idx=0
        char_emb=unif(ks[1], (n_chars, char_emb_dim), 0.1).at[0].set(0.0),
        char_w=unif(ks[2], (window_size, char_emb_dim, num_filters), 0.1),  # Conv1d taps
        char_b=unif(ks[3], (num_filters,), 0.05),
        wih_f=unif(ks[4], (input_dim, 4 * dim), 0.1),
        whh_f=unif(ks[5], (dim, 4 * dim), 0.1),
        b_f=unif(ks[6], (4 * dim,), 0.05),
        wih_b=unif(ks[7], (input_dim, 4 * dim), 0.1),
        whh_b=unif(ks[8], (dim, 4 * dim), 0.1),
        b_b=unif(ks[9], (4 * dim,), 0.05),
        tag_w=unif(ks[10], (tagger_input_dim, n_tags),
                   (6.0 / (tagger_input_dim + n_tags)) ** 0.5),           # xavier_uniform
        tag_b=jnp.zeros((n_tags,), jnp.float32),
    )


def prepare_params(params):
    """Fuse / pad / cast parameters into the inference layout used by the kernels."""
    E = params["form_emb"].shape[1]
    H = params["whh_f"].shape[0]
    n_tags = params["tag_w"].shape[1]
    NP = ((n_tags + 127) // 128) * 128                     # lane-dense tag head

    # Fused input projection for both directions: [W_ih_fwd | W_ih_bwd].
    wih_cat = jnp.concatenate([params["wih_f"], params["wih_b"]], axis=1)  # (D_in, 8H)
    b_ih = jnp.concatenate([params["b_f"], params["b_b"]])[None, :]        # (1, 8H)

    # Block-diagonal recurrent weights so both directions share one per-step dot.
    whh_bd = jnp.zeros((2 * H, 8 * H), jnp.float32)
    whh_bd = whh_bd.at[:H, :4 * H].set(params["whh_f"])
    whh_bd = whh_bd.at[H:, 4 * H:].set(params["whh_b"])

    tag_w_pad = jnp.zeros((2 * H, NP), jnp.float32).at[:, :n_tags].set(params["tag_w"])
    tag_b_pad = jnp.zeros((1, NP), jnp.float32).at[:, :n_tags].set(params["tag_b"])

    return dict(
        form_emb=params["form_emb"].astype(jnp.bfloat16),
        char_emb=params["char_emb"].astype(jnp.bfloat16),
        conv_w=params["char_w"].astype(jnp.bfloat16),
        conv_b=params["char_b"][None, :].astype(jnp.float32),
        wih_form=wih_cat[:E].astype(jnp.bfloat16),
        wih_char=wih_cat[E:].astype(jnp.bfloat16),
        b_ih=b_ih.astype(jnp.float32),
        whh_bd=whh_bd,
        tag_w_pad=tag_w_pad,
        tag_b_pad=tag_b_pad,
    )


# ---------------------------------------------------------------------------
# Forward
# ---------------------------------------------------------------------------

def tagger_forward(prep, form_var, char_var, *, n_tags):
    """Forward pass of Tagger (tagger='linear'). Returns scores (B, T, n_tags)."""
    B, T = form_var.shape
    W = char_var.shape[2]

    # Embedding gathers (JAX glue), produced directly in time-major row order
    # (t, b) so no activation-sized transposes/reverses are needed downstream.
    form_ids = jnp.transpose(form_var, (1, 0)).reshape(-1)            # (T*B,)
    char_ids = jnp.transpose(char_var, (1, 0, 2)).reshape(-1, W)      # (T*B, W)
    form_e = jnp.take(prep["form_emb"], form_ids, axis=0)             # (T*B, E)    bf16
    char_e = jnp.take(prep["char_emb"], char_ids, axis=0)             # (T*B, W, C) bf16

    # Fused char-CNN + BiLSTM input projection (both directions), row-tiled.
    gx = encode_project(char_e, form_e, prep["conv_w"], prep["conv_b"],
                        prep["wih_form"], prep["wih_char"], prep["b_ih"])

    # Fused bidirectional recurrence + tag head (lane-dense padded scores).
    scores_tm = bilstm_tag(gx, prep["whh_bd"], prep["tag_w_pad"],
                           prep["tag_b_pad"], batch=B)                # (T*B, NP)
    NP = scores_tm.shape[1]
    scores = scores_tm.reshape(T, B, NP).transpose(1, 0, 2)[:, :, :n_tags]

    # TODO(synk): 'crf' branch (ChainCRFallenNLP forward loss / Viterbi) is not
    # defined in the provided module; only the 'linear' tagger head is implemented.
    # TODO(synk): no per-sequence length masking (PyTorch pack_padded_sequence);
    # right-padded positions feed the backward recurrence and the char CNN.
    return dict(loss=None, output=scores, score=None, sequence=None)


# ---------------------------------------------------------------------------
# Main
# ---------------------------------------------------------------------------

if __name__ == "__main__":
    # Small, module-consistent shapes.
    B, T, W = 2, 8, 8
    n_words, n_chars, n_tags = 50, 30, 8
    emb_dim, char_emb_dim = 32, 16
    num_filters, window_size = 16, 3
    dim = 32  # LSTM hidden per direction -> tagger_input_dim = 64 (bi=True)

    key = jax.random.PRNGKey(0)
    k_params, k_form, k_char = jax.random.split(key, 3)

    params = init_params(
        k_params, n_words=n_words, n_chars=n_chars, n_tags=n_tags,
        emb_dim=emb_dim, char_emb_dim=char_emb_dim,
        num_filters=num_filters, window_size=window_size, dim=dim,
    )
    prep = prepare_params(params)

    form_var = jax.random.randint(k_form, (B, T), 1, n_words, dtype=jnp.int32)
    char_var = jax.random.randint(k_char, (B, T, W), 1, n_chars, dtype=jnp.int32)

    fwd = jax.jit(functools.partial(tagger_forward, n_tags=n_tags))
    out = fwd(prep, form_var, char_var)
    scores = jax.block_until_ready(out["output"])

    assert scores.shape == (B, T, n_tags), scores.shape
    assert jnp.all(jnp.isfinite(scores))
    print("KERNEL_OK")
</pallas_src>

<mosaic_0001>
module attributes {stable_mosaic.version = 11 : i64} {
  func.func @encode_project_kernel(%arg0: i32, %arg1: memref<16x8x16xbf16, #tpu.memory_space<vmem>>, %arg2: memref<16x32xbf16, #tpu.memory_space<vmem>>, %arg3: memref<3x16x16xbf16, #tpu.memory_space<vmem>>, %arg4: memref<1x16xf32, #tpu.memory_space<vmem>>, %arg5: memref<32x256xbf16, #tpu.memory_space<vmem>>, %arg6: memref<16x256xbf16, #tpu.memory_space<vmem>>, %arg7: memref<1x256xf32, #tpu.memory_space<vmem>>, %arg8: memref<16x256xf32, #tpu.memory_space<vmem>>) attributes {dimension_semantics = [#tpu.dimension_semantics<parallel>], iteration_bounds = array<i64: 1>, scalar_prefetch = 0 : i64, scratch_operands = 0 : i64, tpu.core_type = #tpu.core_type<tc>, window_params = [{transform_indices = @transform_0, window_bounds = array<i64: 16, 8, 16>}, {transform_indices = @transform_1, window_bounds = array<i64: 16, 32>}, {pipeline_mode = #tpu.pipeline_mode<synchronous>, transform_indices = @transform_2, window_bounds = array<i64: 3, 16, 16>}, {pipeline_mode = #tpu.pipeline_mode<synchronous>, transform_indices = @transform_3, window_bounds = array<i64: 1, 16>}, {pipeline_mode = #tpu.pipeline_mode<synchronous>, transform_indices = @transform_4, window_bounds = array<i64: 32, 256>}, {pipeline_mode = #tpu.pipeline_mode<synchronous>, transform_indices = @transform_5, window_bounds = array<i64: 16, 256>}, {pipeline_mode = #tpu.pipeline_mode<synchronous>, transform_indices = @transform_6, window_bounds = array<i64: 1, 256>}, {transform_indices = @transform_7, window_bounds = array<i64: 16, 256>}]} {
    %c0 = arith.constant 0 : index
    %c0_0 = arith.constant 0 : index
    %c0_1 = arith.constant 0 : index
    %0 = vector.load %arg1[%c0, %c0_0, %c0_1] : memref<16x8x16xbf16, #tpu.memory_space<vmem>>, vector<16x6x16xbf16>
    %c0_2 = arith.constant 0 : index
    %c0_3 = arith.constant 0 : index
    %c0_4 = arith.constant 0 : index
    %1 = vector.load %arg3[%c0_2, %c0_3, %c0_4] : memref<3x16x16xbf16, #tpu.memory_space<vmem>>, vector<1x16x16xbf16>
    %2 = vector.shape_cast %1 : vector<1x16x16xbf16> to vector<16x16xbf16>
    %cst = arith.constant dense<0.000000e+00> : vector<16x6x16xf32>
    %3 = tpu.matmul %0, %2, %cst {dimension_numbers = #tpu.dot_dimension_numbers<[2], [0], [0, 1], [1], [0, 0, 0, 1, 1, 1], [], []>} : vector<16x6x16xbf16>, vector<16x16xbf16>, vector<16x6x16xf32> -> vector<16x6x16xf32>
    %c0_5 = arith.constant 0 : index
    %c1 = arith.constant 1 : index
    %c0_6 = arith.constant 0 : index
    %4 = vector.load %arg1[%c0_5, %c1, %c0_6] : memref<16x8x16xbf16, #tpu.memory_space<vmem>>, vector<16x6x16xbf16>
    %c1_7 = arith.constant 1 : index
    %c0_8 = arith.constant 0 : index
    %c0_9 = arith.constant 0 : index
    %5 = vector.load %arg3[%c1_7, %c0_8, %c0_9] : memref<3x16x16xbf16, #tpu.memory_space<vmem>>, vector<1x16x16xbf16>
    %6 = vector.shape_cast %5 : vector<1x16x16xbf16> to vector<16x16xbf16>
    %cst_10 = arith.constant dense<0.000000e+00> : vector<16x6x16xf32>
    %7 = tpu.matmul %4, %6, %cst_10 {dimension_numbers = #tpu.dot_dimension_numbers<[2], [0], [0, 1], [1], [0, 0, 0, 1, 1, 1], [], []>} : vector<16x6x16xbf16>, vector<16x16xbf16>, vector<16x6x16xf32> -> vector<16x6x16xf32>
    %8 = arith.addf %3, %7 : vector<16x6x16xf32>
    %c0_11 = arith.constant 0 : index
    %c2 = arith.constant 2 : index
    %c0_12 = arith.constant 0 : index
    %9 = vector.load %arg1[%c0_11, %c2, %c0_12] : memref<16x8x16xbf16, #tpu.memory_space<vmem>>, vector<16x6x16xbf16>
    %c2_13 = arith.constant 2 : index
    %c0_14 = arith.constant 0 : index
    %c0_15 = arith.constant 0 : index
    %10 = vector.load %arg3[%c2_13, %c0_14, %c0_15] : memref<3x16x16xbf16, #tpu.memory_space<vmem>>, vector<1x16x16xbf16>
    %11 = vector.shape_cast %10 : vector<1x16x16xbf16> to vector<16x16xbf16>
    %cst_16 = arith.constant dense<0.000000e+00> : vector<16x6x16xf32>
    %12 = tpu.matmul %9, %11, %cst_16 {dimension_numbers = #tpu.dot_dimension_numbers<[2], [0], [0, 1], [1], [0, 0, 0, 1, 1, 1], [], []>} : vector<16x6x16xbf16>, vector<16x16xbf16>, vector<16x6x16xf32> -> vector<16x6x16xf32>
    %13 = arith.addf %8, %12 : vector<16x6x16xf32>
    %c0_17 = arith.constant 0 : index
    %c0_18 = arith.constant 0 : index
    %14 = vector.load %arg4[%c0_17, %c0_18] : memref<1x16xf32, #tpu.memory_space<vmem>>, vector<1x16xf32>
    %15 = vector.shape_cast %14 : vector<1x16xf32> to vector<1x1x16xf32>
    %16 = vector.broadcast %15 : vector<1x1x16xf32> to vector<16x6x16xf32>
    %17 = arith.addf %13, %16 : vector<16x6x16xf32>
    %cst_19 = arith.constant 0.000000e+00 : f32
    %18 = vector.broadcast %cst_19 : f32 to vector<16x6x16xf32>
    %19 = arith.maximumf %17, %18 : vector<16x6x16xf32>
    %cst_20 = arith.constant dense<0xFF800000> : vector<16x16xf32>
    %20 = vector.multi_reduction <maximumf>, %19, %cst_20 [1] : vector<16x6x16xf32> to vector<16x16xf32>
    %c0_21 = arith.constant 0 : index
    %c0_22 = arith.constant 0 : index
    %21 = vector.load %arg2[%c0_21, %c0_22] : memref<16x32xbf16, #tpu.memory_space<vmem>>, vector<16x32xbf16>
    %c0_23 = arith.constant 0 : index
    %c0_24 = arith.constant 0 : index
    %22 = vector.load %arg5[%c0_23, %c0_24] : memref<32x256xbf16, #tpu.memory_space<vmem>>, vector<32x256xbf16>
    %cst_25 = arith.constant dense<0.000000e+00> : vector<16x256xf32>
    %23 = tpu.matmul %21, %22, %cst_25 {dimension_numbers = #tpu.dot_dimension_numbers<[1], [0], [0], [1], [0, 0, 1, 1], [], []>} : vector<16x32xbf16>, vector<32x256xbf16>, vector<16x256xf32> -> vector<16x256xf32>
    %24 = arith.truncf %20 : vector<16x16xf32> to vector<16x16xbf16>
    %c0_26 = arith.constant 0 : index
    %c0_27 = arith.constant 0 : index
    %25 = vector.load %arg6[%c0_26, %c0_27] : memref<16x256xbf16, #tpu.memory_space<vmem>>, vector<16x256xbf16>
    %cst_28 = arith.constant dense<0.000000e+00> : vector<16x256xf32>
    %26 = tpu.matmul %24, %25, %cst_28 {dimension_numbers = #tpu.dot_dimension_numbers<[1], [0], [0], [1], [0, 0, 1, 1], [], []>} : vector<16x16xbf16>, vector<16x256xbf16>, vector<16x256xf32> -> vector<16x256xf32>
    %27 = arith.addf %23, %26 : vector<16x256xf32>
    %c0_29 = arith.constant 0 : index
    %c0_30 = arith.constant 0 : index
    %28 = vector.load %arg7[%c0_29, %c0_30] : memref<1x256xf32, #tpu.memory_space<vmem>>, vector<1x256xf32>
    %29 = vector.broadcast %28 : vector<1x256xf32> to vector<16x256xf32>
    %30 = arith.addf %27, %29 : vector<16x256xf32>
    %c0_31 = arith.constant 0 : index
    %c0_32 = arith.constant 0 : index
    %31 = vector.load %arg8[%c0_31, %c0_32] : memref<16x256xf32, #tpu.memory_space<vmem>>, vector<16x256xf32>
    tpu.vector_store %arg8[%c0_31, %c0_32], %30 {strides = array<i32>} : memref<16x256xf32, #tpu.memory_space<vmem>>, vector<16x256xf32>,
    return
  }
  func.func @transform_0(%arg0: i32) -> (i32, i32, i32) {
    %c0_i32 = arith.constant 0 : i32
    %c0_i32_0 = arith.constant 0 : i32
    %c0_i32_1 = arith.constant 0 : i32
    return %arg0, %c0_i32, %c0_i32_0 : i32, i32, i32
  }
  func.func @transform_1(%arg0: i32) -> (i32, i32) {
    %c0_i32 = arith.constant 0 : i32
    %c0_i32_0 = arith.constant 0 : i32
    return %arg0, %c0_i32 : i32, i32
  }
  func.func @transform_2(%arg0: i32) -> (i32, i32, i32) {
    %c0_i32 = arith.constant 0 : i32
    %c0_i32_0 = arith.constant 0 : i32
    %c0_i32_1 = arith.constant 0 : i32
    %c0_i32_2 = arith.constant 0 : i32
    return %c0_i32, %c0_i32_0, %c0_i32_1 : i32, i32, i32
  }
  func.func @transform_3(%arg0: i32) -> (i32, i32) {
    %c0_i32 = arith.constant 0 : i32
    %c0_i32_0 = arith.constant 0 : i32
    %c0_i32_1 = arith.constant 0 : i32
    return %c0_i32, %c0_i32_0 : i32, i32
  }
  func.func @transform_4(%arg0: i32) -> (i32, i32) {
    %c0_i32 = arith.constant 0 : i32
    %c0_i32_0 = arith.constant 0 : i32
    %c0_i32_1 = arith.constant 0 : i32
    return %c0_i32, %c0_i32_0 : i32, i32
  }
  func.func @transform_5(%arg0: i32) -> (i32, i32) {
    %c0_i32 = arith.constant 0 : i32
    %c0_i32_0 = arith.constant 0 : i32
    %c0_i32_1 = arith.constant 0 : i32
    return %c0_i32, %c0_i32_0 : i32, i32
  }
  func.func @transform_6(%arg0: i32) -> (i32, i32) {
    %c0_i32 = arith.constant 0 : i32
    %c0_i32_0 = arith.constant 0 : i32
    %c0_i32_1 = arith.constant 0 : i32
    return %c0_i32, %c0_i32_0 : i32, i32
  }
  func.func @transform_7(%arg0: i32) -> (i32, i32) {
    %c0_i32 = arith.constant 0 : i32
    %c0_i32_0 = arith.constant 0 : i32
    return %arg0, %c0_i32 : i32, i32
  }
}

module attributes {stable_mosaic.version = 11 : i64} {
  func.func @bilstm_tag_kernel(%arg0: memref<16x256xf32, #tpu.memory_space<vmem>>, %arg1: memref<64x256xf32, #tpu.memory_space<vmem>>, %arg2: memref<64x128xf32, #tpu.memory_space<vmem>>, %arg3: memref<1x128xf32, #tpu.memory_space<vmem>>, %arg4: memref<16x128xf32, #tpu.memory_space<vmem>>, %arg5: memref<16x32xf32, #tpu.memory_space<vmem>>, %arg6: memref<16x32xf32, #tpu.memory_space<vmem>>) attributes {dimension_semantics = [], scalar_prefetch = 0 : i64, scratch_operands = 2 : i64, tpu.core_type = #tpu.core_type<tc>} {
    %c0 = arith.constant 0 : index
    %c0_0 = arith.constant 0 : index
    %0 = vector.load %arg1[%c0, %c0_0] : memref<64x256xf32, #tpu.memory_space<vmem>>, vector<64x256xf32>
    %cst = arith.constant 0.000000e+00 : f32
    %1 = vector.broadcast %cst : f32 to vector<2x32xf32>
    %c0_i32 = arith.constant 0 : i32
    %c7_i32 = arith.constant 7 : i32
    %2 = arith.subi %c7_i32, %c0_i32 : i32
    %3 = tpu.concatenate %1, %1 in 1 : vector<2x32xf32>, vector<2x32xf32> -> vector<2x64xf32>
    %cst_1 = arith.constant dense<0.000000e+00> : vector<2x256xf32>
    %4 = tpu.matmul %3, %0, %cst_1 {dimension_numbers = #tpu.dot_dimension_numbers<[1], [0], [0], [1], [0, 0, 1, 1], [], []>} : vector<2x64xf32>, vector<64x256xf32>, vector<2x256xf32> -> vector<2x256xf32>
    %c2_i32 = arith.constant 2 : i32
    %5 = arith.muli %c0_i32, %c2_i32 : i32
    %6 = arith.index_cast %5 : i32 to index
    %c0_2 = arith.constant 0 : index
    %7 = vector.load %arg0[%6, %c0_2] : memref<16x256xf32, #tpu.memory_space<vmem>>, vector<2x128xf32>
    %8 = vector.extract_strided_slice %4 {offsets = [0, 0], sizes = [2, 128], strides = [1, 1]} : vector<2x256xf32> to vector<2x128xf32>
    %9 = arith.addf %7, %8 : vector<2x128xf32>
    %c2_i32_3 = arith.constant 2 : i32
    %10 = arith.muli %2, %c2_i32_3 : i32
    %11 = arith.index_cast %10 : i32 to index
    %c128 = arith.constant 128 : index
    %12 = vector.load %arg0[%11, %c128] : memref<16x256xf32, #tpu.memory_space<vmem>>, vector<2x128xf32>
    %13 = vector.extract_strided_slice %4 {offsets = [0, 128], sizes = [2, 128], strides = [1, 1]} : vector<2x256xf32> to vector<2x128xf32>
    %14 = arith.addf %12, %13 : vector<2x128xf32>
    %15 = vector.extract_strided_slice %9 {offsets = [0, 0], sizes = [2, 32], strides = [1, 1]} : vector<2x128xf32> to vector<2x32xf32>
    %16 = arith.negf %15 : vector<2x32xf32>
    %17 = math.exp %16 : vector<2x32xf32>
    %cst_4 = arith.constant 1.000000e+00 : f32
    %18 = vector.broadcast %cst_4 : f32 to vector<2x32xf32>
    %19 = arith.addf %18, %17 : vector<2x32xf32>
    %20 = arith.divf %18, %19 : vector<2x32xf32>
    %21 = vector.extract_strided_slice %14 {offsets = [0, 0], sizes = [2, 32], strides = [1, 1]} : vector<2x128xf32> to vector<2x32xf32>
    %22 = arith.negf %21 : vector<2x32xf32>
    %23 = math.exp %22 : vector<2x32xf32>
    %cst_5 = arith.constant 1.000000e+00 : f32
    %24 = vector.broadcast %cst_5 : f32 to vector<2x32xf32>
    %25 = arith.addf %24, %23 : vector<2x32xf32>
    %26 = arith.divf %24, %25 : vector<2x32xf32>
    %27 = vector.extract_strided_slice %9 {offsets = [0, 32], sizes = [2, 32], strides = [1, 1]} : vector<2x128xf32> to vector<2x32xf32>
    %28 = arith.negf %27 : vector<2x32xf32>
    %29 = math.exp %28 : vector<2x32xf32>
    %cst_6 = arith.constant 1.000000e+00 : f32
    %30 = vector.broadcast %cst_6 : f32 to vector<2x32xf32>
    %31 = arith.addf %30, %29 : vector<2x32xf32>
    %32 = arith.divf %30, %31 : vector<2x32xf32>
    %33 = vector.extract_strided_slice %14 {offsets = [0, 32], sizes = [2, 32], strides = [1, 1]} : vector<2x128xf32> to vector<2x32xf32>
    %34 = arith.negf %33 : vector<2x32xf32>
    %35 = math.exp %34 : vector<2x32xf32>
    %cst_7 = arith.constant 1.000000e+00 : f32
    %36 = vector.broadcast %cst_7 : f32 to vector<2x32xf32>
    %37 = arith.addf %36, %35 : vector<2x32xf32>
    %38 = arith.divf %36, %37 : vector<2x32xf32>
    %39 = vector.extract_strided_slice %9 {offsets = [0, 64], sizes = [2, 32], strides = [1, 1]} : vector<2x128xf32> to vector<2x32xf32>
    %40 = math.tanh %39 : vector<2x32xf32>
    %41 = vector.extract_strided_slice %14 {offsets = [0, 64], sizes = [2, 32], strides = [1, 1]} : vector<2x128xf32> to vector<2x32xf32>
    %42 = math.tanh %41 : vector<2x32xf32>
    %43 = vector.extract_strided_slice %9 {offsets = [0, 96], sizes = [2, 32], strides = [1, 1]} : vector<2x128xf32> to vector<2x32xf32>
    %44 = arith.negf %43 : vector<2x32xf32>
    %45 = math.exp %44 : vector<2x32xf32>
    %cst_8 = arith.constant 1.000000e+00 : f32
    %46 = vector.broadcast %cst_8 : f32 to vector<2x32xf32>
    %47 = arith.addf %46, %45 : vector<2x32xf32>
    %48 = arith.divf %46, %47 : vector<2x32xf32>
    %49 = vector.extract_strided_slice %14 {offsets = [0, 96], sizes = [2, 32], strides = [1, 1]} : vector<2x128xf32> to vector<2x32xf32>
    %50 = arith.negf %49 : vector<2x32xf32>
    %51 = math.exp %50 : vector<2x32xf32>
    %cst_9 = arith.constant 1.000000e+00 : f32
    %52 = vector.broadcast %cst_9 : f32 to vector<2x32xf32>
    %53 = arith.addf %52, %51 : vector<2x32xf32>
    %54 = arith.divf %52, %53 : vector<2x32xf32>
    %55 = arith.mulf %32, %1 : vector<2x32xf32>
    %56 = arith.mulf %20, %40 : vector<2x32xf32>
    %57 = arith.addf %55, %56 : vector<2x32xf32>
    %58 = arith.mulf %38, %1 : vector<2x32xf32>
    %59 = arith.mulf %26, %42 : vector<2x32xf32>
    %60 = arith.addf %58, %59 : vector<2x32xf32>
    %61 = math.tanh %57 : vector<2x32xf32>
    %62 = arith.mulf %48, %61 : vector<2x32xf32>
    %63 = math.tanh %60 : vector<2x32xf32>
    %64 = arith.mulf %54, %63 : vector<2x32xf32>
    %c2_i32_10 = arith.constant 2 : i32
    %65 = arith.muli %c0_i32, %c2_i32_10 : i32
    %66 = arith.index_cast %65 : i32 to index
    %c0_11 = arith.constant 0 : index
    %67 = vector.load %arg5[%66, %c0_11] : memref<16x32xf32, #tpu.memory_space<vmem>>, vector<2x32xf32>
    tpu.vector_store %arg5[%66, %c0_11], %62 {strides = array<i32>} : memref<16x32xf32, #tpu.memory_space<vmem>>, vector<2x32xf32>,
    %c2_i32_12 = arith.constant 2 : i32
    %68 = arith.muli %2, %c2_i32_12 : i32
    %69 = arith.index_cast %68 : i32 to index
    %c0_13 = arith.constant 0 : index
    %70 = vector.load %arg6[%69, %c0_13] : memref<16x32xf32, #tpu.memory_space<vmem>>, vector<2x32xf32>
    tpu.vector_store %arg6[%69, %c0_13], %64 {strides = array<i32>} : memref<16x32xf32, #tpu.memory_space<vmem>>, vector<2x32xf32>,
    %c1_i32 = arith.constant 1 : i32
    %c7_i32_14 = arith.constant 7 : i32
    %71 = arith.subi %c7_i32_14, %c1_i32 : i32
    %72 = tpu.concatenate %62, %64 in 1 : vector<2x32xf32>, vector<2x32xf32> -> vector<2x64xf32>
    %cst_15 = arith.constant dense<0.000000e+00> : vector<2x256xf32>
    %73 = tpu.matmul %72, %0, %cst_15 {dimension_numbers = #tpu.dot_dimension_numbers<[1], [0], [0], [1], [0, 0, 1, 1], [], []>} : vector<2x64xf32>, vector<64x256xf32>, vector<2x256xf32> -> vector<2x256xf32>
    %c2_i32_16 = arith.constant 2 : i32
    %74 = arith.muli %c1_i32, %c2_i32_16 : i32
    %75 = arith.index_cast %74 : i32 to index
    %c0_17 = arith.constant 0 : index
    %76 = vector.load %arg0[%75, %c0_17] : memref<16x256xf32, #tpu.memory_space<vmem>>, vector<2x128xf32>
    %77 = vector.extract_strided_slice %73 {offsets = [0, 0], sizes = [2, 128], strides = [1, 1]} : vector<2x256xf32> to vector<2x128xf32>
    %78 = arith.addf %76, %77 : vector<2x128xf32>
    %c2_i32_18 = arith.constant 2 : i32
    %79 = arith.muli %71, %c2_i32_18 : i32
    %80 = arith.index_cast %79 : i32 to index
    %c128_19 = arith.constant 128 : index
    %81 = vector.load %arg0[%80, %c128_19] : memref<16x256xf32, #tpu.memory_space<vmem>>, vector<2x128xf32>
    %82 = vector.extract_strided_slice %73 {offsets = [0, 128], sizes = [2, 128], strides = [1, 1]} : vector<2x256xf32> to vector<2x128xf32>
    %83 = arith.addf %81, %82 : vector<2x128xf32>
    %84 = vector.extract_strided_slice %78 {offsets = [0, 0], sizes = [2, 32], strides = [1, 1]} : vector<2x128xf32> to vector<2x32xf32>
    %85 = arith.negf %84 : vector<2x32xf32>
    %86 = math.exp %85 : vector<2x32xf32>
    %cst_20 = arith.constant 1.000000e+00 : f32
    %87 = vector.broadcast %cst_20 : f32 to vector<2x32xf32>
    %88 = arith.addf %87, %86 : vector<2x32xf32>
    %89 = arith.divf %87, %88 : vector<2x32xf32>
    %90 = vector.extract_strided_slice %83 {offsets = [0, 0], sizes = [2, 32], strides = [1, 1]} : vector<2x128xf32> to vector<2x32xf32>
    %91 = arith.negf %90 : vector<2x32xf32>
    %92 = math.exp %91 : vector<2x32xf32>
    %cst_21 = arith.constant 1.000000e+00 : f32
    %93 = vector.broadcast %cst_21 : f32 to vector<2x32xf32>
    %94 = arith.addf %93, %92 : vector<2x32xf32>
    %95 = arith.divf %93, %94 : vector<2x32xf32>
    %96 = vector.extract_strided_slice %78 {offsets = [0, 32], sizes = [2, 32], strides = [1, 1]} : vector<2x128xf32> to vector<2x32xf32>
    %97 = arith.negf %96 : vector<2x32xf32>
    %98 = math.exp %97 : vector<2x32xf32>
    %cst_22 = arith.constant 1.000000e+00 : f32
    %99 = vector.broadcast %cst_22 : f32 to vector<2x32xf32>
    %100 = arith.addf %99, %98 : vector<2x32xf32>
    %101 = arith.divf %99, %100 : vector<2x32xf32>
    %102 = vector.extract_strided_slice %83 {offsets = [0, 32], sizes = [2, 32], strides = [1, 1]} : vector<2x128xf32> to vector<2x32xf32>
    %103 = arith.negf %102 : vector<2x32xf32>
    %104 = math.exp %103 : vector<2x32xf32>
    %cst_23 = arith.constant 1.000000e+00 : f32
    %105 = vector.broadcast %cst_23 : f32 to vector<2x32xf32>
    %106 = arith.addf %105, %104 : vector<2x32xf32>
    %107 = arith.divf %105, %106 : vector<2x32xf32>
    %108 = vector.extract_strided_slice %78 {offsets = [0, 64], sizes = [2, 32], strides = [1, 1]} : vector<2x128xf32> to vector<2x32xf32>
    %109 = math.tanh %108 : vector<2x32xf32>
    %110 = vector.extract_strided_slice %83 {offsets = [0, 64], sizes = [2, 32], strides = [1, 1]} : vector<2x128xf32> to vector<2x32xf32>
    %111 = math.tanh %110 : vector<2x32xf32>
    %112 = vector.extract_strided_slice %78 {offsets = [0, 96], sizes = [2, 32], strides = [1, 1]} : vector<2x128xf32> to vector<2x32xf32>
    %113 = arith.negf %112 : vector<2x32xf32>
    %114 = math.exp %113 : vector<2x32xf32>
    %cst_24 = arith.constant 1.000000e+00 : f32
    %115 = vector.broadcast %cst_24 : f32 to vector<2x32xf32>
    %116 = arith.addf %115, %114 : vector<2x32xf32>
    %117 = arith.divf %115, %116 : vector<2x32xf32>
    %118 = vector.extract_strided_slice %83 {offsets = [0, 96], sizes = [2, 32], strides = [1, 1]} : vector<2x128xf32> to vector<2x32xf32>
    %119 = arith.negf %118 : vector<2x32xf32>
    %120 = math.exp %119 : vector<2x32xf32>
    %cst_25 = arith.constant 1.000000e+00 : f32
    %121 = vector.broadcast %cst_25 : f32 to vector<2x32xf32>
    %122 = arith.addf %121, %120 : vector<2x32xf32>
    %123 = arith.divf %121, %122 : vector<2x32xf32>
    %124 = arith.mulf %101, %57 : vector<2x32xf32>
    %125 = arith.mulf %89, %109 : vector<2x32xf32>
    %126 = arith.addf %124, %125 : vector<2x32xf32>
    %127 = arith.mulf %107, %60 : vector<2x32xf32>
    %128 = arith.mulf %95, %111 : vector<2x32xf32>
    %129 = arith.addf %127, %128 : vector<2x32xf32>
    %130 = math.tanh %126 : vector<2x32xf32>
    %131 = arith.mulf %117, %130 : vector<2x32xf32>
    %132 = math.tanh %129 : vector<2x32xf32>
    %133 = arith.mulf %123, %132 : vector<2x32xf32>
    %c2_i32_26 = arith.constant 2 : i32
    %134 = arith.muli %c1_i32, %c2_i32_26 : i32
    %135 = arith.index_cast %134 : i32 to index
    %c0_27 = arith.constant 0 : index
    %136 = vector.load %arg5[%135, %c0_27] : memref<16x32xf32, #tpu.memory_space<vmem>>, vector<2x32xf32>
    tpu.vector_store %arg5[%135, %c0_27], %131 {strides = array<i32>} : memref<16x32xf32, #tpu.memory_space<vmem>>, vector<2x32xf32>,
    %c2_i32_28 = arith.constant 2 : i32
    %137 = arith.muli %71, %c2_i32_28 : i32
    %138 = arith.index_cast %137 : i32 to index
    %c0_29 = arith.constant 0 : index
    %139 = vector.load %arg6[%138, %c0_29] : memref<16x32xf32, #tpu.memory_space<vmem>>, vector<2x32xf32>
    tpu.vector_store %arg6[%138, %c0_29], %133 {strides = array<i32>} : memref<16x32xf32, #tpu.memory_space<vmem>>, vector<2x32xf32>,
    %c2_i32_30 = arith.constant 2 : i32
    %c7_i32_31 = arith.constant 7 : i32
    %140 = arith.subi %c7_i32_31, %c2_i32_30 : i32
    %141 = tpu.concatenate %131, %133 in 1 : vector<2x32xf32>, vector<2x32xf32> -> vector<2x64xf32>
    %cst_32 = arith.constant dense<0.000000e+00> : vector<2x256xf32>
    %142 = tpu.matmul %141, %0, %cst_32 {dimension_numbers = #tpu.dot_dimension_numbers<[1], [0], [0], [1], [0, 0, 1, 1], [], []>} : vector<2x64xf32>, vector<64x256xf32>, vector<2x256xf32> -> vector<2x256xf32>
    %c2_i32_33 = arith.constant 2 : i32
    %143 = arith.muli %c2_i32_30, %c2_i32_33 : i32
    %144 = arith.index_cast %143 : i32 to index
    %c0_34 = arith.constant 0 : index
    %145 = vector.load %arg0[%144, %c0_34] : memref<16x256xf32, #tpu.memory_space<vmem>>, vector<2x128xf32>
    %146 = vector.extract_strided_slice %142 {offsets = [0, 0], sizes = [2, 128], strides = [1, 1]} : vector<2x256xf32> to vector<2x128xf32>
    %147 = arith.addf %145, %146 : vector<2x128xf32>
    %c2_i32_35 = arith.constant 2 : i32
    %148 = arith.muli %140, %c2_i32_35 : i32
    %149 = arith.index_cast %148 : i32 to index
    %c128_36 = arith.constant 128 : index
    %150 = vector.load %arg0[%149, %c128_36] : memref<16x256xf32, #tpu.memory_space<vmem>>, vector<2x128xf32>
    %151 = vector.extract_strided_slice %142 {offsets = [0, 128], sizes = [2, 128], strides = [1, 1]} : vector<2x256xf32> to vector<2x128xf32>
    %152 = arith.addf %150, %151 : vector<2x128xf32>
    %153 = vector.extract_strided_slice %147 {offsets = [0, 0], sizes = [2, 32], strides = [1, 1]} : vector<2x128xf32> to vector<2x32xf32>
    %154 = arith.negf %153 : vector<2x32xf32>
    %155 = math.exp %154 : vector<2x32xf32>
    %cst_37 = arith.constant 1.000000e+00 : f32
    %156 = vector.broadcast %cst_37 : f32 to vector<2x32xf32>
    %157 = arith.addf %156, %155 : vector<2x32xf32>
    %158 = arith.divf %156, %157 : vector<2x32xf32>
    %159 = vector.extract_strided_slice %152 {offsets = [0, 0], sizes = [2, 32], strides = [1, 1]} : vector<2x128xf32> to vector<2x32xf32>
    %160 = arith.negf %159 : vector<2x32xf32>
    %161 = math.exp %160 : vector<2x32xf32>
    %cst_38 = arith.constant 1.000000e+00 : f32
    %162 = vector.broadcast %cst_38 : f32 to vector<2x32xf32>
    %163 = arith.addf %162, %161 : vector<2x32xf32>
    %164 = arith.divf %162, %163 : vector<2x32xf32>
    %165 = vector.extract_strided_slice %147 {offsets = [0, 32], sizes = [2, 32], strides = [1, 1]} : vector<2x128xf32> to vector<2x32xf32>
    %166 = arith.negf %165 : vector<2x32xf32>
    %167 = math.exp %166 : vector<2x32xf32>
    %cst_39 = arith.constant 1.000000e+00 : f32
    %168 = vector.broadcast %cst_39 : f32 to vector<2x32xf32>
    %169 = arith.addf %168, %167 : vector<2x32xf32>
    %170 = arith.divf %168, %169 : vector<2x32xf32>
    %171 = vector.extract_strided_slice %152 {offsets = [0, 32], sizes = [2, 32], strides = [1, 1]} : vector<2x128xf32> to vector<2x32xf32>
    %172 = arith.negf %171 : vector<2x32xf32>
    %173 = math.exp %172 : vector<2x32xf32>
    %cst_40 = arith.constant 1.000000e+00 : f32
    %174 = vector.broadcast %cst_40 : f32 to vector<2x32xf32>
    %175 = arith.addf %174, %173 : vector<2x32xf32>
    %176 = arith.divf %174, %175 : vector<2x32xf32>
    %177 = vector.extract_strided_slice %147 {offsets = [0, 64], sizes = [2, 32], strides = [1, 1]} : vector<2x128xf32> to vector<2x32xf32>
    %178 = math.tanh %177 : vector<2x32xf32>
    %179 = vector.extract_strided_slice %152 {offsets = [0, 64], sizes = [2, 32], strides = [1, 1]} : vector<2x128xf32> to vector<2x32xf32>
    %180 = math.tanh %179 : vector<2x32xf32>
    %181 = vector.extract_strided_slice %147 {offsets = [0, 96], sizes = [2, 32], strides = [1, 1]} : vector<2x128xf32> to vector<2x32xf32>
    %182 = arith.negf %181 : vector<2x32xf32>
    %183 = math.exp %182 : vector<2x32xf32>
    %cst_41 = arith.constant 1.000000e+00 : f32
    %184 = vector.broadcast %cst_41 : f32 to vector<2x32xf32>
    %185 = arith.addf %184, %183 : vector<2x32xf32>
    %186 = arith.divf %184, %185 : vector<2x32xf32>
    %187 = vector.extract_strided_slice %152 {offsets = [0, 96], sizes = [2, 32], strides = [1, 1]} : vector<2x128xf32> to vector<2x32xf32>
    %188 = arith.negf %187 : vector<2x32xf32>
    %189 = math.exp %188 : vector<2x32xf32>
    %cst_42 = arith.constant 1.000000e+00 : f32
    %190 = vector.broadcast %cst_42 : f32 to vector<2x32xf32>
    %191 = arith.addf %190, %189 : vector<2x32xf32>
    %192 = arith.divf %190, %191 : vector<2x32xf32>
    %193 = arith.mulf %170, %126 : vector<2x32xf32>
    %194 = arith.mulf %158, %178 : vector<2x32xf32>
    %195 = arith.addf %193, %194 : vector<2x32xf32>
    %196 = arith.mulf %176, %129 : vector<2x32xf32>
    %197 = arith.mulf %164, %180 : vector<2x32xf32>
    %198 = arith.addf %196, %197 : vector<2x32xf32>
    %199 = math.tanh %195 : vector<2x32xf32>
    %200 = arith.mulf %186, %199 : vector<2x32xf32>
    %201 = math.tanh %198 : vector<2x32xf32>
    %202 = arith.mulf %192, %201 : vector<2x32xf32>
    %c2_i32_43 = arith.constant 2 : i32
    %203 = arith.muli %c2_i32_30, %c2_i32_43 : i32
    %204 = arith.index_cast %203 : i32 to index
    %c0_44 = arith.constant 0 : index
    %205 = vector.load %arg5[%204, %c0_44] : memref<16x32xf32, #tpu.memory_space<vmem>>, vector<2x32xf32>
    tpu.vector_store %arg5[%204, %c0_44], %200 {strides = array<i32>} : memref<16x32xf32, #tpu.memory_space<vmem>>, vector<2x32xf32>,
    %c2_i32_45 = arith.constant 2 : i32
    %206 = arith.muli %140, %c2_i32_45 : i32
    %207 = arith.index_cast %206 : i32 to index
    %c0_46 = arith.constant 0 : index
    %208 = vector.load %arg6[%207, %c0_46] : memref<16x32xf32, #tpu.memory_space<vmem>>, vector<2x32xf32>
    tpu.vector_store %arg6[%207, %c0_46], %202 {strides = array<i32>} : memref<16x32xf32, #tpu.memory_space<vmem>>, vector<2x32xf32>,
    %c3_i32 = arith.constant 3 : i32
    %c7_i32_47 = arith.constant 7 : i32
    %209 = arith.subi %c7_i32_47, %c3_i32 : i32
    %210 = tpu.concatenate %200, %202 in 1 : vector<2x32xf32>, vector<2x32xf32> -> vector<2x64xf32>
    %cst_48 = arith.constant dense<0.000000e+00> : vector<2x256xf32>
    %211 = tpu.matmul %210, %0, %cst_48 {dimension_numbers = #tpu.dot_dimension_numbers<[1], [0], [0], [1], [0, 0, 1, 1], [], []>} : vector<2x64xf32>, vector<64x256xf32>, vector<2x256xf32> -> vector<2x256xf32>
    %c2_i32_49 = arith.constant 2 : i32
    %212 = arith.muli %c3_i32, %c2_i32_49 : i32
    %213 = arith.index_cast %212 : i32 to index
    %c0_50 = arith.constant 0 : index
    %214 = vector.load %arg0[%213, %c0_50] : memref<16x256xf32, #tpu.memory_space<vmem>>, vector<2x128xf32>
    %215 = vector.extract_strided_slice %211 {offsets = [0, 0], sizes = [2, 128], strides = [1, 1]} : vector<2x256xf32> to vector<2x128xf32>
    %216 = arith.addf %214, %215 : vector<2x128xf32>
    %c2_i32_51 = arith.constant 2 : i32
    %217 = arith.muli %209, %c2_i32_51 : i32
    %218 = arith.index_cast %217 : i32 to index
    %c128_52 = arith.constant 128 : index
    %219 = vector.load %arg0[%218, %c128_52] : memref<16x256xf32, #tpu.memory_space<vmem>>, vector<2x128xf32>
    %220 = vector.extract_strided_slice %211 {offsets = [0, 128], sizes = [2, 128], strides = [1, 1]} : vector<2x256xf32> to vector<2x128xf32>
    %221 = arith.addf %219, %220 : vector<2x128xf32>
    %222 = vector.extract_strided_slice %216 {offsets = [0, 0], sizes = [2, 32], strides = [1, 1]} : vector<2x128xf32> to vector<2x32xf32>
    %223 = arith.negf %222 : vector<2x32xf32>
    %224 = math.exp %223 : vector<2x32xf32>
    %cst_53 = arith.constant 1.000000e+00 : f32
    %225 = vector.broadcast %cst_53 : f32 to vector<2x32xf32>
    %226 = arith.addf %225, %224 : vector<2x32xf32>
    %227 = arith.divf %225, %226 : vector<2x32xf32>
    %228 = vector.extract_strided_slice %221 {offsets = [0, 0], sizes = [2, 32], strides = [1, 1]} : vector<2x128xf32> to vector<2x32xf32>
    %229 = arith.negf %228 : vector<2x32xf32>
    %230 = math.exp %229 : vector<2x32xf32>
    %cst_54 = arith.constant 1.000000e+00 : f32
    %231 = vector.broadcast %cst_54 : f32 to vector<2x32xf32>
    %232 = arith.addf %231, %230 : vector<2x32xf32>
    %233 = arith.divf %231, %232 : vector<2x32xf32>
    %234 = vector.extract_strided_slice %216 {offsets = [0, 32], sizes = [2, 32], strides = [1, 1]} : vector<2x128xf32> to vector<2x32xf32>
    %235 = arith.negf %234 : vector<2x32xf32>
    %236 = math.exp %235 : vector<2x32xf32>
    %cst_55 = arith.constant 1.000000e+00 : f32
    %237 = vector.broadcast %cst_55 : f32 to vector<2x32xf32>
    %238 = arith.addf %237, %236 : vector<2x32xf32>
    %239 = arith.divf %237, %238 : vector<2x32xf32>
    %240 = vector.extract_strided_slice %221 {offsets = [0, 32], sizes = [2, 32], strides = [1, 1]} : vector<2x128xf32> to vector<2x32xf32>
    %241 = arith.negf %240 : vector<2x32xf32>
    %242 = math.exp %241 : vector<2x32xf32>
    %cst_56 = arith.constant 1.000000e+00 : f32
    %243 = vector.broadcast %cst_56 : f32 to vector<2x32xf32>
    %244 = arith.addf %243, %242 : vector<2x32xf32>
    %245 = arith.divf %243, %244 : vector<2x32xf32>
    %246 = vector.extract_strided_slice %216 {offsets = [0, 64], sizes = [2, 32], strides = [1, 1]} : vector<2x128xf32> to vector<2x32xf32>
    %247 = math.tanh %246 : vector<2x32xf32>
    %248 = vector.extract_strided_slice %221 {offsets = [0, 64], sizes = [2, 32], strides = [1, 1]} : vector<2x128xf32> to vector<2x32xf32>
    %249 = math.tanh %248 : vector<2x32xf32>
    %250 = vector.extract_strided_slice %216 {offsets = [0, 96], sizes = [2, 32], strides = [1, 1]} : vector<2x128xf32> to vector<2x32xf32>
    %251 = arith.negf %250 : vector<2x32xf32>
    %252 = math.exp %251 : vector<2x32xf32>
    %cst_57 = arith.constant 1.000000e+00 : f32
    %253 = vector.broadcast %cst_57 : f32 to vector<2x32xf32>
    %254 = arith.addf %253, %252 : vector<2x32xf32>
    %255 = arith.divf %253, %254 : vector<2x32xf32>
    %256 = vector.extract_strided_slice %221 {offsets = [0, 96], sizes = [2, 32], strides = [1, 1]} : vector<2x128xf32> to vector<2x32xf32>
    %257 = arith.negf %256 : vector<2x32xf32>
    %258 = math.exp %257 : vector<2x32xf32>
    %cst_58 = arith.constant 1.000000e+00 : f32
    %259 = vector.broadcast %cst_58 : f32 to vector<2x32xf32>
    %260 = arith.addf %259, %258 : vector<2x32xf32>
    %261 = arith.divf %259, %260 : vector<2x32xf32>
    %262 = arith.mulf %239, %195 : vector<2x32xf32>
    %263 = arith.mulf %227, %247 : vector<2x32xf32>
    %264 = arith.addf %262, %263 : vector<2x32xf32>
    %265 = arith.mulf %245, %198 : vector<2x32xf32>
    %266 = arith.mulf %233, %249 : vector<2x32xf32>
    %267 = arith.addf %265, %266 : vector<2x32xf32>
    %268 = math.tanh %264 : vector<2x32xf32>
    %269 = arith.mulf %255, %268 : vector<2x32xf32>
    %270 = math.tanh %267 : vector<2x32xf32>
    %271 = arith.mulf %261, %270 : vector<2x32xf32>
    %c2_i32_59 = arith.constant 2 : i32
    %272 = arith.muli %c3_i32, %c2_i32_59 : i32
    %273 = arith.index_cast %272 : i32 to index
    %c0_60 = arith.constant 0 : index
    %274 = vector.load %arg5[%273, %c0_60] : memref<16x32xf32, #tpu.memory_space<vmem>>, vector<2x32xf32>
    tpu.vector_store %arg5[%273, %c0_60], %269 {strides = array<i32>} : memref<16x32xf32, #tpu.memory_space<vmem>>, vector<2x32xf32>,
    %c2_i32_61 = arith.constant 2 : i32
    %275 = arith.muli %209, %c2_i32_61 : i32
    %276 = arith.index_cast %275 : i32 to index
    %c0_62 = arith.constant 0 : index
    %277 = vector.load %arg6[%276, %c0_62] : memref<16x32xf32, #tpu.memory_space<vmem>>, vector<2x32xf32>
    tpu.vector_store %arg6[%276, %c0_62], %271 {strides = array<i32>} : memref<16x32xf32, #tpu.memory_space<vmem>>, vector<2x32xf32>,
    %c4_i32 = arith.constant 4 : i32
    %c7_i32_63 = arith.constant 7 : i32
    %278 = arith.subi %c7_i32_63, %c4_i32 : i32
    %279 = tpu.concatenate %269, %271 in 1 : vector<2x32xf32>, vector<2x32xf32> -> vector<2x64xf32>
    %cst_64 = arith.constant dense<0.000000e+00> : vector<2x256xf32>
    %280 = tpu.matmul %279, %0, %cst_64 {dimension_numbers = #tpu.dot_dimension_numbers<[1], [0], [0], [1], [0, 0, 1, 1], [], []>} : vector<2x64xf32>, vector<64x256xf32>, vector<2x256xf32> -> vector<2x256xf32>
    %c2_i32_65 = arith.constant 2 : i32
    %281 = arith.muli %c4_i32, %c2_i32_65 : i32
    %282 = arith.index_cast %281 : i32 to index
    %c0_66 = arith.constant 0 : index
    %283 = vector.load %arg0[%282, %c0_66] : memref<16x256xf32, #tpu.memory_space<vmem>>, vector<2x128xf32>
    %284 = vector.extract_strided_slice %280 {offsets = [0, 0], sizes = [2, 128], strides = [1, 1]} : vector<2x256xf32> to vector<2x128xf32>
    %285 = arith.addf %283, %284 : vector<2x128xf32>
    %c2_i32_67 = arith.constant 2 : i32
    %286 = arith.muli %278, %c2_i32_67 : i32
    %287 = arith.index_cast %286 : i32 to index
    %c128_68 = arith.constant 128 : index
    %288 = vector.load %arg0[%287, %c128_68] : memref<16x256xf32, #tpu.memory_space<vmem>>, vector<2x128xf32>
    %289 = vector.extract_strided_slice %280 {offsets = [0, 128], sizes = [2, 128], strides = [1, 1]} : vector<2x256xf32> to vector<2x128xf32>
    %290 = arith.addf %288, %289 : vector<2x128xf32>
    %291 = vector.extract_strided_slice %285 {offsets = [0, 0], sizes = [2, 32], strides = [1, 1]} : vector<2x128xf32> to vector<2x32xf32>
    %292 = arith.negf %291 : vector<2x32xf32>
    %293 = math.exp %292 : vector<2x32xf32>
    %cst_69 = arith.constant 1.000000e+00 : f32
    %294 = vector.broadcast %cst_69 : f32 to vector<2x32xf32>
    %295 = arith.addf %294, %293 : vector<2x32xf32>
    %296 = arith.divf %294, %295 : vector<2x32xf32>
    %297 = vector.extract_strided_slice %290 {offsets = [0, 0], sizes = [2, 32], strides = [1, 1]} : vector<2x128xf32> to vector<2x32xf32>
    %298 = arith.negf %297 : vector<2x32xf32>
    %299 = math.exp %298 : vector<2x32xf32>
    %cst_70 = arith.constant 1.000000e+00 : f32
    %300 = vector.broadcast %cst_70 : f32 to vector<2x32xf32>
    %301 = arith.addf %300, %299 : vector<2x32xf32>
    %302 = arith.divf %300, %301 : vector<2x32xf32>
    %303 = vector.extract_strided_slice %285 {offsets = [0, 32], sizes = [2, 32], strides = [1, 1]} : vector<2x128xf32> to vector<2x32xf32>
    %304 = arith.negf %303 : vector<2x32xf32>
    %305 = math.exp %304 : vector<2x32xf32>
    %cst_71 = arith.constant 1.000000e+00 : f32
    %306 = vector.broadcast %cst_71 : f32 to vector<2x32xf32>
    %307 = arith.addf %306, %305 : vector<2x32xf32>
    %308 = arith.divf %306, %307 : vector<2x32xf32>
    %309 = vector.extract_strided_slice %290 {offsets = [0, 32], sizes = [2, 32], strides = [1, 1]} : vector<2x128xf32> to vector<2x32xf32>
    %310 = arith.negf %309 : vector<2x32xf32>
    %311 = math.exp %310 : vector<2x32xf32>
    %cst_72 = arith.constant 1.000000e+00 : f32
    %312 = vector.broadcast %cst_72 : f32 to vector<2x32xf32>
    %313 = arith.addf %312, %311 : vector<2x32xf32>
    %314 = arith.divf %312, %313 : vector<2x32xf32>
    %315 = vector.extract_strided_slice %285 {offsets = [0, 64], sizes = [2, 32], strides = [1, 1]} : vector<2x128xf32> to vector<2x32xf32>
    %316 = math.tanh %315 : vector<2x32xf32>
    %317 = vector.extract_strided_slice %290 {offsets = [0, 64], sizes = [2, 32], strides = [1, 1]} : vector<2x128xf32> to vector<2x32xf32>
    %318 = math.tanh %317 : vector<2x32xf32>
    %319 = vector.extract_strided_slice %285 {offsets = [0, 96], sizes = [2, 32], strides = [1, 1]} : vector<2x128xf32> to vector<2x32xf32>
    %320 = arith.negf %319 : vector<2x32xf32>
    %321 = math.exp %320 : vector<2x32xf32>
    %cst_73 = arith.constant 1.000000e+00 : f32
    %322 = vector.broadcast %cst_73 : f32 to vector<2x32xf32>
    %323 = arith.addf %322, %321 : vector<2x32xf32>
    %324 = arith.divf %322, %323 : vector<2x32xf32>
    %325 = vector.extract_strided_slice %290 {offsets = [0, 96], sizes = [2, 32], strides = [1, 1]} : vector<2x128xf32> to vector<2x32xf32>
    %326 = arith.negf %325 : vector<2x32xf32>
    %327 = math.exp %326 : vector<2x32xf32>
    %cst_74 = arith.constant 1.000000e+00 : f32
    %328 = vector.broadcast %cst_74 : f32 to vector<2x32xf32>
    %329 = arith.addf %328, %327 : vector<2x32xf32>
    %330 = arith.divf %328, %329 : vector<2x32xf32>
    %331 = arith.mulf %308, %264 : vector<2x32xf32>
    %332 = arith.mulf %296, %316 : vector<2x32xf32>
    %333 = arith.addf %331, %332 : vector<2x32xf32>
    %334 = arith.mulf %314, %267 : vector<2x32xf32>
    %335 = arith.mulf %302, %318 : vector<2x32xf32>
    %336 = arith.addf %334, %335 : vector<2x32xf32>
    %337 = math.tanh %333 : vector<2x32xf32>
    %338 = arith.mulf %324, %337 : vector<2x32xf32>
    %339 = math.tanh %336 : vector<2x32xf32>
    %340 = arith.mulf %330, %339 : vector<2x32xf32>
    %c2_i32_75 = arith.constant 2 : i32
    %341 = arith.muli %c4_i32, %c2_i32_75 : i32
    %342 = arith.index_cast %341 : i32 to index
    %c0_76 = arith.constant 0 : index
    %343 = vector.load %arg5[%342, %c0_76] : memref<16x32xf32, #tpu.memory_space<vmem>>, vector<2x32xf32>
    tpu.vector_store %arg5[%342, %c0_76], %338 {strides = array<i32>} : memref<16x32xf32, #tpu.memory_space<vmem>>, vector<2x32xf32>,
    %c2_i32_77 = arith.constant 2 : i32
    %344 = arith.muli %278, %c2_i32_77 : i32
    %345 = arith.index_cast %344 : i32 to index
    %c0_78 = arith.constant 0 : index
    %346 = vector.load %arg6[%345, %c0_78] : memref<16x32xf32, #tpu.memory_space<vmem>>, vector<2x32xf32>
    tpu.vector_store %arg6[%345, %c0_78], %340 {strides = array<i32>} : memref<16x32xf32, #tpu.memory_space<vmem>>, vector<2x32xf32>,
    %c5_i32 = arith.constant 5 : i32
    %c7_i32_79 = arith.constant 7 : i32
    %347 = arith.subi %c7_i32_79, %c5_i32 : i32
    %348 = tpu.concatenate %338, %340 in 1 : vector<2x32xf32>, vector<2x32xf32> -> vector<2x64xf32>
    %cst_80 = arith.constant dense<0.000000e+00> : vector<2x256xf32>
    %349 = tpu.matmul %348, %0, %cst_80 {dimension_numbers = #tpu.dot_dimension_numbers<[1], [0], [0], [1], [0, 0, 1, 1], [], []>} : vector<2x64xf32>, vector<64x256xf32>, vector<2x256xf32> -> vector<2x256xf32>
    %c2_i32_81 = arith.constant 2 : i32
    %350 = arith.muli %c5_i32, %c2_i32_81 : i32
    %351 = arith.index_cast %350 : i32 to index
    %c0_82 = arith.constant 0 : index
    %352 = vector.load %arg0[%351, %c0_82] : memref<16x256xf32, #tpu.memory_space<vmem>>, vector<2x128xf32>
    %353 = vector.extract_strided_slice %349 {offsets = [0, 0], sizes = [2, 128], strides = [1, 1]} : vector<2x256xf32> to vector<2x128xf32>
    %354 = arith.addf %352, %353 : vector<2x128xf32>
    %c2_i32_83 = arith.constant 2 : i32
    %355 = arith.muli %347, %c2_i32_83 : i32
    %356 = arith.index_cast %355 : i32 to index
    %c128_84 = arith.constant 128 : index
    %357 = vector.load %arg0[%356, %c128_84] : memref<16x256xf32, #tpu.memory_space<vmem>>, vector<2x128xf32>
    %358 = vector.extract_strided_slice %349 {offsets = [0, 128], sizes = [2, 128], strides = [1, 1]} : vector<2x256xf32> to vector<2x128xf32>
    %359 = arith.addf %357, %358 : vector<2x128xf32>
    %360 = vector.extract_strided_slice %354 {offsets = [0, 0], sizes = [2, 32], strides = [1, 1]} : vector<2x128xf32> to vector<2x32xf32>
    %361 = arith.negf %360 : vector<2x32xf32>
    %362 = math.exp %361 : vector<2x32xf32>
    %cst_85 = arith.constant 1.000000e+00 : f32
    %363 = vector.broadcast %cst_85 : f32 to vector<2x32xf32>
    %364 = arith.addf %363, %362 : vector<2x32xf32>
    %365 = arith.divf %363, %364 : vector<2x32xf32>
    %366 = vector.extract_strided_slice %359 {offsets = [0, 0], sizes = [2, 32], strides = [1, 1]} : vector<2x128xf32> to vector<2x32xf32>
    %367 = arith.negf %366 : vector<2x32xf32>
    %368 = math.exp %367 : vector<2x32xf32>
    %cst_86 = arith.constant 1.000000e+00 : f32
    %369 = vector.broadcast %cst_86 : f32 to vector<2x32xf32>
    %370 = arith.addf %369, %368 : vector<2x32xf32>
    %371 = arith.divf %369, %370 : vector<2x32xf32>
    %372 = vector.extract_strided_slice %354 {offsets = [0, 32], sizes = [2, 32], strides = [1, 1]} : vector<2x128xf32> to vector<2x32xf32>
    %373 = arith.negf %372 : vector<2x32xf32>
    %374 = math.exp %373 : vector<2x32xf32>
    %cst_87 = arith.constant 1.000000e+00 : f32
    %375 = vector.broadcast %cst_87 : f32 to vector<2x32xf32>
    %376 = arith.addf %375, %374 : vector<2x32xf32>
    %377 = arith.divf %375, %376 : vector<2x32xf32>
    %378 = vector.extract_strided_slice %359 {offsets = [0, 32], sizes = [2, 32], strides = [1, 1]} : vector<2x128xf32> to vector<2x32xf32>
    %379 = arith.negf %378 : vector<2x32xf32>
    %380 = math.exp %379 : vector<2x32xf32>
    %cst_88 = arith.constant 1.000000e+00 : f32
    %381 = vector.broadcast %cst_88 : f32 to vector<2x32xf32>
    %382 = arith.addf %381, %380 : vector<2x32xf32>
    %383 = arith.divf %381, %382 : vector<2x32xf32>
    %384 = vector.extract_strided_slice %354 {offsets = [0, 64], sizes = [2, 32], strides = [1, 1]} : vector<2x128xf32> to vector<2x32xf32>
    %385 = math.tanh %384 : vector<2x32xf32>
    %386 = vector.extract_strided_slice %359 {offsets = [0, 64], sizes = [2, 32], strides = [1, 1]} : vector<2x128xf32> to vector<2x32xf32>
    %387 = math.tanh %386 : vector<2x32xf32>
    %388 = vector.extract_strided_slice %354 {offsets = [0, 96], sizes = [2, 32], strides = [1, 1]} : vector<2x128xf32> to vector<2x32xf32>
    %389 = arith.negf %388 : vector<2x32xf32>
    %390 = math.exp %389 : vector<2x32xf32>
    %cst_89 = arith.constant 1.000000e+00 : f32
    %391 = vector.broadcast %cst_89 : f32 to vector<2x32xf32>
    %392 = arith.addf %391, %390 : vector<2x32xf32>
    %393 = arith.divf %391, %392 : vector<2x32xf32>
    %394 = vector.extract_strided_slice %359 {offsets = [0, 96], sizes = [2, 32], strides = [1, 1]} : vector<2x128xf32> to vector<2x32xf32>
    %395 = arith.negf %394 : vector<2x32xf32>
    %396 = math.exp %395 : vector<2x32xf32>
    %cst_90 = arith.constant 1.000000e+00 : f32
    %397 = vector.broadcast %cst_90 : f32 to vector<2x32xf32>
    %398 = arith.addf %397, %396 : vector<2x32xf32>
    %399 = arith.divf %397, %398 : vector<2x32xf32>
    %400 = arith.mulf %377, %333 : vector<2x32xf32>
    %401 = arith.mulf %365, %385 : vector<2x32xf32>
    %402 = arith.addf %400, %401 : vector<2x32xf32>
    %403 = arith.mulf %383, %336 : vector<2x32xf32>
    %404 = arith.mulf %371, %387 : vector<2x32xf32>
    %405 = arith.addf %403, %404 : vector<2x32xf32>
    %406 = math.tanh %402 : vector<2x32xf32>
    %407 = arith.mulf %393, %406 : vector<2x32xf32>
    %408 = math.tanh %405 : vector<2x32xf32>
    %409 = arith.mulf %399, %408 : vector<2x32xf32>
    %c2_i32_91 = arith.constant 2 : i32
    %410 = arith.muli %c5_i32, %c2_i32_91 : i32
    %411 = arith.index_cast %410 : i32 to index
    %c0_92 = arith.constant 0 : index
    %412 = vector.load %arg5[%411, %c0_92] : memref<16x32xf32, #tpu.memory_space<vmem>>, vector<2x32xf32>
    tpu.vector_store %arg5[%411, %c0_92], %407 {strides = array<i32>} : memref<16x32xf32, #tpu.memory_space<vmem>>, vector<2x32xf32>,
    %c2_i32_93 = arith.constant 2 : i32
    %413 = arith.muli %347, %c2_i32_93 : i32
    %414 = arith.index_cast %413 : i32 to index
    %c0_94 = arith.constant 0 : index
    %415 = vector.load %arg6[%414, %c0_94] : memref<16x32xf32, #tpu.memory_space<vmem>>, vector<2x32xf32>
    tpu.vector_store %arg6[%414, %c0_94], %409 {strides = array<i32>} : memref<16x32xf32, #tpu.memory_space<vmem>>, vector<2x32xf32>,
    %c6_i32 = arith.constant 6 : i32
    %c7_i32_95 = arith.constant 7 : i32
    %416 = arith.subi %c7_i32_95, %c6_i32 : i32
    %417 = tpu.concatenate %407, %409 in 1 : vector<2x32xf32>, vector<2x32xf32> -> vector<2x64xf32>
    %cst_96 = arith.constant dense<0.000000e+00> : vector<2x256xf32>
    %418 = tpu.matmul %417, %0, %cst_96 {dimension_numbers = #tpu.dot_dimension_numbers<[1], [0], [0], [1], [0, 0, 1, 1], [], []>} : vector<2x64xf32>, vector<64x256xf32>, vector<2x256xf32> -> vector<2x256xf32>
    %c2_i32_97 = arith.constant 2 : i32
    %419 = arith.muli %c6_i32, %c2_i32_97 : i32
    %420 = arith.index_cast %419 : i32 to index
    %c0_98 = arith.constant 0 : index
    %421 = vector.load %arg0[%420, %c0_98] : memref<16x256xf32, #tpu.memory_space<vmem>>, vector<2x128xf32>
    %422 = vector.extract_strided_slice %418 {offsets = [0, 0], sizes = [2, 128], strides = [1, 1]} : vector<2x256xf32> to vector<2x128xf32>
    %423 = arith.addf %421, %422 : vector<2x128xf32>
    %c2_i32_99 = arith.constant 2 : i32
    %424 = arith.muli %416, %c2_i32_99 : i32
    %425 = arith.index_cast %424 : i32 to index
    %c128_100 = arith.constant 128 : index
    %426 = vector.load %arg0[%425, %c128_100] : memref<16x256xf32, #tpu.memory_space<vmem>>, vector<2x128xf32>
    %427 = vector.extract_strided_slice %418 {offsets = [0, 128], sizes = [2, 128], strides = [1, 1]} : vector<2x256xf32> to vector<2x128xf32>
    %428 = arith.addf %426, %427 : vector<2x128xf32>
    %429 = vector.extract_strided_slice %423 {offsets = [0, 0], sizes = [2, 32], strides = [1, 1]} : vector<2x128xf32> to vector<2x32xf32>
    %430 = arith.negf %429 : vector<2x32xf32>
    %431 = math.exp %430 : vector<2x32xf32>
    %cst_101 = arith.constant 1.000000e+00 : f32
    %432 = vector.broadcast %cst_101 : f32 to vector<2x32xf32>
    %433 = arith.addf %432, %431 : vector<2x32xf32>
    %434 = arith.divf %432, %433 : vector<2x32xf32>
    %435 = vector.extract_strided_slice %428 {offsets = [0, 0], sizes = [2, 32], strides = [1, 1]} : vector<2x128xf32> to vector<2x32xf32>
    %436 = arith.negf %435 : vector<2x32xf32>
    %437 = math.exp %436 : vector<2x32xf32>
    %cst_102 = arith.constant 1.000000e+00 : f32
    %438 = vector.broadcast %cst_102 : f32 to vector<2x32xf32>
    %439 = arith.addf %438, %437 : vector<2x32xf32>
    %440 = arith.divf %438, %439 : vector<2x32xf32>
    %441 = vector.extract_strided_slice %423 {offsets = [0, 32], sizes = [2, 32], strides = [1, 1]} : vector<2x128xf32> to vector<2x32xf32>
    %442 = arith.negf %441 : vector<2x32xf32>
    %443 = math.exp %442 : vector<2x32xf32>
    %cst_103 = arith.constant 1.000000e+00 : f32
    %444 = vector.broadcast %cst_103 : f32 to vector<2x32xf32>
    %445 = arith.addf %444, %443 : vector<2x32xf32>
    %446 = arith.divf %444, %445 : vector<2x32xf32>
    %447 = vector.extract_strided_slice %428 {offsets = [0, 32], sizes = [2, 32], strides = [1, 1]} : vector<2x128xf32> to vector<2x32xf32>
    %448 = arith.negf %447 : vector<2x32xf32>
    %449 = math.exp %448 : vector<2x32xf32>
    %cst_104 = arith.constant 1.000000e+00 : f32
    %450 = vector.broadcast %cst_104 : f32 to vector<2x32xf32>
    %451 = arith.addf %450, %449 : vector<2x32xf32>
    %452 = arith.divf %450, %451 : vector<2x32xf32>
    %453 = vector.extract_strided_slice %423 {offsets = [0, 64], sizes = [2, 32], strides = [1, 1]} : vector<2x128xf32> to vector<2x32xf32>
    %454 = math.tanh %453 : vector<2x32xf32>
    %455 = vector.extract_strided_slice %428 {offsets = [0, 64], sizes = [2, 32], strides = [1, 1]} : vector<2x128xf32> to vector<2x32xf32>
    %456 = math.tanh %455 : vector<2x32xf32>
    %457 = vector.extract_strided_slice %423 {offsets = [0, 96], sizes = [2, 32], strides = [1, 1]} : vector<2x128xf32> to vector<2x32xf32>
    %458 = arith.negf %457 : vector<2x32xf32>
    %459 = math.exp %458 : vector<2x32xf32>
    %cst_105 = arith.constant 1.000000e+00 : f32
    %460 = vector.broadcast %cst_105 : f32 to vector<2x32xf32>
    %461 = arith.addf %460, %459 : vector<2x32xf32>
    %462 = arith.divf %460, %461 : vector<2x32xf32>
    %463 = vector.extract_strided_slice %428 {offsets = [0, 96], sizes = [2, 32], strides = [1, 1]} : vector<2x128xf32> to vector<2x32xf32>
    %464 = arith.negf %463 : vector<2x32xf32>
    %465 = math.exp %464 : vector<2x32xf32>
    %cst_106 = arith.constant 1.000000e+00 : f32
    %466 = vector.broadcast %cst_106 : f32 to vector<2x32xf32>
    %467 = arith.addf %466, %465 : vector<2x32xf32>
    %468 = arith.divf %466, %467 : vector<2x32xf32>
    %469 = arith.mulf %446, %402 : vector<2x32xf32>
    %470 = arith.mulf %434, %454 : vector<2x32xf32>
    %471 = arith.addf %469, %470 : vector<2x32xf32>
    %472 = arith.mulf %452, %405 : vector<2x32xf32>
    %473 = arith.mulf %440, %456 : vector<2x32xf32>
    %474 = arith.addf %472, %473 : vector<2x32xf32>
    %475 = math.tanh %471 : vector<2x32xf32>
    %476 = arith.mulf %462, %475 : vector<2x32xf32>
    %477 = math.tanh %474 : vector<2x32xf32>
    %478 = arith.mulf %468, %477 : vector<2x32xf32>
    %c2_i32_107 = arith.constant 2 : i32
    %479 = arith.muli %c6_i32, %c2_i32_107 : i32
    %480 = arith.index_cast %479 : i32 to index
    %c0_108 = arith.constant 0 : index
    %481 = vector.load %arg5[%480, %c0_108] : memref<16x32xf32, #tpu.memory_space<vmem>>, vector<2x32xf32>
    tpu.vector_store %arg5[%480, %c0_108], %476 {strides = array<i32>} : memref<16x32xf32, #tpu.memory_space<vmem>>, vector<2x32xf32>,
    %c2_i32_109 = arith.constant 2 : i32
    %482 = arith.muli %416, %c2_i32_109 : i32
    %483 = arith.index_cast %482 : i32 to index
    %c0_110 = arith.constant 0 : index
    %484 = vector.load %arg6[%483, %c0_110] : memref<16x32xf32, #tpu.memory_space<vmem>>, vector<2x32xf32>
    tpu.vector_store %arg6[%483, %c0_110], %478 {strides = array<i32>} : memref<16x32xf32, #tpu.memory_space<vmem>>, vector<2x32xf32>,
    %c7_i32_111 = arith.constant 7 : i32
    %c7_i32_112 = arith.constant 7 : i32
    %485 = arith.subi %c7_i32_112, %c7_i32_111 : i32
    %486 = tpu.concatenate %476, %478 in 1 : vector<2x32xf32>, vector<2x32xf32> -> vector<2x64xf32>
    %cst_113 = arith.constant dense<0.000000e+00> : vector<2x256xf32>
    %487 = tpu.matmul %486, %0, %cst_113 {dimension_numbers = #tpu.dot_dimension_numbers<[1], [0], [0], [1], [0, 0, 1, 1], [], []>} : vector<2x64xf32>, vector<64x256xf32>, vector<2x256xf32> -> vector<2x256xf32>
    %c2_i32_114 = arith.constant 2 : i32
    %488 = arith.muli %c7_i32_111, %c2_i32_114 : i32
    %489 = arith.index_cast %488 : i32 to index
    %c0_115 = arith.constant 0 : index
    %490 = vector.load %arg0[%489, %c0_115] : memref<16x256xf32, #tpu.memory_space<vmem>>, vector<2x128xf32>
    %491 = vector.extract_strided_slice %487 {offsets = [0, 0], sizes = [2, 128], strides = [1, 1]} : vector<2x256xf32> to vector<2x128xf32>
    %492 = arith.addf %490, %491 : vector<2x128xf32>
    %c2_i32_116 = arith.constant 2 : i32
    %493 = arith.muli %485, %c2_i32_116 : i32
    %494 = arith.index_cast %493 : i32 to index
    %c128_117 = arith.constant 128 : index
    %495 = vector.load %arg0[%494, %c128_117] : memref<16x256xf32, #tpu.memory_space<vmem>>, vector<2x128xf32>
    %496 = vector.extract_strided_slice %487 {offsets = [0, 128], sizes = [2, 128], strides = [1, 1]} : vector<2x256xf32> to vector<2x128xf32>
    %497 = arith.addf %495, %496 : vector<2x128xf32>
    %498 = vector.extract_strided_slice %492 {offsets = [0, 0], sizes = [2, 32], strides = [1, 1]} : vector<2x128xf32> to vector<2x32xf32>
    %499 = arith.negf %498 : vector<2x32xf32>
    %500 = math.exp %499 : vector<2x32xf32>
    %cst_118 = arith.constant 1.000000e+00 : f32
    %501 = vector.broadcast %cst_118 : f32 to vector<2x32xf32>
    %502 = arith.addf %501, %500 : vector<2x32xf32>
    %503 = arith.divf %501, %502 : vector<2x32xf32>
    %504 = vector.extract_strided_slice %497 {offsets = [0, 0], sizes = [2, 32], strides = [1, 1]} : vector<2x128xf32> to vector<2x32xf32>
    %505 = arith.negf %504 : vector<2x32xf32>
    %506 = math.exp %505 : vector<2x32xf32>
    %cst_119 = arith.constant 1.000000e+00 : f32
    %507 = vector.broadcast %cst_119 : f32 to vector<2x32xf32>
    %508 = arith.addf %507, %506 : vector<2x32xf32>
    %509 = arith.divf %507, %508 : vector<2x32xf32>
    %510 = vector.extract_strided_slice %492 {offsets = [0, 32], sizes = [2, 32], strides = [1, 1]} : vector<2x128xf32> to vector<2x32xf32>
    %511 = arith.negf %510 : vector<2x32xf32>
    %512 = math.exp %511 : vector<2x32xf32>
    %cst_120 = arith.constant 1.000000e+00 : f32
    %513 = vector.broadcast %cst_120 : f32 to vector<2x32xf32>
    %514 = arith.addf %513, %512 : vector<2x32xf32>
    %515 = arith.divf %513, %514 : vector<2x32xf32>
    %516 = vector.extract_strided_slice %497 {offsets = [0, 32], sizes = [2, 32], strides = [1, 1]} : vector<2x128xf32> to vector<2x32xf32>
    %517 = arith.negf %516 : vector<2x32xf32>
    %518 = math.exp %517 : vector<2x32xf32>
    %cst_121 = arith.constant 1.000000e+00 : f32
    %519 = vector.broadcast %cst_121 : f32 to vector<2x32xf32>
    %520 = arith.addf %519, %518 : vector<2x32xf32>
    %521 = arith.divf %519, %520 : vector<2x32xf32>
    %522 = vector.extract_strided_slice %492 {offsets = [0, 64], sizes = [2, 32], strides = [1, 1]} : vector<2x128xf32> to vector<2x32xf32>
    %523 = math.tanh %522 : vector<2x32xf32>
    %524 = vector.extract_strided_slice %497 {offsets = [0, 64], sizes = [2, 32], strides = [1, 1]} : vector<2x128xf32> to vector<2x32xf32>
    %525 = math.tanh %524 : vector<2x32xf32>
    %526 = vector.extract_strided_slice %492 {offsets = [0, 96], sizes = [2, 32], strides = [1, 1]} : vector<2x128xf32> to vector<2x32xf32>
    %527 = arith.negf %526 : vector<2x32xf32>
    %528 = math.exp %527 : vector<2x32xf32>
    %cst_122 = arith.constant 1.000000e+00 : f32
    %529 = vector.broadcast %cst_122 : f32 to vector<2x32xf32>
    %530 = arith.addf %529, %528 : vector<2x32xf32>
    %531 = arith.divf %529, %530 : vector<2x32xf32>
    %532 = vector.extract_strided_slice %497 {offsets = [0, 96], sizes = [2, 32], strides = [1, 1]} : vector<2x128xf32> to vector<2x32xf32>
    %533 = arith.negf %532 : vector<2x32xf32>
    %534 = math.exp %533 : vector<2x32xf32>
    %cst_123 = arith.constant 1.000000e+00 : f32
    %535 = vector.broadcast %cst_123 : f32 to vector<2x32xf32>
    %536 = arith.addf %535, %534 : vector<2x32xf32>
    %537 = arith.divf %535, %536 : vector<2x32xf32>
    %538 = arith.mulf %515, %471 : vector<2x32xf32>
    %539 = arith.mulf %503, %523 : vector<2x32xf32>
    %540 = arith.addf %538, %539 : vector<2x32xf32>
    %541 = arith.mulf %521, %474 : vector<2x32xf32>
    %542 = arith.mulf %509, %525 : vector<2x32xf32>
    %543 = arith.addf %541, %542 : vector<2x32xf32>
    %544 = math.tanh %540 : vector<2x32xf32>
    %545 = arith.mulf %531, %544 : vector<2x32xf32>
    %546 = math.tanh %543 : vector<2x32xf32>
    %547 = arith.mulf %537, %546 : vector<2x32xf32>
    %c2_i32_124 = arith.constant 2 : i32
    %548 = arith.muli %c7_i32_111, %c2_i32_124 : i32
    %549 = arith.index_cast %548 : i32 to index
    %c0_125 = arith.constant 0 : index
    %550 = vector.load %arg5[%549, %c0_125] : memref<16x32xf32, #tpu.memory_space<vmem>>, vector<2x32xf32>
    tpu.vector_store %arg5[%549, %c0_125], %545 {strides = array<i32>} : memref<16x32xf32, #tpu.memory_space<vmem>>, vector<2x32xf32>,
    %c2_i32_126 = arith.constant 2 : i32
    %551 = arith.muli %485, %c2_i32_126 : i32
    %552 = arith.index_cast %551 : i32 to index
    %c0_127 = arith.constant 0 : index
    %553 = vector.load %arg6[%552, %c0_127] : memref<16x32xf32, #tpu.memory_space<vmem>>, vector<2x32xf32>
    tpu.vector_store %arg6[%552, %c0_127], %547 {strides = array<i32>} : memref<16x32xf32, #tpu.memory_space<vmem>>, vector<2x32xf32>,
    %c8_i32 = arith.constant 8 : i32
    %c0_128 = arith.constant 0 : index
    %c0_129 = arith.constant 0 : index
    %554 = vector.load %arg5[%c0_128, %c0_129] : memref<16x32xf32, #tpu.memory_space<vmem>>, vector<16x32xf32>
    %c0_130 = arith.constant 0 : index
    %c0_131 = arith.constant 0 : index
    %555 = vector.load %arg2[%c0_130, %c0_131] : memref<64x128xf32, #tpu.memory_space<vmem>>, vector<32x128xf32>
    %cst_132 = arith.constant dense<0.000000e+00> : vector<16x128xf32>
    %556 = tpu.matmul %554, %555, %cst_132 {dimension_numbers = #tpu.dot_dimension_numbers<[1], [0], [0], [1], [0, 0, 1, 1], [], []>} : vector<16x32xf32>, vector<32x128xf32>, vector<16x128xf32> -> vector<16x128xf32>
    %c0_133 = arith.constant 0 : index
    %c0_134 = arith.constant 0 : index
    %557 = vector.load %arg6[%c0_133, %c0_134] : memref<16x32xf32, #tpu.memory_space<vmem>>, vector<16x32xf32>
    %c32 = arith.constant 32 : index
    %c0_135 = arith.constant 0 : index
    %558 = vector.load %arg2[%c32, %c0_135] : memref<64x128xf32, #tpu.memory_space<vmem>>, vector<32x128xf32>
    %cst_136 = arith.constant dense<0.000000e+00> : vector<16x128xf32>
    %559 = tpu.matmul %557, %558, %cst_136 {dimension_numbers = #tpu.dot_dimension_numbers<[1], [0], [0], [1], [0, 0, 1, 1], [], []>} : vector<16x32xf32>, vector<32x128xf32>, vector<16x128xf32> -> vector<16x128xf32>
    %560 = arith.addf %556, %559 : vector<16x128xf32>
    %c0_137 = arith.constant 0 : index
    %c0_138 = arith.constant 0 : index
    %561 = vector.load %arg3[%c0_137, %c0_138] : memref<1x128xf32, #tpu.memory_space<vmem>>, vector<1x128xf32>
    %562 = vector.broadcast %561 : vector<1x128xf32> to vector<16x128xf32>
    %563 = arith.addf %560, %562 : vector<16x128xf32>
    %c0_139 = arith.constant 0 : index
    %c0_140 = arith.constant 0 : index
    %564 = vector.load %arg4[%c0_139, %c0_140] : memref<16x128xf32, #tpu.memory_space<vmem>>, vector<16x128xf32>
    tpu.vector_store %arg4[%c0_139, %c0_140], %563 {strides = array<i32>} : memref<16x128xf32, #tpu.memory_space<vmem>>, vector<16x128xf32>,
    return
  }
}

</mosaic_0001>

<bundles_post_ra>
// kernel: tagger_forward.3
= control target key start
LH: loop header
LB: loop body
LE: loop exit
PB: predicated region body
PF: predicated region fallthrough
CT: control target
= control target key end

     0   :  { %v1461_v16 = vmov 0.0   ;;  %s1462_s24 = smov 64   ;;  %s1463_s25 = smov 32   ;;  %vm162_vm8 = vcmask 254976   ;;  %vm174_vm9 = vcmask 261120   ;;  %vm33_vm10 = vcmask 523264   ;;  %s1974_s1 = inlined_call_operand.vmem [shape: f32[64,256], index: 1, kind: input, shape index: {}]   ;;  %s1975_s0 = inlined_call_operand.vmem [shape: f32[16,256], index: 0, kind: input, shape index: {}]   ;;  %s1976_s2 = inlined_call_operand.vmem [shape: f32[64,128], index: 2, kind: input, shape index: {}]   ;;  %s1977_s3 = inlined_call_operand.vmem [shape: f32[1,128], index: 3, kind: input, shape index: {}]   ;;  %s1978_s4 = inlined_call_operand.vmem [shape: f32[16,128], index: 4, kind: output, shape index: {}]  }
   0x1   :  { %v1492_v0 = vld [vmem:[%s1974_s1 + $0x70] sm:$0xff]  ;;  %v1497_v1 = vld [vmem:[%s1974_s1 + $0x78] sm:$0xff]  ;;  %v1502_v2 = vld [vmem:[%s1974_s1 + $0x60] sm:$0xff] }
   0x2   :  { %45 = vmatpush.msra.mxu0 %v1492_v0  ;;  %65 = vmatpush.msra.mxu1 %v1497_v1  ;;  %v1509_v3 = vld [vmem:[%s1974_s1 + $0x68] sm:$0xff]  ;;  %v1514_v4 = vld [vmem:[%s1974_s1 + $0x50] sm:$0xff]  ;;  %v1519_v5 = vld [vmem:[%s1974_s1 + $0x58] sm:$0xff] }
   0x3   :  { %187 = vmatpush.msra.mxu2 %v1492_v0  ;;  %207 = vmatpush.msra.mxu3 %v1497_v1  ;;  %v1528_v6 = vld [vmem:[%s1974_s1 + $0x40] sm:$0xff]  ;;  %v1533_v7 = vld [vmem:[%s1974_s1 + $0x48] sm:$0xff]  ;;  %v1542_v8 = vld [vmem:[%s1974_s1 + $0x30] sm:$0xff] }
   0x4   :  { %46 = vmatpush.msra.mxu0 %v1502_v2  ;;  %66 = vmatpush.msra.mxu1 %v1509_v3  ;;  %v1547_v9 = vld [vmem:[%s1974_s1 + $0x38] sm:$0xff]  ;;  %v1556_v10 = vld [vmem:[%s1974_s1 + $0x20] sm:$0xff]  ;;  %v1561_v11 = vld [vmem:[%s1974_s1 + $0x28] sm:$0xff] }
   0x5   :  { %188 = vmatpush.msra.mxu2 %v1502_v2  ;;  %208 = vmatpush.msra.mxu3 %v1509_v3  ;;  %v1570_v12 = vld [vmem:[%s1974_s1 + $0x10] sm:$0xff]  ;;  %v1575_v13 = vld [vmem:[%s1974_s1 + $0x18] sm:$0xff]  ;;  %v1584_v14 = vld [vmem:[%s1974_s1] sm:$0xff] }
   0x6   :  { %47 = vmatpush.msra.mxu0 %v1514_v4  ;;  %67 = vmatpush.msra.mxu1 %v1519_v5  ;;  %v1589_v15 = vld [vmem:[%s1974_s1 + $0x8] sm:$0xff]  ;;  %v79_v18 = vld [vmem:[%s1975_s0 + $0x18] sm:$0xc0]  ;;  %v77_v22 = vld [vmem:[%s1975_s0] sm:$0x3] }
   0x7   :  { %189 = vmatpush.msra.mxu2 %v1514_v4  ;;  %209 = vmatpush.msra.mxu3 %v1519_v5 }
   0x8   :  { %48 = vmatpush.msra.mxu0 %v1528_v6  ;;  %68 = vmatpush.msra.mxu1 %v1533_v7 }
   0x9   :  { %190 = vmatpush.msra.mxu2 %v1528_v6  ;;  %210 = vmatpush.msra.mxu3 %v1533_v7 }
   0xa   :  { %49 = vmatpush.msra.mxu0 %v1542_v8  ;;  %69 = vmatpush.msra.mxu1 %v1547_v9 }
   0xb   :  { %191 = vmatpush.msra.mxu2 %v1542_v8  ;;  %211 = vmatpush.msra.mxu3 %v1547_v9 }
   0xc   :  { %50 = vmatpush.msra.mxu0 %v1556_v10  ;;  %70 = vmatpush.msra.mxu1 %v1561_v11 }
   0xd   :  { %192 = vmatpush.msra.mxu2 %v1556_v10  ;;  %212 = vmatpush.msra.mxu3 %v1561_v11 }
   0xe   :  { %51 = vmatpush.msra.mxu0 %v1570_v12  ;;  %71 = vmatpush.msra.mxu1 %v1575_v13 }
   0xf   :  { %193 = vmatpush.msra.mxu2 %v1570_v12  ;;  %213 = vmatpush.msra.mxu3 %v1575_v13 }
  0x10   :  { %52 = vmatpush.msra.mxu0 %v1584_v14  ;;  %72 = vmatpush.msra.mxu1 %v1589_v15 }
  0x11   :  { %53 = vmatmul.f32.vlgmr.msra.gmra.mxu0 %v1461_v16  ;;  %73 = vmatmul.f32.vlgmr.msra.gmra.mxu1 %v1461_v16 }
  0x12   :  { %194 = vmatpush.msra.mxu2 %v1584_v14  ;;  %214 = vmatpush.msra.mxu3 %v1589_v15 }
  0x13   :  { %338 = vmatpush.msrb.mxu0 %v1492_v0  ;;  %358 = vmatpush.msrb.mxu1 %v1497_v1 }
  0x14   :  { %487 = vmatpush.msrb.mxu2 %v1492_v0  ;;  %507 = vmatpush.msrb.mxu3 %v1497_v1 }
  0x15   :  { %339 = vmatpush.msrb.mxu0 %v1502_v2  ;;  %359 = vmatpush.msrb.mxu1 %v1509_v3 }
  0x16   :  { %488 = vmatpush.msrb.mxu2 %v1502_v2  ;;  %508 = vmatpush.msrb.mxu3 %v1509_v3 }
  0x17   :  { %340 = vmatpush.msrb.mxu0 %v1514_v4  ;;  %360 = vmatpush.msrb.mxu1 %v1519_v5 }
  0x18   :  { %489 = vmatpush.msrb.mxu2 %v1514_v4  ;;  %509 = vmatpush.msrb.mxu3 %v1519_v5 }
  0x19   :  { %341 = vmatpush.msrb.mxu0 %v1528_v6  ;;  %361 = vmatpush.msrb.mxu1 %v1533_v7 }
  0x1a   :  { %490 = vmatpush.msrb.mxu2 %v1528_v6  ;;  %510 = vmatpush.msrb.mxu3 %v1533_v7 }
  0x1b   :  { %342 = vmatpush.msrb.mxu0 %v1542_v8  ;;  %362 = vmatpush.msrb.mxu1 %v1547_v9 }
  0x1c   :  { %491 = vmatpush.msrb.mxu2 %v1542_v8  ;;  %511 = vmatpush.msrb.mxu3 %v1547_v9 }
  0x1d   :  { %343 = vmatpush.msrb.mxu0 %v1556_v10  ;;  %363 = vmatpush.msrb.mxu1 %v1561_v11 }
  0x1e   :  { %492 = vmatpush.msrb.mxu2 %v1556_v10  ;;  %512 = vmatpush.msrb.mxu3 %v1561_v11 }
  0x1f   :  { %344 = vmatpush.msrb.mxu0 %v1570_v12  ;;  %364 = vmatpush.msrb.mxu1 %v1575_v13 }
  0x20   :  { %493 = vmatpush.msrb.mxu2 %v1570_v12  ;;  %513 = vmatpush.msrb.mxu3 %v1575_v13 }
  0x21   :  { %345 = vmatpush.msrb.mxu0 %v1584_v14  ;;  %365 = vmatpush.msrb.mxu1 %v1589_v15 }
  0x22   :  { %494 = vmatpush.msrb.mxu2 %v1584_v14  ;;  %514 = vmatpush.msrb.mxu3 %v1589_v15 }
  0x23   :  { %633 = vmatpush.msra.mxu0 %v1492_v0  ;;  %653 = vmatpush.msra.mxu1 %v1497_v1 }
  0x25   :  { %634 = vmatpush.msra.mxu0 %v1502_v2  ;;  %654 = vmatpush.msra.mxu1 %v1509_v3 }
  0x27   :  { %635 = vmatpush.msra.mxu0 %v1514_v4  ;;  %655 = vmatpush.msra.mxu1 %v1519_v5 }
  0x29   :  { %636 = vmatpush.msra.mxu0 %v1528_v6  ;;  %656 = vmatpush.msra.mxu1 %v1533_v7 }
  0x2b   :  { %637 = vmatpush.msra.mxu0 %v1542_v8  ;;  %657 = vmatpush.msra.mxu1 %v1547_v9 }
  0x2d   :  { %638 = vmatpush.msra.mxu0 %v1556_v10  ;;  %658 = vmatpush.msra.mxu1 %v1561_v11 }
  0x2f   :  { %639 = vmatpush.msra.mxu0 %v1570_v12  ;;  %659 = vmatpush.msra.mxu1 %v1575_v13 }
  0x31   :  { %640 = vmatpush.msra.mxu0 %v1584_v14  ;;  %660 = vmatpush.msra.mxu1 %v1589_v15 }
  0x8e   :  { %v74_v17 = vpop.f32.mrf.mxu1  ;;  %v54_v21 = vpop.f32.mrf.mxu0 }
  0x8f   :  { %v81_v19 = vrot.slane %v74_v17, 2  ;;  %v78_v23 = vadd.f32 %v77_v22, %v54_v21 }
  0x91   :  { %v83_v20 = vadd.f32 %v81_v19, %v79_v18  ;;  %v1287_v27 = vmul.f32 -1.442695, %v78_v23 }
  0x93   :  { %1333 = vtanh.f32 %v83_v20  ;;  %v1288_v26 = vmul.f32 -1.442695, %v83_v20 }
  0x94   :  { %1335 = vtanh.f32 %v78_v23 }
  0x95   :  { %1337 = vpow2.f32 %v1288_v26 }
  0x96   :  { %1339 = vpow2.f32 %v1287_v27  ;;  %v224_v27 = vld [vmem:[%s1975_s0 + $0x18] sm:$0x30] }
  0x99   :  { %v1334_v24 = vpop.eup %1333 }
  0x9a   :  { %137 = vrot.lane.b32.xlu0 %v1334_v24, %s1462_s24  ;;  %v1336_v25 = vpop.eup %1335 }
  0x9b   :  { %v1338_v28 = vpop.eup %1337 }
  0x9c   :  { %v106_v29 = vadd.f32 1.0, %v1338_v28  ;;  %v1340_v30 = vpop.eup %1339 }
  0x9d   :  { %v87_v31 = vadd.f32 1.0, %v1340_v30 }
  0x9e   :  { %1341 = vrcp.f32 %v106_v29  ;;  %v118_v40 = vand.u32 2147483648, %v106_v29  ;;  %vm112_vm1 = vweird.f32 %v106_v29  ;;  %v116_v41 = vand.u32 2147483647, %v106_v29 }
  0x9f   :  { %1343 = vrcp.f32 %v87_v31  ;;  %vm93_vm4 = vweird.f32 %v87_v31  ;;  %v99_v49 = vand.u32 2147483648, %v87_v31  ;;  %v97_v50 = vand.u32 2147483647, %v87_v31 }
  0xa0   :  { %v119_v44 = vor.u32 1.1754944e-38, %v118_v40  ;;  %vm117_vm3 = vcmp.eq.f32.partialorder %v116_v41, 8.507059e+37 }
  0xa1   :  { %v100_v52 = vor.u32 1.1754944e-38, %v99_v49  ;;  %vm98_vm7 = vcmp.eq.f32.partialorder %v97_v50, 8.507059e+37 }
  0xa2   :  { %126 = vrot.lane.b32.xlu0 %v1336_v25, %s1462_s24  ;;  %v219_v25 = vld [vmem:[%s1975_s0] sm:$0xc] }
  0xa4   :  { %v1342_v32 = vpop.eup %1341 }
  0xa5   :  { %v108_v33 = vmul.f32 %v1342_v32, %v106_v29  ;;  %v1344_v35 = vpop.eup %1343  ;;  %vm113_vm0 = vweird.f32 %v1342_v32 }
  0xa6   :  { %v89_v37 = vmul.f32 %v1344_v35, %v87_v31  ;;  %vm114_vm2 = vmor %vm112_vm1, %vm113_vm0  ;;  %vm94_vm5 = vweird.f32 %v1344_v35 }
  0xa7   :  { %v109_v34 = vsub.f32 1.0, %v108_v33  ;;  %vm95_vm6 = vmor %vm93_vm4, %vm94_vm5 }
  0xa8   :  { %v90_v39 = vsub.f32 1.0, %v89_v37 }
  0xa9   :  { %v110_v36 = vmul.f32 %v1342_v32, %v109_v34 }
  0xaa   :  { %v91_v43 = vmul.f32 %v1344_v35, %v90_v39 }
  0xab   :  { %v111_v38 = vadd.f32 %v1342_v32, %v110_v36 }
  0xac   :  { %v92_v48 = vadd.f32 %v1344_v35, %v91_v43 }
  0xad   :  { %v115_v42 = vsel %vm114_vm2, %v1342_v32, %v111_v38 }
  0xae   :  { %v120_v46 = vsel %vm117_vm3, %v119_v44, %v115_v42  ;;  %v96_v51 = vsel %vm95_vm6, %v1344_v35, %v92_v48  ;;  %vm313_vm3 = vcmask 257026  }
  0xaf   :  { %v101_v54 = vsel %vm98_vm7, %v100_v52, %v96_v51  ;;  %v135_v56 = vmul.f32 0.0, %v120_v46 }
  0xb0   :  { %v124_v59 = vmul.f32 0.0, %v101_v54 }
 0x10c   :  { %v138_v45 = vpop.permute.xlu0 %137 }
 0x10d   :  { %v140_v47 = vmul.f32 %v138_v45, %v120_v46 }
 0x10f   :  { %142 = vrot.lane.b32.xlu1 %v140_v47, %s1463_s25 }
 0x114   :  { %v127_v53 = vpop.permute.xlu0 %126 }
 0x115   :  { %v129_v55 = vmul.f32 %v127_v53, %v101_v54 }
 0x117   :  { %131 = vrot.lane.b32.xlu1 %v129_v55, %s1463_s25 }
 0x181   :  { %v143_v57 = vpop.permute.xlu1 %142 }
 0x182   :  { %v1659_v58 = vadd.f32 %v143_v57, %v135_v56 }
 0x184   :  { %1345 = vtanh.f32 %v1659_v58 }
 0x189   :  { %v132_v60 = vpop.permute.xlu1 %131 }
 0x18a   :  { %v1346_v61 = vpop.eup %1345  ;;  %v1662_v62 = vadd.f32 %v132_v60, %v124_v59 }
 0x18b   :  { %154 = vrot.lane.b32.xlu2 %v1346_v61, %s1462_s24 }
 0x18c   :  { %1347 = vtanh.f32 %v1662_v62 }
 0x192   :  { %v1348_v63 = vpop.eup %1347 }
 0x193   :  { %148 = vrot.lane.b32.xlu2 %v1348_v63, %s1462_s24 }
 0x1e5   :  { %v155_v16 = vpop.permute.xlu2 %154 }
 0x1e6   :  { %v1667_v17 = vmul.f32 %v155_v16, %v120_v46 }
 0x1e8   :  { %v170_v18 = vrot.slane %v1667_v17, 6 }
 0x1ea   :  { %171 = vrot.lane.b32.xlu1 %v170_v18, %s1462_s24 }
 0x1ed   :  { %v149_v19 = vpop.permute.xlu2 %148 }
 0x1ee   :  { %v151_v20 = vmul.f32 %v149_v19, %v101_v54  ;;  %v270_v19 = vrot.slane %v1662_v62, 6 }
 0x1f0   :  { %159 = vrot.lane.b32.xlu0 %v151_v20, %s1463_s25  ;;  %v284_v20 = vrot.slane %v1659_v58, 2 }
 0x25c   :  { %v172_v21 = vpop.permute.xlu1 %171 }
 0x262   :  { %v160_v22 = vpop.permute.xlu0 %159 }
 0x263   :  { %163 = vst.msk [vmem:[#allocation2] sm:$0x3] %vm162_vm8, %v160_v22  ;;  %v175_v23 = vsel %vm174_vm9, %v160_v22, %v172_v21 }
 0x264   :  { %1289 = vmatmul.msk.f32.vlgmr.msra.gmra.mxu2 %vm33_vm10, %v175_v23  ;;  %1290 = vmatmul.msk.f32.vlgmr.msra.gmra.mxu3 %vm33_vm10, %v175_v23 }
 0x265   :  { %778 = vmatpush.msra.mxu2 %v1492_v0  ;;  %798 = vmatpush.msra.mxu3 %v1497_v1 }
 0x267   :  { %779 = vmatpush.msra.mxu2 %v1502_v2  ;;  %799 = vmatpush.msra.mxu3 %v1509_v3 }
 0x269   :  { %780 = vmatpush.msra.mxu2 %v1514_v4  ;;  %800 = vmatpush.msra.mxu3 %v1519_v5 }
 0x26b   :  { %781 = vmatpush.msra.mxu2 %v1528_v6  ;;  %801 = vmatpush.msra.mxu3 %v1533_v7 }
 0x26d   :  { %782 = vmatpush.msra.mxu2 %v1542_v8  ;;  %802 = vmatpush.msra.mxu3 %v1547_v9 }
 0x26f   :  { %783 = vmatpush.msra.mxu2 %v1556_v10  ;;  %803 = vmatpush.msra.mxu3 %v1561_v11 }
 0x271   :  { %784 = vmatpush.msra.mxu2 %v1570_v12  ;;  %804 = vmatpush.msra.mxu3 %v1575_v13 }
 0x273   :  { %785 = vmatpush.msra.mxu2 %v1584_v14  ;;  %805 = vmatpush.msra.mxu3 %v1589_v15 }
 0x2e7   :  { %v196_v24 = vpop.f32.mrf.mxu2  ;;  %v216_v26 = vpop.f32.mrf.mxu3 }
 0x2e8   :  { %v221_v28 = vrot.slane %v196_v24, 6  ;;  %v226_v29 = vrot.slane %v216_v26, 4 }
 0x2ea   :  { %v223_v30 = vadd.f32 %v221_v28, %v219_v25  ;;  %v228_v31 = vadd.f32 %v226_v29, %v224_v27 }
 0x2ec   :  { %1349 = vtanh.f32 %v223_v30  ;;  %v1292_v34 = vmul.f32 -1.442695, %v228_v31  ;;  %v1291_v38 = vmul.f32 -1.442695, %v223_v30 }
 0x2ed   :  { %1351 = vtanh.f32 %v228_v31 }
 0x2ee   :  { %1353 = vpow2.f32 %v1292_v34 }
 0x2f2   :  { %v1350_v32 = vpop.eup %1349 }
 0x2f3   :  { %v1352_v33 = vpop.eup %1351  ;;  %274 = vrot.lane.b32.xlu0 %v1350_v32, %s1462_s24 }
 0x2f4   :  { %288 = vrot.lane.b32.xlu2 %v1352_v33, %s1462_s24  ;;  %v1354_v35 = vpop.eup %1353 }
 0x2f5   :  { %v251_v36 = vadd.f32 1.0, %v1354_v35 }
 0x2f7   :  { %1355 = vrcp.f32 %v251_v36  ;;  %v263_v45 = vand.u32 2147483648, %v251_v36  ;;  %vm257_vm12 = vweird.f32 %v251_v36  ;;  %v261_v46 = vand.u32 2147483647, %v251_v36 }
 0x2f8   :  { %1357 = vpow2.f32 %v1291_v38 }
 0x2f9   :  { %v264_v48 = vor.u32 1.1754944e-38, %v263_v45  ;;  %vm262_vm14 = vcmp.eq.f32.partialorder %v261_v46, 8.507059e+37 }
 0x2fd   :  { %v1356_v37 = vpop.eup %1355 }
 0x2fe   :  { %v253_v39 = vmul.f32 %v1356_v37, %v251_v36  ;;  %v1358_v41 = vpop.eup %1357  ;;  %vm258_vm11 = vweird.f32 %v1356_v37 }
 0x2ff   :  { %v232_v43 = vadd.f32 1.0, %v1358_v41  ;;  %vm259_vm13 = vmor %vm257_vm12, %vm258_vm11 }
 0x300   :  { %v254_v40 = vsub.f32 1.0, %v253_v39  ;;  %v375_v39 = vld [vmem:[%s1975_s0 + $0x18] sm:$0xc] }
 0x301   :  { %1359 = vrcp.f32 %v232_v43  ;;  %v244_v57 = vand.u32 2147483648, %v232_v43  ;;  %vm238_vm0 = vweird.f32 %v232_v43  ;;  %v242_v59 = vand.u32 2147483647, %v232_v43 }
 0x302   :  { %v255_v42 = vmul.f32 %v1356_v37, %v254_v40 }
 0x303   :  { %v245_v61 = vor.u32 1.1754944e-38, %v244_v57  ;;  %vm243_vm2 = vcmp.eq.f32.partialorder %v242_v59, 8.507059e+37 }
 0x304   :  { %v256_v44 = vadd.f32 %v1356_v37, %v255_v42 }
 0x306   :  { %v260_v47 = vsel %vm259_vm13, %v1356_v37, %v256_v44  ;;  %v370_v37 = vld [vmem:[%s1975_s0] sm:$0x30] }
 0x307   :  { %v265_v50 = vsel %vm262_vm14, %v264_v48, %v260_v47  ;;  %v1360_v51 = vpop.eup %1359 }
 0x308   :  { %v234_v53 = vmul.f32 %v1360_v51, %v232_v43  ;;  %vm239_vm15 = vweird.f32 %v1360_v51  ;;  %v286_v22 = vmul.f32 %v284_v20, %v265_v50 }
 0x309   :  { %vm240_vm1 = vmor %vm238_vm0, %vm239_vm15  ;;  %vm319_vm15 = vcmask 259076  }
 0x30a   :  { %v235_v54 = vsub.f32 1.0, %v234_v53 }
 0x30c   :  { %v236_v55 = vmul.f32 %v1360_v51, %v235_v54 }
 0x30e   :  { %v237_v56 = vadd.f32 %v1360_v51, %v236_v55 }
 0x310   :  { %v241_v60 = vsel %vm240_vm1, %v1360_v51, %v237_v56 }
 0x311   :  { %v246_v16 = vsel %vm243_vm2, %v245_v61, %v241_v60 }
 0x312   :  { %v272_v21 = vmul.f32 %v270_v19, %v246_v16 }
 0x34e   :  { %v289_v49 = vpop.permute.xlu2 %288 }
 0x34f   :  { %v291_v52 = vmul.f32 %v289_v49, %v265_v50 }
 0x351   :  { %293 = vrot.lane.b32.xlu1 %v291_v52, %s1463_s25 }
 0x365   :  { %v275_v63 = vpop.permute.xlu0 %274 }
 0x366   :  { %v277_v18 = vmul.f32 %v275_v63, %v246_v16 }
 0x368   :  { %279 = vrot.lane.b32.xlu2 %v277_v18, %s1463_s25 }
 0x3c2   :  { %v280_v23 = vpop.permute.xlu2 %279 }
 0x3c3   :  { %v294_v24 = vpop.permute.xlu1 %293  ;;  %v1704_v25 = vadd.f32 %v280_v23, %v272_v21 }
 0x3c4   :  { %v1706_v26 = vadd.f32 %v294_v24, %v286_v22 }
 0x3c5   :  { %1361 = vtanh.f32 %v1704_v25 }
 0x3c6   :  { %1363 = vtanh.f32 %v1706_v26 }
 0x3cb   :  { %v1362_v27 = vpop.eup %1361 }
 0x3cc   :  { %v1364_v28 = vpop.eup %1363  ;;  %299 = vrot.lane.b32.xlu1 %v1362_v27, %s1462_s24 }
 0x3cd   :  { %305 = vrot.lane.b32.xlu0 %v1364_v28, %s1462_s24 }
 0x43e   :  { %v300_v62 = vpop.permute.xlu1 %299 }
 0x43f   :  { %v306_v58 = vpop.permute.xlu0 %305  ;;  %v302_v29 = vmul.f32 %v300_v62, %v246_v16 }
 0x440   :  { %v1712_v30 = vmul.f32 %v306_v58, %v265_v50 }
 0x441   :  { %310 = vrot.lane.b32.xlu2 %v302_v29, %s1463_s25 }
 0x442   :  { %v321_v31 = vrot.slane %v1712_v30, 2 }
 0x444   :  { %322 = vrot.lane.b32.xlu0 %v321_v31, %s1462_s24 }
 0x49b   :  { %v311_v32 = vpop.permute.xlu2 %310 }
 0x49c   :  { %314 = vst.msk [vmem:[#allocation2] sm:$0xc] %vm313_vm3, %v311_v32 }
 0x4b6   :  { %v323_v33 = vpop.permute.xlu0 %322 }
 0x4b7   :  { %v325_v34 = vsel %vm174_vm9, %v311_v32, %v323_v33  ;;  %v421_v32 = vrot.slane %v1704_v25, 6 }
 0x4b8   :  { %v327_v35 = vrot.slane %v325_v34, 2 }
 0x4ba   :  { %1293 = vmatmul.msk.f32.vlgmr.msrb.gmra.mxu0 %vm33_vm10, %v327_v35  ;;  %1294 = vmatmul.msk.f32.vlgmr.msrb.gmra.mxu1 %vm33_vm10, %v327_v35 }
 0x4bb   :  { %927 = vmatpush.msrb.mxu0 %v1492_v0  ;;  %947 = vmatpush.msrb.mxu1 %v1497_v1 }
 0x4bd   :  { %928 = vmatpush.msrb.mxu0 %v1502_v2  ;;  %948 = vmatpush.msrb.mxu1 %v1509_v3 }
 0x4bf   :  { %929 = vmatpush.msrb.mxu0 %v1514_v4  ;;  %949 = vmatpush.msrb.mxu1 %v1519_v5 }
 0x4c1   :  { %930 = vmatpush.msrb.mxu0 %v1528_v6  ;;  %950 = vmatpush.msrb.mxu1 %v1533_v7 }
 0x4c3   :  { %931 = vmatpush.msrb.mxu0 %v1542_v8  ;;  %951 = vmatpush.msrb.mxu1 %v1547_v9 }
 0x4c5   :  { %932 = vmatpush.msrb.mxu0 %v1556_v10  ;;  %952 = vmatpush.msrb.mxu1 %v1561_v11 }
 0x4c7   :  { %933 = vmatpush.msrb.mxu0 %v1570_v12  ;;  %953 = vmatpush.msrb.mxu1 %v1575_v13 }
 0x4c9   :  { %934 = vmatpush.msrb.mxu0 %v1584_v14  ;;  %954 = vmatpush.msrb.mxu1 %v1589_v15 }
 0x537   :  { %v347_v36 = vpop.f32.mrf.mxu0  ;;  %v367_v38 = vpop.f32.mrf.mxu1 }
 0x538   :  { %v372_v40 = vrot.slane %v347_v36, 4  ;;  %v377_v41 = vrot.slane %v367_v38, 6 }
 0x53a   :  { %v374_v42 = vadd.f32 %v372_v40, %v370_v37  ;;  %v379_v43 = vadd.f32 %v377_v41, %v375_v39  ;;  %v435_v37 = vrot.slane %v1706_v26, 2 }
 0x53c   :  { %1365 = vtanh.f32 %v374_v42  ;;  %v1295_v46 = vmul.f32 -1.442695, %v374_v42  ;;  %v1296_v50 = vmul.f32 -1.442695, %v379_v43 }
 0x53d   :  { %1367 = vtanh.f32 %v379_v43 }
 0x53e   :  { %1369 = vpow2.f32 %v1295_v46 }
 0x542   :  { %v1366_v44 = vpop.eup %1365 }
 0x543   :  { %v1368_v45 = vpop.eup %1367  ;;  %425 = vrot.lane.b32.xlu2 %v1366_v44, %s1462_s24 }
 0x544   :  { %439 = vrot.lane.b32.xlu1 %v1368_v45, %s1462_s24  ;;  %v1370_v47 = vpop.eup %1369 }
 0x545   :  { %v383_v48 = vadd.f32 1.0, %v1370_v47 }
 0x547   :  { %1371 = vrcp.f32 %v383_v48  ;;  %v395_v57 = vand.u32 2147483648, %v383_v48  ;;  %vm389_vm5 = vweird.f32 %v383_v48  ;;  %v393_v59 = vand.u32 2147483647, %v383_v48 }
 0x548   :  { %1373 = vpow2.f32 %v1296_v50 }
 0x549   :  { %v396_v61 = vor.u32 1.1754944e-38, %v395_v57  ;;  %vm394_vm7 = vcmp.eq.f32.partialorder %v393_v59, 8.507059e+37 }
 0x54d   :  { %v1372_v49 = vpop.eup %1371 }
 0x54e   :  { %v385_v51 = vmul.f32 %v1372_v49, %v383_v48  ;;  %v1374_v54 = vpop.eup %1373  ;;  %vm390_vm4 = vweird.f32 %v1372_v49 }
 0x54f   :  { %v402_v55 = vadd.f32 1.0, %v1374_v54  ;;  %vm391_vm6 = vmor %vm389_vm5, %vm390_vm4 }
 0x550   :  { %v386_v52 = vsub.f32 1.0, %v385_v51 }
 0x551   :  { %1375 = vrcp.f32 %v402_v55  ;;  %v414_v24 = vand.u32 2147483648, %v402_v55  ;;  %vm408_vm12 = vweird.f32 %v402_v55  ;;  %v412_v27 = vand.u32 2147483647, %v402_v55 }
 0x552   :  { %v387_v53 = vmul.f32 %v1372_v49, %v386_v52 }
 0x553   :  { %v415_v62 = vor.u32 1.1754944e-38, %v414_v24  ;;  %vm413_vm14 = vcmp.eq.f32.partialorder %v412_v27, 8.507059e+37 }
 0x554   :  { %v388_v56 = vadd.f32 %v1372_v49, %v387_v53 }
 0x556   :  { %v392_v60 = vsel %vm391_vm6, %v1372_v49, %v388_v56 }
 0x557   :  { %v397_v16 = vsel %vm394_vm7, %v396_v61, %v392_v60  ;;  %v1376_v19 = vpop.eup %1375 }
 0x558   :  { %v404_v20 = vmul.f32 %v1376_v19, %v402_v55  ;;  %vm409_vm11 = vweird.f32 %v1376_v19  ;;  %v423_v33 = vmul.f32 %v421_v32, %v397_v16 }
 0x559   :  { %vm410_vm13 = vmor %vm408_vm12, %vm409_vm11  ;;  %vm168_vm12 = vcmask 261126  }
 0x55a   :  { %v405_v21 = vsub.f32 1.0, %v404_v20 }
 0x55c   :  { %v406_v22 = vmul.f32 %v1376_v19, %v405_v21 }
 0x55e   :  { %v407_v23 = vadd.f32 %v1376_v19, %v406_v22 }
 0x560   :  { %v411_v28 = vsel %vm410_vm13, %v1376_v19, %v407_v23 }
 0x561   :  { %v416_v29 = vsel %vm413_vm14, %v415_v62, %v411_v28 }
 0x562   :  { %v437_v38 = vmul.f32 %v435_v37, %v416_v29 }
 0x59d   :  { %v426_v63 = vpop.permute.xlu2 %425 }
 0x59e   :  { %v428_v18 = vmul.f32 %v426_v63, %v397_v16 }
 0x5a0   :  { %430 = vrot.lane.b32.xlu1 %v428_v18, %s1463_s25 }
 0x5b6   :  { %v440_v58 = vpop.permute.xlu1 %439 }
 0x5b7   :  { %v442_v31 = vmul.f32 %v440_v58, %v416_v29 }
 0x5b9   :  { %444 = vrot.lane.b32.xlu0 %v442_v31, %s1463_s25 }
 0x612   :  { %v431_v34 = vpop.permute.xlu1 %430 }
 0x613   :  { %v1748_v35 = vadd.f32 %v431_v34, %v423_v33 }
 0x615   :  { %1377 = vtanh.f32 %v1748_v35  ;;  %v567_v33 = vrot.slane %v1748_v35, 6 }
 0x61b   :  { %v1378_v36 = vpop.eup %1377 }
 0x61c   :  { %450 = vrot.lane.b32.xlu0 %v1378_v36, %s1462_s24 }
 0x62b   :  { %v445_v39 = vpop.permute.xlu0 %444 }
 0x62c   :  { %v1753_v40 = vadd.f32 %v445_v39, %v437_v38 }
 0x62e   :  { %1379 = vtanh.f32 %v1753_v40  ;;  %v581_v62 = vrot.slane %v1753_v40, 2 }
 0x634   :  { %v1380_v41 = vpop.eup %1379 }
 0x635   :  { %456 = vrot.lane.b32.xlu2 %v1380_v41, %s1462_s24 }
 0x68e   :  { %v451_v25 = vpop.permute.xlu0 %450 }
 0x68f   :  { %v457_v42 = vpop.permute.xlu2 %456  ;;  %v453_v43 = vmul.f32 %v451_v25, %v397_v16 }
 0x690   :  { %v1757_v44 = vmul.f32 %v457_v42, %v416_v29 }
 0x691   :  { %461 = vrot.lane.b32.xlu1 %v453_v43, %s1463_s25 }
 0x692   :  { %v470_v45 = vrot.slane %v1757_v44, 6 }
 0x694   :  { %471 = vrot.lane.b32.xlu2 %v470_v45, %s1462_s24 }
 0x6ee   :  { %v472_v26 = vpop.permute.xlu2 %471 }
 0x703   :  { %v462_v46 = vpop.permute.xlu1 %461 }
 0x704   :  { %464 = vst.msk [vmem:[#allocation2] sm:$0x30] %vm319_vm15, %v462_v46  ;;  %v474_v47 = vsel %vm174_vm9, %v462_v46, %v472_v26  ;;  %v665_v46 = vld [vmem:[%s1975_s0 + $0x10] sm:$0x3] }
 0x705   :  { %v476_v48 = vrot.slane %v474_v47, 4 }
 0x707   :  { %1297 = vmatmul.msk.f32.vlgmr.msrb.gmra.mxu2 %vm33_vm10, %v476_v48  ;;  %1298 = vmatmul.msk.f32.vlgmr.msrb.gmra.mxu3 %vm33_vm10, %v476_v48 }
 0x708   :  { %1076 = vmatpush.msrb.mxu2 %v1492_v0  ;;  %1096 = vmatpush.msrb.mxu3 %v1497_v1  ;;  %v524_v0 = vld [vmem:[%s1975_s0 + $0x18] sm:$0x3] }
 0x70a   :  { %1077 = vmatpush.msrb.mxu2 %v1502_v2  ;;  %1097 = vmatpush.msrb.mxu3 %v1509_v3  ;;  %v519_v2 = vld [vmem:[%s1975_s0] sm:$0xc0] }
 0x70c   :  { %1078 = vmatpush.msrb.mxu2 %v1514_v4  ;;  %1098 = vmatpush.msrb.mxu3 %v1519_v5 }
 0x70e   :  { %1079 = vmatpush.msrb.mxu2 %v1528_v6  ;;  %1099 = vmatpush.msrb.mxu3 %v1533_v7 }
 0x710   :  { %1080 = vmatpush.msrb.mxu2 %v1542_v8  ;;  %1100 = vmatpush.msrb.mxu3 %v1547_v9 }
 0x712   :  { %1081 = vmatpush.msrb.mxu2 %v1556_v10  ;;  %1101 = vmatpush.msrb.mxu3 %v1561_v11 }
 0x714   :  { %1082 = vmatpush.msrb.mxu2 %v1570_v12  ;;  %1102 = vmatpush.msrb.mxu3 %v1575_v13 }
 0x716   :  { %1083 = vmatpush.msrb.mxu2 %v1584_v14  ;;  %1103 = vmatpush.msrb.mxu3 %v1589_v15 }
 0x78a   :  { %v496_v1 = vpop.f32.mrf.mxu2  ;;  %v516_v3 = vpop.f32.mrf.mxu3 }
 0x78b   :  { %v521_v4 = vrot.slane %v496_v1, 2  ;;  %v525_v5 = vadd.f32 %v524_v0, %v516_v3  ;;  %v667_v0 = vld [vmem:[%s1975_s0 + $0x8] sm:$0xc0] }
 0x78d   :  { %v523_v6 = vadd.f32 %v521_v4, %v519_v2  ;;  %1381 = vtanh.f32 %v525_v5  ;;  %v1300_v9 = vmul.f32 -1.442695, %v525_v5 }
 0x78f   :  { %1383 = vtanh.f32 %v523_v6  ;;  %v1299_v10 = vmul.f32 -1.442695, %v523_v6 }
 0x790   :  { %1385 = vpow2.f32 %v1300_v9 }
 0x791   :  { %1387 = vpow2.f32 %v1299_v10 }
 0x793   :  { %v1382_v7 = vpop.eup %1381 }
 0x794   :  { %585 = vrot.lane.b32.xlu0 %v1382_v7, %s1462_s24 }
 0x795   :  { %v1384_v8 = vpop.eup %1383 }
 0x796   :  { %571 = vrot.lane.b32.xlu1 %v1384_v8, %s1462_s24  ;;  %v1386_v11 = vpop.eup %1385 }
 0x797   :  { %v1388_v12 = vpop.eup %1387  ;;  %v548_v13 = vadd.f32 1.0, %v1386_v11 }
 0x798   :  { %v529_v14 = vadd.f32 1.0, %v1388_v12 }
 0x799   :  { %1389 = vrcp.f32 %v548_v13  ;;  %v560_v57 = vand.u32 2147483648, %v548_v13  ;;  %vm554_vm1 = vweird.f32 %v548_v13  ;;  %v558_v59 = vand.u32 2147483647, %v548_v13 }
 0x79a   :  { %1391 = vrcp.f32 %v529_v14  ;;  %v541_v61 = vand.u32 2147483648, %v529_v14  ;;  %vm535_vm5 = vweird.f32 %v529_v14  ;;  %v539_v16 = vand.u32 2147483647, %v529_v14 }
 0x79b   :  { %v561_v18 = vor.u32 1.1754944e-38, %v560_v57  ;;  %vm559_vm7 = vcmp.eq.f32.partialorder %v558_v59, 8.507059e+37 }
 0x79c   :  { %v542_v22 = vor.u32 1.1754944e-38, %v541_v61  ;;  %vm540_vm11 = vcmp.eq.f32.partialorder %v539_v16, 8.507059e+37 }
 0x79f   :  { %v1390_v15 = vpop.eup %1389 }
 0x7a0   :  { %v1392_v49 = vpop.eup %1391  ;;  %v550_v50 = vmul.f32 %v1390_v15, %v548_v13  ;;  %vm555_vm0 = vweird.f32 %v1390_v15 }
 0x7a1   :  { %v531_v51 = vmul.f32 %v1392_v49, %v529_v14  ;;  %vm536_vm2 = vweird.f32 %v1392_v49  ;;  %vm556_vm4 = vmor %vm554_vm1, %vm555_vm0 }
 0x7a2   :  { %v551_v52 = vsub.f32 1.0, %v550_v50  ;;  %vm537_vm6 = vmor %vm535_vm5, %vm536_vm2 }
 0x7a3   :  { %v532_v53 = vsub.f32 1.0, %v531_v51 }
 0x7a4   :  { %v552_v54 = vmul.f32 %v1390_v15, %v551_v52 }
 0x7a5   :  { %v533_v55 = vmul.f32 %v1392_v49, %v532_v53 }
 0x7a6   :  { %v553_v56 = vadd.f32 %v1390_v15, %v552_v54 }
 0x7a7   :  { %v534_v60 = vadd.f32 %v1392_v49, %v533_v55 }
 0x7a8   :  { %v557_v63 = vsel %vm556_vm4, %v1390_v15, %v553_v56 }
 0x7a9   :  { %v538_v19 = vsel %vm537_vm6, %v1392_v49, %v534_v60  ;;  %v562_v21 = vsel %vm559_vm7, %v561_v18, %v557_v63 }
 0x7aa   :  { %v543_v27 = vsel %vm540_vm11, %v542_v22, %v538_v19  ;;  %v583_v58 = vmul.f32 %v581_v62, %v562_v21 }
 0x7ab   :  { %v569_v34 = vmul.f32 %v567_v33, %v543_v27 }
 0x806   :  { %v586_v20 = vpop.permute.xlu0 %585 }
 0x807   :  { %v588_v23 = vmul.f32 %v586_v20, %v562_v21 }
 0x808   :  { %v572_v24 = vpop.permute.xlu1 %571 }
 0x809   :  { %v574_v28 = vmul.f32 %v572_v24, %v543_v27  ;;  %590 = vrot.lane.b32.xlu2 %v588_v23, %s1463_s25 }
 0x80b   :  { %576 = vrot.lane.b32.xlu0 %v574_v28, %s1463_s25 }
 0x863   :  { %v591_v29 = vpop.permute.xlu2 %590 }
 0x864   :  { %v1793_v31 = vadd.f32 %v591_v29, %v583_v58 }
 0x866   :  { %1393 = vtanh.f32 %v1793_v31  ;;  %v727_v28 = vrot.slane %v1793_v31, 2 }
 0x86c   :  { %v1394_v32 = vpop.eup %1393 }
 0x86d   :  { %602 = vrot.lane.b32.xlu1 %v1394_v32, %s1462_s24 }
 0x87d   :  { %v577_v36 = vpop.permute.xlu0 %576 }
 0x87e   :  { %v1798_v37 = vadd.f32 %v577_v36, %v569_v34 }
 0x880   :  { %1395 = vtanh.f32 %v1798_v37  ;;  %v713_v24 = vrot.slane %v1798_v37, 6 }
 0x886   :  { %v1396_v38 = vpop.eup %1395 }
 0x887   :  { %596 = vrot.lane.b32.xlu2 %v1396_v38, %s1462_s24 }
 0x8df   :  { %v603_v39 = vpop.permute.xlu1 %602 }
 0x8e0   :  { %v1802_v40 = vmul.f32 %v603_v39, %v562_v21 }
 0x8e1   :  { %v597_v41 = vpop.permute.xlu2 %596 }
 0x8e2   :  { %v616_v25 = vrot.slane %v1802_v40, 2  ;;  %v599_v42 = vmul.f32 %v597_v41, %v543_v27 }
 0x8e4   :  { %617 = vrot.lane.b32.xlu1 %v616_v25, %s1462_s24  ;;  %607 = vrot.lane.b32.xlu0 %v599_v42, %s1463_s25 }
 0x956   :  { %v618_v35 = vpop.permute.xlu1 %617  ;;  %v608_v43 = vpop.permute.xlu0 %607 }
 0x957   :  { %610 = vst.msk [vmem:[#allocation2] sm:$0xc0] %vm168_vm12, %v608_v43  ;;  %v620_v45 = vsel %vm174_vm9, %v608_v43, %v618_v35 }
 0x958   :  { %v622_v26 = vrot.slane %v620_v45, 6  ;;  %v810_v45 = vld [vmem:[%s1975_s0 + $0x10] sm:$0xc] }
 0x95a   :  { %1301 = vmatmul.msk.f32.vlgmr.msra.gmra.mxu0 %vm33_vm10, %v622_v26  ;;  %1302 = vmatmul.msk.f32.vlgmr.msra.gmra.mxu1 %vm33_vm10, %v622_v26 }
 0x9d7   :  { %v642_v47 = vpop.f32.mrf.mxu0  ;;  %v662_v48 = vpop.f32.mrf.mxu1 }
 0x9d8   :  { %v666_v1 = vadd.f32 %v665_v46, %v642_v47  ;;  %v669_v2 = vrot.slane %v662_v48, 2  ;;  %v815_v46 = vld [vmem:[%s1975_s0 + $0x8] sm:$0x30] }
 0x9da   :  { %1397 = vtanh.f32 %v666_v1  ;;  %v671_v3 = vadd.f32 %v669_v2, %v667_v0  ;;  %v1303_v9 = vmul.f32 -1.442695, %v666_v1 }
 0x9dc   :  { %1399 = vtanh.f32 %v671_v3  ;;  %v1304_v6 = vmul.f32 -1.442695, %v671_v3 }
 0x9de   :  { %1401 = vpow2.f32 %v1304_v6 }
 0x9e0   :  { %v1398_v4 = vpop.eup %1397 }
 0x9e1   :  { %717 = vrot.lane.b32.xlu0 %v1398_v4, %s1462_s24 }
 0x9e2   :  { %v1400_v5 = vpop.eup %1399 }
 0x9e3   :  { %731 = vrot.lane.b32.xlu2 %v1400_v5, %s1462_s24 }
 0x9e4   :  { %v1402_v7 = vpop.eup %1401 }
 0x9e5   :  { %v694_v8 = vadd.f32 1.0, %v1402_v7 }
 0x9e7   :  { %1403 = vrcp.f32 %v694_v8  ;;  %v706_v50 = vand.u32 2147483648, %v694_v8  ;;  %vm700_vm14 = vweird.f32 %v694_v8  ;;  %v704_v51 = vand.u32 2147483647, %v694_v8 }
 0x9e8   :  { %1405 = vpow2.f32 %v1303_v9 }
 0x9e9   :  { %v707_v53 = vor.u32 1.1754944e-38, %v706_v50  ;;  %vm705_vm1 = vcmp.eq.f32.partialorder %v704_v51, 8.507059e+37 }
 0x9ed   :  { %v1404_v10 = vpop.eup %1403 }
 0x9ee   :  { %v696_v11 = vmul.f32 %v1404_v10, %v694_v8  ;;  %v1406_v13 = vpop.eup %1405  ;;  %vm701_vm13 = vweird.f32 %v1404_v10 }
 0x9ef   :  { %v675_v14 = vadd.f32 1.0, %v1406_v13  ;;  %vm702_vm0 = vmor %vm700_vm14, %vm701_vm13 }
 0x9f0   :  { %v697_v12 = vsub.f32 1.0, %v696_v11 }
 0x9f1   :  { %1407 = vrcp.f32 %v675_v14  ;;  %v687_v16 = vand.u32 2147483648, %v675_v14  ;;  %vm681_vm4 = vweird.f32 %v675_v14  ;;  %v685_v18 = vand.u32 2147483647, %v675_v14 }
 0x9f2   :  { %v698_v15 = vmul.f32 %v1404_v10, %v697_v12 }
 0x9f3   :  { %v688_v20 = vor.u32 1.1754944e-38, %v687_v16  ;;  %vm686_vm6 = vcmp.eq.f32.partialorder %v685_v18, 8.507059e+37 }
 0x9f4   :  { %v699_v49 = vadd.f32 %v1404_v10, %v698_v15 }
 0x9f6   :  { %v703_v52 = vsel %vm702_vm0, %v1404_v10, %v699_v49 }
 0x9f7   :  { %v1408_v54 = vpop.eup %1407  ;;  %v708_v56 = vsel %vm705_vm1, %v707_v53, %v703_v52 }
 0x9f8   :  { %v677_v59 = vmul.f32 %v1408_v54, %v675_v14  ;;  %vm682_vm2 = vweird.f32 %v1408_v54  ;;  %v729_v29 = vmul.f32 %v727_v28, %v708_v56 }
 0x9f9   :  { %vm683_vm5 = vmor %vm681_vm4, %vm682_vm2 }
 0x9fa   :  { %v678_v60 = vsub.f32 1.0, %v677_v59 }
 0x9fc   :  { %v679_v61 = vmul.f32 %v1408_v54, %v678_v60 }
 0x9fe   :  { %v680_v63 = vadd.f32 %v1408_v54, %v679_v61 }
 0xa00   :  { %v684_v19 = vsel %vm683_vm5, %v1408_v54, %v680_v63 }
 0xa01   :  { %v689_v22 = vsel %vm686_vm6, %v688_v20, %v684_v19 }
 0xa02   :  { %v715_v27 = vmul.f32 %v713_v24, %v689_v22 }
 0xa3d   :  { %v732_v55 = vpop.permute.xlu2 %731 }
 0xa3e   :  { %v734_v57 = vmul.f32 %v732_v55, %v708_v56 }
 0xa40   :  { %736 = vrot.lane.b32.xlu1 %v734_v57, %s1463_s25 }
 0xa53   :  { %v718_v21 = vpop.permute.xlu0 %717 }
 0xa54   :  { %v720_v23 = vmul.f32 %v718_v21, %v689_v22 }
 0xa56   :  { %722 = vrot.lane.b32.xlu2 %v720_v23, %s1463_s25 }
 0xab0   :  { %v723_v62 = vpop.permute.xlu2 %722 }
 0xab1   :  { %v1823_v58 = vadd.f32 %v723_v62, %v715_v27 }
 0xab2   :  { %v737_v32 = vpop.permute.xlu1 %736 }
 0xab3   :  { %1409 = vtanh.f32 %v1823_v58  ;;  %v1826_v33 = vadd.f32 %v737_v32, %v729_v29 }
 0xab5   :  { %1411 = vtanh.f32 %v1826_v33  ;;  %v875_v62 = vrot.slane %v1826_v33, 2  ;;  %v1210_v33 = vld [vmem:[%s1976_s2 + $0x18] sm:$0xff] }
 0xab6   :  { %1264 = vmatpush.msra.mxu1 %v1210_v33 }
 0xab9   :  { %v1410_v34 = vpop.eup %1409 }
 0xaba   :  { %742 = vrot.lane.b32.xlu1 %v1410_v34, %s1462_s24 }
 0xabb   :  { %v1412_v36 = vpop.eup %1411 }
 0xabc   :  { %748 = vrot.lane.b32.xlu0 %v1412_v36, %s1462_s24 }
 0xb2c   :  { %v743_v37 = vpop.permute.xlu1 %742 }
 0xb2d   :  { %v745_v38 = vmul.f32 %v743_v37, %v689_v22  ;;  %v861_v22 = vrot.slane %v1823_v58, 6 }
 0xb2e   :  { %v749_v31 = vpop.permute.xlu0 %748 }
 0xb2f   :  { %753 = vrot.lane.b32.xlu2 %v745_v38, %s1463_s25  ;;  %v1832_v39 = vmul.f32 %v749_v31, %v708_v56 }
 0xb31   :  { %v762_v41 = vrot.slane %v1832_v39, 6 }
 0xb33   :  { %763 = vrot.lane.b32.xlu0 %v762_v41, %s1462_s24 }
 0xb89   :  { %v754_v25 = vpop.permute.xlu2 %753 }
 0xb8a   :  { %756 = vst.msk [vmem:[#allocation2 + $0x8] sm:$0x3] %vm162_vm8, %v754_v25 }
 0xba5   :  { %v764_v42 = vpop.permute.xlu0 %763 }
 0xba6   :  { %v766_v35 = vsel %vm174_vm9, %v754_v25, %v764_v42  ;;  %v1209_v25 = vld [vmem:[%s1976_s2 + $0x10] sm:$0xff]  ;;  %v1208_v42 = vld [vmem:[%s1976_s2 + $0x8] sm:$0xff] }
 0xba7   :  { %1305 = vmatmul.msk.f32.vlgmr.msra.gmra.mxu2 %vm33_vm10, %v766_v35  ;;  %1306 = vmatmul.msk.f32.vlgmr.msra.gmra.mxu3 %vm33_vm10, %v766_v35  ;;  %v1207_v35 = vld [vmem:[%s1976_s2] sm:$0xff] }
 0xba8   :  { %1325 = vmatpush.msra.mxu3 %v1210_v33  ;;  %1265 = vmatpush.msra.mxu1 %v1209_v25 }
 0xbaa   :  { %1326 = vmatpush.msra.mxu3 %v1209_v25  ;;  %1266 = vmatpush.msra.mxu1 %v1208_v42 }
 0xbac   :  { %1327 = vmatpush.msra.mxu3 %v1208_v42  ;;  %1267 = vmatpush.msra.mxu1 %v1207_v35 }
 0xbae   :  { %1328 = vmatpush.msra.mxu3 %v1207_v35 }
 0xc2a   :  { %v787_v43 = vpop.f32.mrf.mxu2  ;;  %v807_v26 = vpop.f32.mrf.mxu3 }
 0xc2b   :  { %v812_v47 = vrot.slane %v787_v43, 6  ;;  %v817_v48 = vrot.slane %v807_v26, 4 }
 0xc2d   :  { %v814_v0 = vadd.f32 %v812_v47, %v810_v45  ;;  %v819_v1 = vadd.f32 %v817_v48, %v815_v46  ;;  %v1205_v47 = vld [vmem:[#allocation2] sm:$0xff] }
 0xc2f   :  { %1413 = vtanh.f32 %v814_v0  ;;  %v1307_v4 = vmul.f32 -1.442695, %v814_v0  ;;  %v1308_v8 = vmul.f32 -1.442695, %v819_v1  ;;  %v959_v0 = vld [vmem:[%s1975_s0 + $0x10] sm:$0x30] }
 0xc30   :  { %1415 = vtanh.f32 %v819_v1 }
 0xc31   :  { %1417 = vpow2.f32 %v1307_v4 }
 0xc35   :  { %v1414_v2 = vpop.eup %1413 }
 0xc36   :  { %v1416_v3 = vpop.eup %1415  ;;  %865 = vrot.lane.b32.xlu2 %v1414_v2, %s1462_s24  ;;  %v964_v2 = vld [vmem:[%s1975_s0 + $0x8] sm:$0xc] }
 0xc37   :  { %879 = vrot.lane.b32.xlu1 %v1416_v3, %s1462_s24  ;;  %v1418_v5 = vpop.eup %1417 }
 0xc38   :  { %v823_v6 = vadd.f32 1.0, %v1418_v5 }
 0xc3a   :  { %1419 = vrcp.f32 %v823_v6  ;;  %v835_v15 = vand.u32 2147483648, %v823_v6  ;;  %vm829_vm11 = vweird.f32 %v823_v6  ;;  %v833_v49 = vand.u32 2147483647, %v823_v6 }
 0xc3b   :  { %1421 = vpow2.f32 %v1308_v8 }
 0xc3c   :  { %v836_v51 = vor.u32 1.1754944e-38, %v835_v15  ;;  %vm834_vm14 = vcmp.eq.f32.partialorder %v833_v49, 8.507059e+37 }
 0xc40   :  { %v1420_v7 = vpop.eup %1419 }
 0xc41   :  { %v825_v9 = vmul.f32 %v1420_v7, %v823_v6  ;;  %v1422_v12 = vpop.eup %1421  ;;  %vm830_vm7 = vweird.f32 %v1420_v7 }
 0xc42   :  { %v842_v13 = vadd.f32 1.0, %v1422_v12  ;;  %vm831_vm13 = vmor %vm829_vm11, %vm830_vm7 }
 0xc43   :  { %v826_v10 = vsub.f32 1.0, %v825_v9 }
 0xc44   :  { %1423 = vrcp.f32 %v842_v13  ;;  %v854_v61 = vand.u32 2147483648, %v842_v13  ;;  %vm848_vm1 = vweird.f32 %v842_v13  ;;  %v852_v63 = vand.u32 2147483647, %v842_v13 }
 0xc45   :  { %v827_v11 = vmul.f32 %v1420_v7, %v826_v10 }
 0xc46   :  { %v855_v18 = vor.u32 1.1754944e-38, %v854_v61  ;;  %vm853_vm4 = vcmp.eq.f32.partialorder %v852_v63, 8.507059e+37 }
 0xc47   :  { %v828_v14 = vadd.f32 %v1420_v7, %v827_v11 }
 0xc49   :  { %v832_v50 = vsel %vm831_vm13, %v1420_v7, %v828_v14 }
 0xc4a   :  { %v837_v53 = vsel %vm834_vm14, %v836_v51, %v832_v50  ;;  %v1424_v55 = vpop.eup %1423 }
 0xc4b   :  { %v844_v56 = vmul.f32 %v1424_v55, %v842_v13  ;;  %vm849_vm0 = vweird.f32 %v1424_v55  ;;  %v863_v23 = vmul.f32 %v861_v22, %v837_v53 }
 0xc4c   :  { %vm850_vm2 = vmor %vm848_vm1, %vm849_vm0 }
 0xc4d   :  { %v845_v57 = vsub.f32 1.0, %v844_v56 }
 0xc4f   :  { %v846_v59 = vmul.f32 %v1424_v55, %v845_v57 }
 0xc51   :  { %v847_v60 = vadd.f32 %v1424_v55, %v846_v59 }
 0xc53   :  { %v851_v16 = vsel %vm850_vm2, %v1424_v55, %v847_v60 }
 0xc54   :  { %v856_v20 = vsel %vm853_vm4, %v855_v18, %v851_v16 }
 0xc55   :  { %v877_v29 = vmul.f32 %v875_v62, %v856_v20 }
 0xc90   :  { %v866_v52 = vpop.permute.xlu2 %865 }
 0xc91   :  { %v868_v54 = vmul.f32 %v866_v52, %v837_v53 }
 0xc93   :  { %870 = vrot.lane.b32.xlu1 %v868_v54, %s1463_s25 }
 0xca9   :  { %v880_v19 = vpop.permute.xlu1 %879 }
 0xcaa   :  { %v882_v21 = vmul.f32 %v880_v19, %v856_v20 }
 0xcac   :  { %884 = vrot.lane.b32.xlu0 %v882_v21, %s1463_s25 }
 0xd05   :  { %v871_v24 = vpop.permute.xlu1 %870 }
 0xd06   :  { %v1851_v27 = vadd.f32 %v871_v24, %v863_v23 }
 0xd08   :  { %1425 = vtanh.f32 %v1851_v27 }
 0xd0e   :  { %v1426_v28 = vpop.eup %1425 }
 0xd0f   :  { %890 = vrot.lane.b32.xlu0 %v1426_v28, %s1462_s24 }
 0xd1e   :  { %v885_v32 = vpop.permute.xlu0 %884 }
 0xd1f   :  { %v1856_v34 = vadd.f32 %v885_v32, %v877_v29 }
 0xd21   :  { %1427 = vtanh.f32 %v1856_v34  ;;  %v1024_v29 = vrot.slane %v1856_v34, 2 }
 0xd27   :  { %v1428_v36 = vpop.eup %1427 }
 0xd28   :  { %896 = vrot.lane.b32.xlu2 %v1428_v36, %s1462_s24 }
 0xd81   :  { %v891_v58 = vpop.permute.xlu0 %890 }
 0xd82   :  { %v897_v37 = vpop.permute.xlu2 %896  ;;  %v893_v38 = vmul.f32 %v891_v58, %v837_v53 }
 0xd83   :  { %v1860_v31 = vmul.f32 %v897_v37, %v856_v20 }
 0xd84   :  { %901 = vrot.lane.b32.xlu1 %v893_v38, %s1463_s25  ;;  %v1010_v38 = vrot.slane %v1851_v27, 6 }
 0xd85   :  { %v910_v41 = vrot.slane %v1860_v31, 2 }
 0xd87   :  { %911 = vrot.lane.b32.xlu2 %v910_v41, %s1462_s24 }
 0xde1   :  { %v912_v43 = vpop.permute.xlu2 %911 }
 0xdf6   :  { %v902_v45 = vpop.permute.xlu1 %901 }
 0xdf7   :  { %904 = vst.msk [vmem:[#allocation2 + $0x8] sm:$0xc] %vm313_vm3, %v902_v45  ;;  %v914_v26 = vsel %vm174_vm9, %v902_v45, %v912_v43 }
 0xdf8   :  { %v916_v46 = vrot.slane %v914_v26, 2 }
 0xdfa   :  { %1309 = vmatmul.msk.f32.vlgmr.msrb.gmra.mxu0 %vm33_vm10, %v916_v46  ;;  %1310 = vmatmul.msk.f32.vlgmr.msrb.gmra.mxu1 %vm33_vm10, %v916_v46 }
 0xe02   :  { %1319 = vmatmul.msk.f32.vlgmr.msra.gmra.mxu1 %vm174_vm9, %v1205_v47 }
 0xe77   :  { %v936_v48 = vpop.f32.mrf.mxu0  ;;  %v956_v1 = vpop.f32.mrf.mxu1 }
 0xe78   :  { %v961_v3 = vrot.slane %v936_v48, 4  ;;  %v966_v4 = vrot.slane %v956_v1, 6 }
 0xe7a   :  { %v963_v5 = vadd.f32 %v961_v3, %v959_v0  ;;  %v968_v6 = vadd.f32 %v966_v4, %v964_v2  ;;  %v1113_v0 = vld [vmem:[%s1975_s0 + $0x8] sm:$0x3]  ;;  %v1108_v2 = vld [vmem:[%s1975_s0 + $0x10] sm:$0xc0] }
 0xe7c   :  { %1429 = vtanh.f32 %v963_v5  ;;  %v1311_v9 = vmul.f32 -1.442695, %v963_v5  ;;  %v1312_v10 = vmul.f32 -1.442695, %v968_v6 }
 0xe7d   :  { %1431 = vtanh.f32 %v968_v6 }
 0xe7e   :  { %1433 = vpow2.f32 %v1311_v9 }
 0xe7f   :  { %1435 = vpow2.f32 %v1312_v10 }
 0xe82   :  { %v1430_v7 = vpop.eup %1429 }
 0xe83   :  { %v1432_v8 = vpop.eup %1431  ;;  %1014 = vrot.lane.b32.xlu1 %v1430_v7, %s1462_s24 }
 0xe84   :  { %1028 = vrot.lane.b32.xlu0 %v1432_v8, %s1462_s24  ;;  %v1434_v11 = vpop.eup %1433 }
 0xe85   :  { %v1436_v12 = vpop.eup %1435  ;;  %v972_v13 = vadd.f32 1.0, %v1434_v11 }
 0xe86   :  { %v991_v14 = vadd.f32 1.0, %v1436_v12 }
 0xe87   :  { %1437 = vrcp.f32 %v972_v13  ;;  %v984_v59 = vand.u32 2147483648, %v972_v13  ;;  %vm978_vm7 = vweird.f32 %v972_v13  ;;  %v982_v61 = vand.u32 2147483647, %v972_v13 }
 0xe88   :  { %1439 = vrcp.f32 %v991_v14  ;;  %v1003_v60 = vand.u32 2147483648, %v991_v14  ;;  %vm997_vm11 = vweird.f32 %v991_v14  ;;  %v1001_v63 = vand.u32 2147483647, %v991_v14 }
 0xe89   :  { %v985_v19 = vor.u32 1.1754944e-38, %v984_v59  ;;  %vm983_vm0 = vcmp.eq.f32.partialorder %v982_v61, 8.507059e+37 }
 0xe8a   :  { %v1004_v20 = vor.u32 1.1754944e-38, %v1003_v60  ;;  %vm1002_vm1 = vcmp.eq.f32.partialorder %v1001_v63, 8.507059e+37 }
 0xe8d   :  { %v1438_v15 = vpop.eup %1437 }
 0xe8e   :  { %v1440_v49 = vpop.eup %1439  ;;  %v974_v50 = vmul.f32 %v1438_v15, %v972_v13  ;;  %vm979_vm5 = vweird.f32 %v1438_v15 }
 0xe8f   :  { %v993_v51 = vmul.f32 %v1440_v49, %v991_v14  ;;  %vm998_vm6 = vweird.f32 %v1440_v49  ;;  %vm980_vm13 = vmor %vm978_vm7, %vm979_vm5 }
 0xe90   :  { %v975_v52 = vsub.f32 1.0, %v974_v50  ;;  %vm999_vm14 = vmor %vm997_vm11, %vm998_vm6 }
 0xe91   :  { %v994_v53 = vsub.f32 1.0, %v993_v51 }
 0xe92   :  { %v976_v54 = vmul.f32 %v1438_v15, %v975_v52 }
 0xe93   :  { %v995_v55 = vmul.f32 %v1440_v49, %v994_v53 }
 0xe94   :  { %v977_v56 = vadd.f32 %v1438_v15, %v976_v54 }
 0xe95   :  { %v996_v57 = vadd.f32 %v1440_v49, %v995_v55 }
 0xe96   :  { %v981_v16 = vsel %vm980_vm13, %v1438_v15, %v977_v56 }
 0xe97   :  { %v1000_v18 = vsel %vm999_vm14, %v1440_v49, %v996_v57  ;;  %v986_v22 = vsel %vm983_vm0, %v985_v19, %v981_v16 }
 0xe98   :  { %v1005_v24 = vsel %vm1002_vm1, %v1004_v20, %v1000_v18  ;;  %v1012_v41 = vmul.f32 %v1010_v38, %v986_v22 }
 0xe99   :  { %v1026_v32 = vmul.f32 %v1024_v29, %v1005_v24 }
 0xef5   :  { %v1015_v21 = vpop.permute.xlu1 %1014 }
 0xef6   :  { %v1029_v23 = vpop.permute.xlu0 %1028  ;;  %v1017_v28 = vmul.f32 %v1015_v21, %v986_v22 }
 0xef7   :  { %v1031_v62 = vmul.f32 %v1029_v23, %v1005_v24 }
 0xef8   :  { %1019 = vrot.lane.b32.xlu0 %v1017_v28, %s1463_s25 }
 0xef9   :  { %1033 = vrot.lane.b32.xlu2 %v1031_v62, %s1463_s25 }
 0xf53   :  { %v1034_v36 = vpop.permute.xlu2 %1033 }
 0xf54   :  { %v1893_v58 = vadd.f32 %v1034_v36, %v1026_v32 }
 0xf56   :  { %1441 = vtanh.f32 %v1893_v58  ;;  %v1170_v29 = vrot.slane %v1893_v58, 2 }
 0xf5c   :  { %v1442_v37 = vpop.eup %1441 }
 0xf5d   :  { %1045 = vrot.lane.b32.xlu1 %v1442_v37, %s1462_s24 }
 0xf6a   :  { %v1020_v33 = vpop.permute.xlu0 %1019 }
 0xf6b   :  { %v1898_v25 = vadd.f32 %v1020_v33, %v1012_v41 }
 0xf6d   :  { %1443 = vtanh.f32 %v1898_v25  ;;  %v1156_v32 = vrot.slane %v1898_v25, 6  ;;  %v1216_v25 = vld [vmem:[%s1976_s2 + $0x38] sm:$0xff] }
 0xf6e   :  { %1321 = vmatpush.msra.mxu2 %v1216_v25  ;;  %1235 = vmatpush.msra.mxu0 %v1216_v25 }
 0xf73   :  { %v1444_v42 = vpop.eup %1443 }
 0xf74   :  { %1039 = vrot.lane.b32.xlu2 %v1444_v42, %s1462_s24 }
 0xfce   :  { %v1040_v34 = vpop.permute.xlu2 %1039 }
 0xfcf   :  { %v1046_v35 = vpop.permute.xlu1 %1045  ;;  %v1042_v43 = vmul.f32 %v1040_v34, %v986_v22 }
 0xfd0   :  { %v1902_v45 = vmul.f32 %v1046_v35, %v1005_v24  ;;  %v1215_v35 = vld [vmem:[%s1976_s2 + $0x30] sm:$0xff] }
 0xfd1   :  { %1050 = vrot.lane.b32.xlu0 %v1042_v43, %s1463_s25  ;;  %1322 = vmatpush.msra.mxu2 %v1215_v35 }
 0xfd2   :  { %v1059_v26 = vrot.slane %v1902_v45, 6  ;;  %1236 = vmatpush.msra.mxu0 %v1215_v35 }
 0xfd4   :  { %1060 = vrot.lane.b32.xlu1 %v1059_v26, %s1462_s24 }
0x1043   :  { %v1051_v27 = vpop.permute.xlu0 %1050 }
0x1044   :  { %1053 = vst.msk [vmem:[#allocation2 + $0x8] sm:$0x30] %vm319_vm15, %v1051_v27 }
0x1046   :  { %v1061_v46 = vpop.permute.xlu1 %1060 }
0x1047   :  { %v1063_v47 = vsel %vm174_vm9, %v1051_v27, %v1061_v46 }
0x1048   :  { %v1065_v48 = vrot.slane %v1063_v47, 4 }
0x104a   :  { %1313 = vmatmul.msk.f32.vlgmr.msrb.gmra.mxu2 %vm33_vm10, %v1065_v48  ;;  %1314 = vmatmul.msk.f32.vlgmr.msrb.gmra.mxu3 %vm33_vm10, %v1065_v48 }
0x10cd   :  { %v1085_v1 = vpop.f32.mrf.mxu2  ;;  %v1105_v3 = vpop.f32.mrf.mxu3 }
0x10ce   :  { %v1110_v4 = vrot.slane %v1085_v1, 2  ;;  %v1114_v5 = vadd.f32 %v1113_v0, %v1105_v3 }
0x10d0   :  { %v1112_v6 = vadd.f32 %v1110_v4, %v1108_v2  ;;  %1445 = vtanh.f32 %v1114_v5  ;;  %v1316_v12 = vmul.f32 -1.442695, %v1114_v5 }
0x10d2   :  { %1447 = vtanh.f32 %v1112_v6  ;;  %v1315_v9 = vmul.f32 -1.442695, %v1112_v6 }
0x10d4   :  { %1449 = vpow2.f32 %v1315_v9  ;;  %v1269_v9 = vpop.f32.mrf.mxu1 }
0x10d6   :  { %v1446_v7 = vpop.eup %1445 }
0x10d7   :  { %1174 = vrot.lane.b32.xlu0 %v1446_v7, %s1462_s24 }
0x10d8   :  { %v1448_v8 = vpop.eup %1447 }
0x10d9   :  { %1160 = vrot.lane.b32.xlu2 %v1448_v8, %s1462_s24 }
0x10da   :  { %v1450_v10 = vpop.eup %1449 }
0x10db   :  { %v1118_v11 = vadd.f32 1.0, %v1450_v10 }
0x10dd   :  { %1451 = vrcp.f32 %v1118_v11  ;;  %v1130_v53 = vand.u32 2147483648, %v1118_v11  ;;  %vm1124_vm2 = vweird.f32 %v1118_v11  ;;  %v1128_v54 = vand.u32 2147483647, %v1118_v11 }
0x10de   :  { %1453 = vpow2.f32 %v1316_v12 }
0x10df   :  { %v1131_v56 = vor.u32 1.1754944e-38, %v1130_v53  ;;  %vm1129_vm5 = vcmp.eq.f32.partialorder %v1128_v54, 8.507059e+37 }
0x10e3   :  { %v1452_v13 = vpop.eup %1451 }
0x10e4   :  { %v1120_v14 = vmul.f32 %v1452_v13, %v1118_v11  ;;  %v1454_v49 = vpop.eup %1453  ;;  %vm1125_vm10 = vweird.f32 %v1452_v13 }
0x10e5   :  { %v1137_v51 = vadd.f32 1.0, %v1454_v49  ;;  %vm1126_vm4 = vmor %vm1124_vm2, %vm1125_vm10 }
0x10e6   :  { %v1121_v15 = vsub.f32 1.0, %v1120_v14 }
0x10e7   :  { %1455 = vrcp.f32 %v1137_v51  ;;  %v1149_v20 = vand.u32 2147483648, %v1137_v51  ;;  %vm1143_vm7 = vweird.f32 %v1137_v51  ;;  %v1147_v21 = vand.u32 2147483647, %v1137_v51 }
0x10e8   :  { %v1122_v50 = vmul.f32 %v1452_v13, %v1121_v15 }
0x10e9   :  { %v1150_v23 = vor.u32 1.1754944e-38, %v1149_v20  ;;  %vm1148_vm13 = vcmp.eq.f32.partialorder %v1147_v21, 8.507059e+37 }
0x10ea   :  { %v1123_v52 = vadd.f32 %v1452_v13, %v1122_v50 }
0x10ec   :  { %v1127_v55 = vsel %vm1126_vm4, %v1452_v13, %v1123_v52 }
0x10ed   :  { %v1456_v57 = vpop.eup %1455  ;;  %v1132_v60 = vsel %vm1129_vm5, %v1131_v56, %v1127_v55 }
0x10ee   :  { %v1139_v63 = vmul.f32 %v1456_v57, %v1137_v51  ;;  %vm1144_vm6 = vweird.f32 %v1456_v57  ;;  %v1158_v41 = vmul.f32 %v1156_v32, %v1132_v60 }
0x10ef   :  { %vm1145_vm11 = vmor %vm1143_vm7, %vm1144_vm6 }
0x10f0   :  { %v1140_v16 = vsub.f32 1.0, %v1139_v63 }
0x10f2   :  { %v1141_v18 = vmul.f32 %v1456_v57, %v1140_v16 }
0x10f4   :  { %v1142_v19 = vadd.f32 %v1456_v57, %v1141_v18 }
0x10f6   :  { %v1146_v22 = vsel %vm1145_vm11, %v1456_v57, %v1142_v19 }
0x10f7   :  { %v1151_v28 = vsel %vm1148_vm13, %v1150_v23, %v1146_v22 }
0x10f8   :  { %v1172_v36 = vmul.f32 %v1170_v29, %v1151_v28 }
0x1133   :  { %v1161_v59 = vpop.permute.xlu2 %1160 }
0x1134   :  { %v1163_v61 = vmul.f32 %v1161_v59, %v1132_v60 }
0x1136   :  { %1165 = vrot.lane.b32.xlu1 %v1163_v61, %s1463_s25 }
0x1149   :  { %v1175_v24 = vpop.permute.xlu0 %1174 }
0x114a   :  { %v1177_v62 = vmul.f32 %v1175_v24, %v1151_v28 }
0x114c   :  { %1179 = vrot.lane.b32.xlu2 %v1177_v62, %s1463_s25 }
0x1154   :  { %165 = vrot.lane.b32.xlu2 %v1667_v17, %s1463_s25 }
0x115c   :  { %612 = vrot.lane.b32.xlu2 %v1802_v40, %s1463_s25 }
0x1164   :  { %906 = vrot.lane.b32.xlu2 %v1860_v31, %s1463_s25 }
0x11a6   :  { %v1180_v37 = vpop.permute.xlu2 %1179 }
0x11a7   :  { %v1182_v38 = vadd.f32 %v1180_v37, %v1172_v36 }
0x11a8   :  { %v1166_v33 = vpop.permute.xlu1 %1165 }
0x11a9   :  { %1457 = vtanh.f32 %v1182_v38  ;;  %v1168_v42 = vadd.f32 %v1166_v33, %v1158_v41 }
0x11ab   :  { %1459 = vtanh.f32 %v1168_v42 }
0x11ae   :  { %v166_v34 = vpop.permute.xlu2 %165 }
0x11af   :  { %v1458_v17 = vpop.eup %1457  ;;  %169 = vst.msk [vmem:[#allocation3 + $0x8] sm:$0xc0] %vm168_vm12, %v166_v34 }
0x11b0   :  { %1191 = vrot.lane.b32.xlu1 %v1458_v17, %s1462_s24 }
0x11b1   :  { %v1460_v40 = vpop.eup %1459 }
0x11b2   :  { %1185 = vrot.lane.b32.xlu0 %v1460_v40, %s1462_s24 }
0x11b6   :  { %v613_v31 = vpop.permute.xlu2 %612 }
0x11b7   :  { %615 = vst.msk [vmem:[#allocation3 + $0x8] sm:$0x3] %vm162_vm8, %v613_v31 }
0x11b8   :  { %466 = vrot.lane.b32.xlu1 %v1757_v44, %s1463_s25  ;;  %v1213_v44 = vld [vmem:[%s1976_s2 + $0x20] sm:$0xff] }
0x11ba   :  { %316 = vrot.lane.b32.xlu0 %v1712_v30, %s1463_s25  ;;  %v1214_v30 = vld [vmem:[%s1976_s2 + $0x28] sm:$0xff] }
0x11bb   :  { %1323 = vmatpush.msra.mxu2 %v1214_v30  ;;  %1237 = vmatpush.msra.mxu0 %v1214_v30 }
0x11bd   :  { %1324 = vmatpush.msra.mxu2 %v1213_v44  ;;  %1238 = vmatpush.msra.mxu0 %v1213_v44 }
0x11be   :  { %v907_v58 = vpop.permute.xlu2 %906 }
0x11bf   :  { %909 = vst.msk [vmem:[#allocation3] sm:$0x30] %vm319_vm15, %v907_v58 }
0x11c0   :  { %758 = vrot.lane.b32.xlu1 %v1832_v39, %s1463_s25 }
0x1222   :  { %v1192_v39 = vpop.permute.xlu1 %1191 }
0x1223   :  { %v1194_v43 = vmul.f32 %v1192_v39, %v1151_v28 }
0x1224   :  { %v1186_v26 = vpop.permute.xlu0 %1185 }
0x1225   :  { %v1188_v27 = vmul.f32 %v1186_v26, %v1132_v60  ;;  %1201 = vrot.lane.b32.xlu1 %v1194_v43, %s1463_s25 }
0x1227   :  { %1196 = vrot.lane.b32.xlu0 %v1188_v27, %s1463_s25 }
0x122a   :  { %v467_v46 = vpop.permute.xlu1 %466 }
0x122b   :  { %469 = vst.msk [vmem:[#allocation3 + $0x8] sm:$0xc] %vm313_vm3, %v467_v46 }
0x122c   :  { %v317_v47 = vpop.permute.xlu0 %316 }
0x122d   :  { %320 = vst.msk [vmem:[#allocation3 + $0x8] sm:$0x30] %vm319_vm15, %v317_v47 }
0x122f   :  { %1055 = vrot.lane.b32.xlu0 %v1902_v45, %s1463_s25  ;;  %v1332_v45 = vld [vmem:[%s1977_s3] ss:$0 sm:$0xff] }
0x1232   :  { %v759_v48 = vpop.permute.xlu1 %758 }
0x1233   :  { %761 = vst.msk [vmem:[#allocation3] sm:$0xc0] %vm168_vm12, %v759_v48 }
0x1234   :  { %v1212_v0 = vld [vmem:[#allocation3 + $0x8] sm:$0xff] }
0x1235   :  { %1318 = vmatmul.msk.f32.vlgmr.msra.gmra.mxu2 %vm174_vm9, %v1212_v0 }
0x1297   :  { %v1202_v1 = vpop.permute.xlu1 %1201 }
0x1298   :  { %1204 = vst.msk [vmem:[#allocation3] sm:$0x3] %vm162_vm8, %v1202_v1 }
0x1299   :  { %v1197_v2 = vpop.permute.xlu0 %1196 }
0x129a   :  { %1199 = vst.msk [vmem:[#allocation2 + $0x8] sm:$0xc0] %vm168_vm12, %v1197_v2 }
0x12a1   :  { %v1056_v3 = vpop.permute.xlu0 %1055  ;;  %v1206_v4 = vld [vmem:[#allocation2 + $0x8] sm:$0xff] }
0x12a2   :  { %1058 = vst.msk [vmem:[#allocation3] sm:$0xc] %vm313_vm3, %v1056_v3  ;;  %1320 = vmatmul.msk.f32.vlgmr.msra.gmra.mxu3 %vm174_vm9, %v1206_v4 }
0x12a9   :  { %v1211_v5 = vld [vmem:[#allocation3] sm:$0xff] }
0x12aa   :  { %1317 = vmatmul.msk.f32.vlgmr.msra.gmra.mxu0 %vm174_vm9, %v1211_v5 }
0x12b8   :  { %v1243_v6 = vpop.f32.mrf.mxu2 }
0x1325   :  { %v1272_v7 = vpop.f32.mrf.mxu3 }
0x1326   :  { %v1273_v8 = vadd.f32 %v1272_v7, %v1243_v6 }
0x1327   :  { %v1240_v10 = vpop.f32.mrf.mxu0 }
0x1328   :  { %v1280_v11 = vadd.f32 %v1332_v45, %v1273_v8  ;;  %v1270_v12 = vadd.f32 %v1269_v9, %v1240_v10 }
0x132a   :  { %1282 = vst [vmem:[%s1978_s4 + $0x8] sm:$0xff] %v1280_v11  ;;  %v1279_v13 = vadd.f32 %v1332_v45, %v1270_v12 }
0x132c   :  { %1281 = vst [vmem:[%s1978_s4] sm:$0xff] %v1279_v13 }

// kernel: tagger_forward.2
= control target key start
LH: loop header
LB: loop body
LE: loop exit
PB: predicated region body
PF: predicated region fallthrough
CT: control target
= control target key end

     0   :  { %vm96_vm0 = vcmask 1040384   ;;  %vm100_vm1 = vcmask 1041409   ;;  %vm104_vm2 = vcmask 1042434   ;;  %vm108_vm3 = vcmask 1043459   ;;  %s3058_s2 = inlined_call_operand.vmem [shape: bf16[3,16,16], index: 2, kind: input, shape index: {}]   ;;  %s3059_s0 = inlined_call_operand.vmem [shape: bf16[16,8,16], index: 0, kind: input, shape index: {}]   ;;  %s3060_s3 = inlined_call_operand.vmem [shape: f32[1,16], index: 3, kind: input, shape index: {}]   ;;  %s3061_s5 = inlined_call_operand.vmem [shape: bf16[16,256], index: 5, kind: input, shape index: {}]   ;;  %s3062_s4 = inlined_call_operand.vmem [shape: bf16[32,256], index: 4, kind: input, shape index: {}]   ;;  %s3063_s1 = inlined_call_operand.vmem [shape: bf16[16,32], index: 1, kind: input, shape index: {}]   ;;  %s3064_s6 = inlined_call_operand.vmem [shape: f32[1,256], index: 6, kind: input, shape index: {}]   ;;  %s3065_s7 = inlined_call_operand.vmem [shape: f32[16,256], index: 7, kind: output, shape index: {}]  }
   0x1   :  { %v2279_v0 = vld [vmem:[%s3058_s2 + $0x8] sm:$0xff]  ;;  %v2278_v1 = vld [vmem:[%s3058_s2] sm:$0xff]  ;;  %vm292_vm4 = vsmask.f32 256  ;;  %vm293_vm5 = vsmask.f32 1284 }
   0x2   :  { %v45_v2 = vld [vmem:[%s3059_s0] sm:$0xf]  ;;  %v46_v3 = vld [vmem:[%s3059_s0 + $0x4] sm:$0xf]  ;;  %v2344_v4 = vld [vmem:[%s3059_s0 + $0x8] sm:$0xf]  ;;  %826 = vmatpush.bf16.msra.mxu0 %v2279_v0  ;;  %1152 = vmatpush.bf16.msra.mxu1 %v2278_v1 }
   0x3   :  { %v80_v5 = vrot.slane %v45_v2, 3  ;;  %v81_v6 = vrot.slane %v46_v3, 3  ;;  %v2347_v7 = vrot.slane %v2344_v4, 3  ;;  %vm295_vm6 = vsmask.f32 2312  ;;  %vm294_vm7 = vmor %vm292_vm4, %vm293_vm5 }
   0x4   :  { %vm296_vm8 = vmor %vm294_vm7, %vm295_vm6  ;;  %vm297_vm9 = vsmask.f32 3340  ;;  %vm299_vm10 = vsmask.f32 4368  ;;  %vm301_vm12 = vsmask.f32 5396 }
   0x5   :  { %v99_v8 = vsel %vm96_vm0, %v45_v2, %v80_v5  ;;  %v101_v9 = vsel %vm100_vm1, %v45_v2, %v80_v5  ;;  %v105_v10 = vsel %vm104_vm2, %v45_v2, %v80_v5  ;;  %v109_v11 = vsel %vm108_vm3, %v45_v2, %v80_v5  ;;  %vm298_vm11 = vmor %vm296_vm8, %vm297_vm9  ;;  %v48_v53 = vld [vmem:[%s3059_s0 + $0xc] sm:$0xf]  ;;  %v49_v54 = vld [vmem:[%s3059_s0 + $0x10] sm:$0xf] }
   0x6   :  { %v103_v12 = vrot.slane %v101_v9, 1  ;;  %v107_v13 = vrot.slane %v105_v10, 2  ;;  %v111_v14 = vrot.slane %v109_v11, 3  ;;  %v114_v15 = vsel %vm96_vm0, %v46_v3, %v81_v6  ;;  %vm300_vm14 = vmor %vm298_vm11, %vm299_vm10  ;;  %v50_v55 = vld [vmem:[%s3059_s0 + $0x14] sm:$0xf] }
   0x7   :  { %v115_v16 = vsel %vm100_vm1, %v46_v3, %v81_v6  ;;  %v118_v17 = vsel %vm104_vm2, %v46_v3, %v81_v6  ;;  %v121_v18 = vsel %vm108_vm3, %v46_v3, %v81_v6  ;;  %v126_v19 = vsel %vm96_vm0, %v2344_v4, %v2347_v7  ;;  %vm302_vm4 = vmor %vm300_vm14, %vm301_vm12  ;;  %v2404_v58 = vld [vmem:[%s3059_s0 + $0x18] sm:$0xf]  ;;  %v2414_v63 = vld [vmem:[%s3059_s0 + $0x1c] sm:$0xf] }
   0x8   :  { %v117_v20 = vrot.slane %v115_v16, 1  ;;  %v120_v21 = vrot.slane %v118_v17, 2  ;;  %v123_v22 = vrot.slane %v121_v18, 3  ;;  %v127_v23 = vsel %vm100_vm1, %v2344_v4, %v2347_v7 }
   0x9   :  { %v129_v24 = vrot.slane %v127_v23, 1  ;;  %v2366_v25 = vsel %vm104_vm2, %v2344_v4, %v2347_v7  ;;  %vm303_vm13 = vsmask.f32 6424  ;;  %v307_v27 = vshrl.u32 %v99_v8, 16 }
   0xa   :  { %v132_v26 = vrot.slane %v2366_v25, 2  ;;  %vm305_vm15 = vsmask.f32 7452  ;;  %v312_v28 = vshll.u32 %v103_v12, 16  ;;  %v315_v29 = vshrl.u32 %v103_v12, 16  ;;  %vm304_vm5 = vmor %vm302_vm4, %vm303_vm13 }
   0xb   :  { %v320_v30 = vshll.u32 %v107_v13, 16  ;;  %v323_v31 = vshrl.u32 %v107_v13, 16  ;;  %v328_v32 = vshll.u32 %v111_v14, 16  ;;  %v331_v33 = vshrl.u32 %v114_v15, 16  ;;  %vm2369_vm6 = vmor %vm304_vm5, %vm305_vm15 }
   0xc   :  { %v336_v34 = vshll.u32 %v117_v20, 16  ;;  %v339_v35 = vshrl.u32 %v117_v20, 16  ;;  %v344_v36 = vshll.u32 %v120_v21, 16  ;;  %v347_v38 = vshrl.u32 %v120_v21, 16 }
   0xd   :  { %v352_v39 = vshll.u32 %v123_v22, 16  ;;  %v355_v40 = vshrl.u32 %v126_v19, 16  ;;  %v314_v41 = vsel %vm2369_vm6, %v307_v27, %v312_v28  ;;  %v322_v42 = vsel %vm2369_vm6, %v315_v29, %v320_v30 }
   0xe   :  { %v330_v43 = vsel %vm2369_vm6, %v323_v31, %v328_v32  ;;  %v360_v44 = vshll.u32 %v129_v24, 16  ;;  %v338_v45 = vsel %vm2369_vm6, %v331_v33, %v336_v34  ;;  %v363_v46 = vshrl.u32 %v129_v24, 16  ;;  %692 = vst [vmem:[#allocation1] ss:$9 sm:$0xff] %v314_v41 }
   0xf   :  { %v368_v47 = vshll.u32 %v132_v26, 16  ;;  %v346_v48 = vsel %vm2369_vm6, %v339_v35, %v344_v36  ;;  %695 = vst [vmem:[#allocation1 + $0x1] ss:$9 sm:$0xff] %v322_v42  ;;  %v354_v49 = vsel %vm2369_vm6, %v347_v38, %v352_v39  ;;  %vm806_vm7 = vcmask 130048  }
  0x10   :  { %698 = vst [vmem:[#allocation1 + $0x2] ss:$9 sm:$0xff] %v330_v43  ;;  %v362_v50 = vsel %vm2369_vm6, %v355_v40, %v360_v44  ;;  %v83_v56 = vrot.slane %v48_v53, 3  ;;  %v84_v57 = vrot.slane %v49_v54, 3  ;;  %v85_v59 = vrot.slane %v50_v55, 3 }
  0x11   :  { %701 = vst [vmem:[#allocation1 + $0x3] ss:$9 sm:$0xff] %v338_v45  ;;  %v370_v51 = vsel %vm2369_vm6, %v363_v46, %v368_v47  ;;  %v133_v60 = vsel %vm108_vm3, %v2344_v4, %v2347_v7  ;;  %v86_v2 = vrot.slane %v2404_v58, 3  ;;  %v87_v10 = vrot.slane %v2414_v63, 3 }
  0x12   :  { %704 = vst [vmem:[#allocation1 + $0x4] ss:$9 sm:$0xff] %v346_v48  ;;  %v139_v61 = vsel %vm100_vm1, %v48_v53, %v83_v56  ;;  %v142_v62 = vsel %vm104_vm2, %v48_v53, %v83_v56  ;;  %v145_v0 = vsel %vm108_vm3, %v48_v53, %v83_v56  ;;  %v151_v1 = vsel %vm100_vm1, %v49_v54, %v84_v57 }
  0x13   :  { %707 = vst [vmem:[#allocation1 + $0x5] ss:$9 sm:$0xff] %v354_v49  ;;  %v135_v3 = vrot.slane %v133_v60, 3  ;;  %v154_v5 = vsel %vm104_vm2, %v49_v54, %v84_v57  ;;  %v157_v4 = vsel %vm108_vm3, %v49_v54, %v84_v57  ;;  %v138_v6 = vsel %vm96_vm0, %v48_v53, %v83_v56  ;;  %v53_v60 = vld [vmem:[%s3059_s0 + $0x20] sm:$0xf] }
  0x14   :  { %710 = vst [vmem:[#allocation1 + $0x6] ss:$9 sm:$0xff] %v362_v50  ;;  %v141_v7 = vrot.slane %v139_v61, 1  ;;  %v144_v8 = vrot.slane %v142_v62, 2  ;;  %v163_v9 = vsel %vm100_vm1, %v50_v55, %v85_v59  ;;  %v147_v11 = vrot.slane %v145_v0, 3 }
  0x15   :  { %713 = vst [vmem:[#allocation1 + $0x7] ss:$9 sm:$0xff] %v370_v51  ;;  %v150_v12 = vsel %vm96_vm0, %v49_v54, %v84_v57  ;;  %v153_v13 = vrot.slane %v151_v1, 1  ;;  %v156_v14 = vrot.slane %v154_v5, 2  ;;  %v159_v15 = vrot.slane %v157_v4, 3 }
  0x16   :  { %v162_v16 = vsel %vm96_vm0, %v50_v55, %v85_v59  ;;  %v371_v17 = vshrl.u32 %v132_v26, 16  ;;  %v165_v18 = vrot.slane %v163_v9, 1  ;;  %v166_v19 = vsel %vm104_vm2, %v50_v55, %v85_v59 }
  0x17   :  { %v376_v20 = vshll.u32 %v135_v3, 16  ;;  %v379_v21 = vshrl.u32 %v138_v6, 16  ;;  %v384_v22 = vshll.u32 %v141_v7, 16  ;;  %v387_v23 = vshrl.u32 %v141_v7, 16  ;;  %v54_v7 = vld [vmem:[%s3059_s0 + $0x24] sm:$0xf] }
  0x18   :  { %v392_v24 = vshll.u32 %v144_v8, 16  ;;  %v395_v27 = vshrl.u32 %v144_v8, 16  ;;  %v400_v29 = vshll.u32 %v147_v11, 16  ;;  %v403_v30 = vshrl.u32 %v150_v12, 16 }
  0x19   :  { %v378_v28 = vsel %vm2369_vm6, %v371_v17, %v376_v20  ;;  %v408_v31 = vshll.u32 %v153_v13, 16  ;;  %v386_v32 = vsel %vm2369_vm6, %v379_v21, %v384_v22  ;;  %v411_v26 = vshrl.u32 %v153_v13, 16 }
  0x1a   :  { %v394_v25 = vsel %vm2369_vm6, %v387_v23, %v392_v24  ;;  %v416_v33 = vshll.u32 %v156_v14, 16  ;;  %v402_v34 = vsel %vm2369_vm6, %v395_v27, %v400_v29  ;;  %v419_v36 = vshrl.u32 %v156_v14, 16  ;;  %v2475_v14 = vld [vmem:[%s3059_s0 + $0x28] sm:$0xf] }
  0x1b   :  { %v410_v35 = vsel %vm2369_vm6, %v403_v30, %v408_v31  ;;  %v424_v38 = vshll.u32 %v159_v15, 16  ;;  %v169_v39 = vsel %vm108_vm3, %v50_v55, %v85_v59  ;;  %v427_v41 = vshrl.u32 %v162_v16, 16 }
  0x1c   :  { %v714_v52 = vld [vmem:[#allocation1] sm:$0xff]  ;;  %v418_v40 = vsel %vm2369_vm6, %v411_v26, %v416_v33  ;;  %v432_v42 = vshll.u32 %v165_v18, 16  ;;  %v175_v43 = vsel %vm100_vm1, %v2404_v58, %v86_v2  ;;  %v168_v45 = vrot.slane %v166_v19, 2 }
  0x1d   :  { %2218 = vmatmul.msk.bf16.vlgmr.msra.gmra.mxu0 %vm806_vm7, %v714_v52  ;;  %716 = vst [vmem:[#allocation1] ss:$9 sm:$0xff] %v378_v28  ;;  %v426_v44 = vsel %vm2369_vm6, %v419_v36, %v424_v38  ;;  %v178_v46 = vsel %vm104_vm2, %v2404_v58, %v86_v2  ;;  %v171_v48 = vrot.slane %v169_v39, 3  ;;  %v181_v49 = vsel %vm108_vm3, %v2404_v58, %v86_v2 }
  0x1e   :  { %718 = vst [vmem:[#allocation1 + $0x1] ss:$9 sm:$0xff] %v386_v32  ;;  %v434_v47 = vsel %vm2369_vm6, %v427_v41, %v432_v42  ;;  %v177_v50 = vrot.slane %v175_v43, 1  ;;  %v187_v51 = vsel %vm100_vm1, %v2414_v63, %v87_v10  ;;  %v174_v52 = vsel %vm96_vm0, %v2404_v58, %v86_v2 }
  0x1f   :  { %720 = vst [vmem:[#allocation1 + $0x2] ss:$9 sm:$0xff] %v394_v25  ;;  %v180_v53 = vrot.slane %v178_v46, 2  ;;  %v190_v54 = vsel %vm104_vm2, %v2414_v63, %v87_v10  ;;  %v183_v55 = vrot.slane %v181_v49, 3  ;;  %v193_v56 = vsel %vm108_vm3, %v2414_v63, %v87_v10  ;;  %v56_v49 = vld [vmem:[%s3059_s0 + $0x2c] sm:$0xf] }
  0x20   :  { %722 = vst [vmem:[#allocation1 + $0x3] ss:$9 sm:$0xff] %v402_v34  ;;  %v435_v57 = vshrl.u32 %v165_v18, 16  ;;  %v440_v59 = vshll.u32 %v168_v45, 16  ;;  %v189_v61 = vrot.slane %v187_v51, 1  ;;  %v443_v62 = vshrl.u32 %v168_v45, 16 }
  0x21   :  { %724 = vst [vmem:[#allocation1 + $0x4] ss:$9 sm:$0xff] %v410_v35  ;;  %v448_v0 = vshll.u32 %v171_v48, 16  ;;  %v186_v58 = vsel %vm96_vm0, %v2414_v63, %v87_v10  ;;  %v192_v1 = vrot.slane %v190_v54, 2  ;;  %v451_v2 = vshrl.u32 %v174_v52, 16 }
  0x22   :  { %726 = vst [vmem:[#allocation1 + $0x5] ss:$9 sm:$0xff] %v418_v40  ;;  %v456_v3 = vshll.u32 %v177_v50, 16  ;;  %v195_v5 = vrot.slane %v193_v56, 3  ;;  %v459_v4 = vshrl.u32 %v177_v50, 16  ;;  %v464_v6 = vshll.u32 %v180_v53, 16 }
  0x23   :  { %728 = vst [vmem:[#allocation1 + $0x6] ss:$9 sm:$0xff] %v426_v44  ;;  %v88_v8 = vrot.slane %v53_v60, 3  ;;  %v442_v9 = vsel %vm2369_vm6, %v435_v57, %v440_v59  ;;  %v467_v11 = vshrl.u32 %v180_v53, 16  ;;  %v472_v12 = vshll.u32 %v183_v55, 16 }
  0x24   :  { %730 = vst [vmem:[#allocation1 + $0x7] ss:$9 sm:$0xff] %v434_v47  ;;  %v450_v13 = vsel %vm2369_vm6, %v443_v62, %v448_v0  ;;  %v475_v63 = vshrl.u32 %v186_v58, 16  ;;  %v480_v10 = vshll.u32 %v189_v61, 16  ;;  %v458_v15 = vsel %vm2369_vm6, %v451_v2, %v456_v3 }
  0x25   :  { %v483_v16 = vshrl.u32 %v189_v61, 16  ;;  %v488_v17 = vshll.u32 %v192_v1, 16  ;;  %v89_v19 = vrot.slane %v54_v7, 3  ;;  %v466_v20 = vsel %vm2369_vm6, %v459_v4, %v464_v6  ;;  %v57_v61 = vld [vmem:[%s3059_s0 + $0x30] sm:$0xf] }
  0x26   :  { %v491_v21 = vshrl.u32 %v192_v1, 16  ;;  %v496_v22 = vshll.u32 %v195_v5, 16  ;;  %v199_v23 = vsel %vm100_vm1, %v53_v60, %v88_v8  ;;  %v474_v24 = vsel %vm2369_vm6, %v467_v11, %v472_v12 }
  0x27   :  { %v202_v27 = vsel %vm104_vm2, %v53_v60, %v88_v8  ;;  %v482_v28 = vsel %vm2369_vm6, %v475_v63, %v480_v10  ;;  %v90_v29 = vrot.slane %v2475_v14, 3  ;;  %v205_v30 = vsel %vm108_vm3, %v53_v60, %v88_v8 }
  0x28   :  { %v490_v31 = vsel %vm2369_vm6, %v483_v16, %v488_v17  ;;  %v201_v32 = vrot.slane %v199_v23, 1  ;;  %v211_v25 = vsel %vm100_vm1, %v54_v7, %v89_v19  ;;  %v498_v26 = vsel %vm2369_vm6, %v491_v21, %v496_v22 }
  0x29   :  { %v198_v33 = vsel %vm96_vm0, %v53_v60, %v88_v8  ;;  %v204_v34 = vrot.slane %v202_v27, 2  ;;  %v214_v35 = vsel %vm104_vm2, %v54_v7, %v89_v19  ;;  %v207_v36 = vrot.slane %v205_v30, 3 }
  0x2a   :  { %v217_v38 = vsel %vm108_vm3, %v54_v7, %v89_v19  ;;  %v210_v39 = vsel %vm96_vm0, %v54_v7, %v89_v19  ;;  %v213_v40 = vrot.slane %v211_v25, 1  ;;  %v223_v41 = vsel %vm100_vm1, %v2475_v14, %v90_v29 }
  0x2b   :  { %v731_v18 = vld [vmem:[#allocation1] sm:$0xff]  ;;  %v216_v42 = vrot.slane %v214_v35, 2  ;;  %v226_v43 = vsel %vm104_vm2, %v2475_v14, %v90_v29  ;;  %v499_v44 = vshrl.u32 %v198_v33, 16  ;;  %v504_v45 = vshll.u32 %v201_v32, 16 }
  0x2c   :  { %733 = vst [vmem:[#allocation1] ss:$9 sm:$0xff] %v442_v9  ;;  %v219_v46 = vrot.slane %v217_v38, 3  ;;  %v507_v47 = vshrl.u32 %v201_v32, 16  ;;  %v512_v48 = vshll.u32 %v204_v34, 16  ;;  %v225_v50 = vrot.slane %v223_v41, 1 }
  0x2d   :  { %2219 = vmatmul.msk.bf16.gmra.mxu0 %vm806_vm7, %v731_v18  ;;  %735 = vst [vmem:[#allocation1 + $0x1] ss:$9 sm:$0xff] %v450_v13  ;;  %v515_v51 = vshrl.u32 %v204_v34, 16  ;;  %v520_v52 = vshll.u32 %v207_v36, 16  ;;  %v222_v53 = vsel %vm96_vm0, %v2475_v14, %v90_v29  ;;  %v228_v54 = vrot.slane %v226_v43, 2 }
  0x2e   :  { %737 = vst [vmem:[#allocation1 + $0x2] ss:$9 sm:$0xff] %v458_v15  ;;  %v523_v55 = vshrl.u32 %v210_v39, 16  ;;  %v528_v56 = vshll.u32 %v213_v40, 16  ;;  %v506_v57 = vsel %vm2369_vm6, %v499_v44, %v504_v45  ;;  %v531_v59 = vshrl.u32 %v213_v40, 16 }
  0x2f   :  { %739 = vst [vmem:[#allocation1 + $0x3] ss:$9 sm:$0xff] %v466_v20  ;;  %v536_v60 = vshll.u32 %v216_v42, 16  ;;  %v91_v62 = vrot.slane %v56_v49, 3  ;;  %v514_v0 = vsel %vm2369_vm6, %v507_v47, %v512_v48  ;;  %v539_v58 = vshrl.u32 %v216_v42, 16 }
  0x30   :  { %741 = vst [vmem:[#allocation1 + $0x4] ss:$9 sm:$0xff] %v474_v24  ;;  %v544_v1 = vshll.u32 %v219_v46, 16  ;;  %v522_v2 = vsel %vm2369_vm6, %v515_v51, %v520_v52  ;;  %v547_v3 = vshrl.u32 %v222_v53, 16  ;;  %v552_v5 = vshll.u32 %v225_v50, 16 }
  0x31   :  { %743 = vst [vmem:[#allocation1 + $0x5] ss:$9 sm:$0xff] %v482_v28  ;;  %v530_v6 = vsel %vm2369_vm6, %v523_v55, %v528_v56  ;;  %v555_v7 = vshrl.u32 %v225_v50, 16  ;;  %v560_v8 = vshll.u32 %v228_v54, 16  ;;  %v2522_v9 = vld [vmem:[%s3059_s0 + $0x34] sm:$0xf]  ;;  %v229_v12 = vsel %vm108_vm3, %v2475_v14, %v90_v29 }
  0x32   :  { %745 = vst [vmem:[#allocation1 + $0x6] ss:$9 sm:$0xff] %v490_v31  ;;  %v92_v11 = vrot.slane %v57_v61, 3  ;;  %v538_v13 = vsel %vm2369_vm6, %v531_v59, %v536_v60  ;;  %v235_v63 = vsel %vm100_vm1, %v56_v49, %v91_v62  ;;  %v546_v10 = vsel %vm2369_vm6, %v539_v58, %v544_v1  ;;  %v59_v39 = vld [vmem:[%s3059_s0 + $0x38] sm:$0xf] }
  0x33   :  { %747 = vst [vmem:[#allocation1 + $0x7] ss:$9 sm:$0xff] %v498_v26  ;;  %v238_v15 = vsel %vm104_vm2, %v56_v49, %v91_v62  ;;  %v554_v16 = vsel %vm2369_vm6, %v547_v3, %v552_v5  ;;  %v93_v14 = vrot.slane %v2522_v9, 3  ;;  %v231_v17 = vrot.slane %v229_v12, 3  ;;  %v60_v50 = vld [vmem:[%s3059_s0 + $0x3c] sm:$0xf] }
  0x34   :  { %v241_v18 = vsel %vm108_vm3, %v56_v49, %v91_v62  ;;  %v562_v19 = vsel %vm2369_vm6, %v555_v7, %v560_v8  ;;  %v237_v20 = vrot.slane %v235_v63, 1  ;;  %v247_v21 = vsel %vm100_vm1, %v57_v61, %v92_v11 }
  0x35   :  { %v234_v22 = vsel %vm96_vm0, %v56_v49, %v91_v62  ;;  %v240_v23 = vrot.slane %v238_v15, 2  ;;  %v250_v24 = vsel %vm104_vm2, %v57_v61, %v92_v11  ;;  %v243_v27 = vrot.slane %v241_v18, 3 }
  0x36   :  { %v253_v28 = vsel %vm108_vm3, %v57_v61, %v92_v11  ;;  %v249_v29 = vrot.slane %v247_v21, 1  ;;  %v259_v30 = vsel %vm100_vm1, %v2522_v9, %v93_v14  ;;  %v563_v31 = vshrl.u32 %v228_v54, 16 }
  0x37   :  { %v568_v32 = vshll.u32 %v231_v17, 16  ;;  %v246_v25 = vsel %vm96_vm0, %v57_v61, %v92_v11  ;;  %v252_v26 = vrot.slane %v250_v24, 2  ;;  %v571_v33 = vshrl.u32 %v234_v22, 16 }
  0x38   :  { %v576_v34 = vshll.u32 %v237_v20, 16  ;;  %v255_v35 = vrot.slane %v253_v28, 3  ;;  %v579_v36 = vshrl.u32 %v237_v20, 16  ;;  %v584_v38 = vshll.u32 %v240_v23, 16 }
  0x39   :  { %v261_v40 = vrot.slane %v259_v30, 1  ;;  %v587_v41 = vshrl.u32 %v240_v23, 16  ;;  %v592_v42 = vshll.u32 %v243_v27, 16  ;;  %v258_v43 = vsel %vm96_vm0, %v2522_v9, %v93_v14 }
  0x3a   :  { %v748_v4 = vld [vmem:[#allocation1] sm:$0xff]  ;;  %v570_v44 = vsel %vm2369_vm6, %v563_v31, %v568_v32  ;;  %v595_v45 = vshrl.u32 %v246_v25, 16  ;;  %v600_v46 = vshll.u32 %v249_v29, 16  ;;  %v578_v47 = vsel %vm2369_vm6, %v571_v33, %v576_v34 }
  0x3b   :  { %750 = vst [vmem:[#allocation1] ss:$9 sm:$0xff] %v506_v57  ;;  %v603_v48 = vshrl.u32 %v249_v29, 16  ;;  %v608_v49 = vshll.u32 %v252_v26, 16  ;;  %v94_v51 = vrot.slane %v59_v39, 3  ;;  %v586_v52 = vsel %vm2369_vm6, %v579_v36, %v584_v38 }
  0x3c   :  { %752 = vst [vmem:[#allocation1 + $0x1] ss:$9 sm:$0xff] %v514_v0  ;;  %v611_v53 = vshrl.u32 %v252_v26, 16  ;;  %v616_v54 = vshll.u32 %v255_v35, 16  ;;  %v594_v56 = vsel %vm2369_vm6, %v587_v41, %v592_v42  ;;  %v619_v57 = vshrl.u32 %v258_v43, 16 }
  0x3d   :  { %2220 = vmatmul.msk.bf16.gmra.mxu0 %vm806_vm7, %v748_v4  ;;  %754 = vst [vmem:[#allocation1 + $0x2] ss:$9 sm:$0xff] %v522_v2  ;;  %v624_v59 = vshll.u32 %v261_v40, 16  ;;  %v262_v60 = vsel %vm104_vm2, %v2522_v9, %v93_v14  ;;  %v602_v61 = vsel %vm2369_vm6, %v595_v45, %v600_v46  ;;  %v95_v62 = vrot.slane %v60_v50, 3  ;;  %v27_v41 = vld [vmem:[%s3059_s0] sm:$0x7] }
  0x3e   :  { %756 = vst [vmem:[#allocation1 + $0x3] ss:$9 sm:$0xff] %v530_v6  ;;  %v265_v0 = vsel %vm108_vm3, %v2522_v9, %v93_v14  ;;  %v610_v58 = vsel %vm2369_vm6, %v603_v48, %v608_v49  ;;  %v271_v1 = vsel %vm100_vm1, %v59_v39, %v94_v51  ;;  %v618_v2 = vsel %vm2369_vm6, %v611_v53, %v616_v54  ;;  %v28_v45 = vld [vmem:[%s3059_s0 + $0x4] sm:$0x7] }
  0x3f   :  { %758 = vst [vmem:[#allocation1 + $0x4] ss:$9 sm:$0xff] %v538_v13  ;;  %v264_v3 = vrot.slane %v262_v60, 2  ;;  %v274_v5 = vsel %vm104_vm2, %v59_v39, %v94_v51  ;;  %v626_v4 = vsel %vm2369_vm6, %v619_v57, %v624_v59  ;;  %v267_v6 = vrot.slane %v265_v0, 3 }
  0x40   :  { %760 = vst [vmem:[#allocation1 + $0x5] ss:$9 sm:$0xff] %v546_v10  ;;  %v277_v7 = vsel %vm108_vm3, %v59_v39, %v94_v51  ;;  %v273_v8 = vrot.slane %v271_v1, 1  ;;  %v283_v9 = vsel %vm100_vm1, %v60_v50, %v95_v62  ;;  %v270_v11 = vsel %vm96_vm0, %v59_v39, %v94_v51  ;;  %v31_v1 = vld [vmem:[%s3059_s0 + $0x10] sm:$0x7] }
  0x41   :  { %762 = vst [vmem:[#allocation1 + $0x6] ss:$9 sm:$0xff] %v554_v16  ;;  %v276_v12 = vrot.slane %v274_v5, 2  ;;  %v286_v13 = vsel %vm104_vm2, %v60_v50, %v95_v62  ;;  %v279_v63 = vrot.slane %v277_v7, 3  ;;  %v289_v10 = vsel %vm108_vm3, %v60_v50, %v95_v62 }
  0x42   :  { %764 = vst [vmem:[#allocation1 + $0x7] ss:$9 sm:$0xff] %v562_v19  ;;  %v627_v15 = vshrl.u32 %v261_v40, 16  ;;  %v632_v16 = vshll.u32 %v264_v3, 16  ;;  %v285_v14 = vrot.slane %v283_v9, 1  ;;  %v635_v17 = vshrl.u32 %v264_v3, 16 }
  0x43   :  { %v640_v18 = vshll.u32 %v267_v6, 16  ;;  %v282_v19 = vsel %vm96_vm0, %v60_v50, %v95_v62  ;;  %v288_v20 = vrot.slane %v286_v13, 2  ;;  %v643_v21 = vshrl.u32 %v270_v11, 16  ;;  %v30_v62 = vld [vmem:[%s3059_s0 + $0xc] sm:$0x7] }
  0x44   :  { %v648_v22 = vshll.u32 %v273_v8, 16  ;;  %v291_v23 = vrot.slane %v289_v10, 3  ;;  %v651_v24 = vshrl.u32 %v273_v8, 16  ;;  %v656_v27 = vshll.u32 %v276_v12, 16  ;;  %v32_v8 = vld [vmem:[%s3059_s0 + $0x14] sm:$0x7] }
  0x45   :  { %v634_v28 = vsel %vm2369_vm6, %v627_v15, %v632_v16  ;;  %v659_v29 = vshrl.u32 %v276_v12, 16  ;;  %v664_v30 = vshll.u32 %v279_v63, 16  ;;  %v642_v31 = vsel %vm2369_vm6, %v635_v17, %v640_v18  ;;  %v33_v18 = vld [vmem:[%s3059_s0 + $0x18] sm:$0x7] }
  0x46   :  { %v667_v32 = vshrl.u32 %v282_v19, 16  ;;  %v672_v25 = vshll.u32 %v285_v14, 16  ;;  %v650_v26 = vsel %vm2369_vm6, %v643_v21, %v648_v22  ;;  %v675_v33 = vshrl.u32 %v285_v14, 16 }
  0x47   :  { %v680_v34 = vshll.u32 %v288_v20, 16  ;;  %v658_v36 = vsel %vm2369_vm6, %v651_v24, %v656_v27  ;;  %v683_v38 = vshrl.u32 %v288_v20, 16  ;;  %v688_v39 = vshll.u32 %v291_v23, 16  ;;  %v34_v20 = vld [vmem:[%s3059_s0 + $0x1c] sm:$0x7] }
  0x48   :  { %v666_v40 = vsel %vm2369_vm6, %v659_v29, %v664_v30  ;;  %v674_v42 = vsel %vm2369_vm6, %v667_v32, %v672_v25  ;;  %v874_v46 = vrot.slane %v27_v41, 3  ;;  %v875_v48 = vrot.slane %v28_v45, 3 }
  0x49   :  { %v765_v55 = vld [vmem:[#allocation1] sm:$0xff]  ;;  %v682_v43 = vsel %vm2369_vm6, %v675_v33, %v680_v34  ;;  %v878_v5 = vrot.slane %v31_v1, 3  ;;  %v879_v15 = vrot.slane %v32_v8, 3  ;;  %v880_v21 = vrot.slane %v33_v18, 3 }
  0x4a   :  { %767 = vst [vmem:[#allocation1] ss:$9 sm:$0xff] %v570_v44  ;;  %v690_v44 = vsel %vm2369_vm6, %v683_v38, %v688_v39  ;;  %v893_v49 = vsel %vm100_vm1, %v27_v41, %v874_v46  ;;  %v896_v50 = vsel %vm104_vm2, %v27_v41, %v874_v46  ;;  %v892_v51 = vsel %vm96_vm0, %v27_v41, %v874_v46 }
  0x4b   :  { %769 = vst [vmem:[#allocation1 + $0x1] ss:$9 sm:$0xff] %v578_v47  ;;  %v29_v47 = vld [vmem:[%s3059_s0 + $0x8] sm:$0x7]  ;;  %v902_v53 = vsel %vm100_vm1, %v28_v45, %v875_v48  ;;  %v898_v54 = vrot.slane %v896_v50, 2  ;;  %v901_v57 = vsel %vm96_vm0, %v28_v45, %v875_v48  ;;  %v929_v12 = vsel %vm100_vm1, %v31_v1, %v878_v5 }
  0x4c   :  { %771 = vst [vmem:[#allocation1 + $0x2] ss:$9 sm:$0xff] %v586_v52  ;;  %v876_v37 = vrot.slane %v29_v47, 3  ;;  %v895_v52 = vrot.slane %v893_v49, 1  ;;  %v904_v59 = vrot.slane %v902_v53, 1  ;;  %v932_v63 = vsel %vm104_vm2, %v31_v1, %v878_v5 }
  0x4d   :  { %2221 = vmatmul.msk.bf16.gmra.mxu0 %vm806_vm7, %v765_v55  ;;  %773 = vst [vmem:[#allocation1 + $0x3] ss:$9 sm:$0xff] %v594_v56  ;;  %v905_v55 = vsel %vm104_vm2, %v28_v45, %v875_v48  ;;  %v928_v16 = vsel %vm96_vm0, %v31_v1, %v878_v5  ;;  %v931_v14 = vrot.slane %v929_v12, 1  ;;  %v934_v17 = vrot.slane %v932_v63, 2 }
  0x4e   :  { %775 = vst [vmem:[#allocation1 + $0x4] ss:$9 sm:$0xff] %v602_v61  ;;  %v911_v60 = vsel %vm100_vm1, %v29_v47, %v876_v37  ;;  %v907_v61 = vrot.slane %v905_v55, 2  ;;  %v910_v0 = vsel %vm96_vm0, %v29_v47, %v876_v37  ;;  %v914_v3 = vsel %vm104_vm2, %v29_v47, %v876_v37 }
  0x4f   :  { %777 = vst [vmem:[#allocation1 + $0x5] ss:$9 sm:$0xff] %v610_v58  ;;  %v913_v58 = vrot.slane %v911_v60, 1  ;;  %v916_v6 = vrot.slane %v914_v3, 2  ;;  %v937_v19 = vsel %vm96_vm0, %v32_v8, %v879_v15  ;;  %v938_v22 = vsel %vm100_vm1, %v32_v8, %v879_v15  ;;  %v39_v60 = vld [vmem:[%s3059_s0 + $0x30] sm:$0x7] }
  0x50   :  { %779 = vst [vmem:[#allocation1 + $0x6] ss:$9 sm:$0xff] %v618_v2  ;;  %v877_v2 = vrot.slane %v30_v62, 3  ;;  %v941_v23 = vsel %vm104_vm2, %v32_v8, %v879_v15  ;;  %v881_v24 = vrot.slane %v34_v20, 3  ;;  %v940_v27 = vrot.slane %v938_v22, 1 }
  0x51   :  { %781 = vst [vmem:[#allocation1 + $0x7] ss:$9 sm:$0xff] %v626_v4  ;;  %v943_v29 = vrot.slane %v941_v23, 2  ;;  %v950_v30 = vsel %vm104_vm2, %v33_v18, %v880_v21  ;;  %v40_v3 = vld [vmem:[%s3059_s0 + $0x34] sm:$0x7]  ;;  %vm2032_vm8 = vcmask 1044484  }
  0x52   :  { %v920_v4 = vsel %vm100_vm1, %v30_v62, %v877_v2  ;;  %v923_v7 = vsel %vm104_vm2, %v30_v62, %v877_v2  ;;  %v919_v9 = vsel %vm96_vm0, %v30_v62, %v877_v2  ;;  %v956_v25 = vsel %vm100_vm1, %v34_v20, %v881_v24 }
  0x53   :  { %v922_v11 = vrot.slane %v920_v4, 1  ;;  %v925_v13 = vrot.slane %v923_v7, 2  ;;  %v952_v33 = vrot.slane %v950_v30, 2  ;;  %v959_v34 = vsel %vm104_vm2, %v34_v20, %v881_v24 }
  0x54   :  { %v958_v38 = vrot.slane %v956_v25, 1  ;;  %v961_v39 = vrot.slane %v959_v34, 2  ;;  %v1268_v34 = vld [vmem:[%s3059_s0] sm:$0xe]  ;;  %vm2034_vm9 = vcmask 1045509   ;;  %vm2036_vm10 = vcmask 1046534  }
  0x58   :  { %v782_v35 = vld [vmem:[#allocation1] sm:$0xff] }
  0x59   :  { %784 = vst [vmem:[#allocation1] ss:$9 sm:$0xff] %v634_v28  ;;  %v947_v28 = vsel %vm100_vm1, %v33_v18, %v880_v21 }
  0x5a   :  { %786 = vst [vmem:[#allocation1 + $0x1] ss:$9 sm:$0xff] %v642_v31  ;;  %v946_v31 = vsel %vm96_vm0, %v33_v18, %v880_v21  ;;  %v949_v32 = vrot.slane %v947_v28, 1 }
  0x5b   :  { %788 = vst [vmem:[#allocation1 + $0x2] ss:$9 sm:$0xff] %v650_v26 }
  0x5c   :  { %790 = vst [vmem:[#allocation1 + $0x3] ss:$9 sm:$0xff] %v658_v36  ;;  %v955_v36 = vsel %vm96_vm0, %v34_v20, %v881_v24 }
  0x5d   :  { %2222 = vmatmul.msk.bf16.gmra.mxu0 %vm806_vm7, %v782_v35  ;;  %792 = vst [vmem:[#allocation1 + $0x4] ss:$9 sm:$0xff] %v666_v40  ;;  %v35_v35 = vld [vmem:[%s3059_s0 + $0x20] sm:$0x7]  ;;  %v36_v40 = vld [vmem:[%s3059_s0 + $0x24] sm:$0x7] }
  0x5e   :  { %794 = vst [vmem:[#allocation1 + $0x5] ss:$9 sm:$0xff] %v674_v42  ;;  %v882_v41 = vrot.slane %v35_v35, 3  ;;  %v37_v42 = vld [vmem:[%s3059_s0 + $0x28] sm:$0x7] }
  0x5f   :  { %796 = vst [vmem:[#allocation1 + $0x6] ss:$9 sm:$0xff] %v682_v43  ;;  %v883_v43 = vrot.slane %v36_v40, 3  ;;  %v884_v46 = vrot.slane %v37_v42, 3 }
  0x60   :  { %798 = vst [vmem:[#allocation1 + $0x7] ss:$9 sm:$0xff] %v690_v44  ;;  %v965_v44 = vsel %vm100_vm1, %v35_v35, %v882_v41  ;;  %v968_v45 = vsel %vm104_vm2, %v35_v35, %v882_v41  ;;  %v964_v47 = vsel %vm96_vm0, %v35_v35, %v882_v41  ;;  %v1270_v41 = vld [vmem:[%s3059_s0 + $0x8] sm:$0xe] }
  0x61   :  { %v967_v48 = vrot.slane %v965_v44, 1  ;;  %v974_v49 = vsel %vm100_vm1, %v36_v40, %v883_v43  ;;  %v970_v50 = vrot.slane %v968_v45, 2  ;;  %v977_v37 = vsel %vm104_vm2, %v36_v40, %v883_v43 }
  0x62   :  { %v976_v53 = vrot.slane %v974_v49, 1  ;;  %v979_v55 = vrot.slane %v977_v37, 2  ;;  %v986_v62 = vsel %vm104_vm2, %v37_v42, %v884_v46  ;;  %v1272_v49 = vld [vmem:[%s3059_s0 + $0x10] sm:$0xe] }
  0x63   :  { %v988_v1 = vrot.slane %v986_v62, 2 }
  0x67   :  { %v799_v56 = vld [vmem:[#allocation1] sm:$0xff] }
  0x68   :  { %1034 = vst [vmem:[#allocation1] ss:$9 sm:$0xff] %v892_v51 }
  0x69   :  { %1037 = vst [vmem:[#allocation1 + $0x1] ss:$9 sm:$0xff] %v895_v52  ;;  %v973_v52 = vsel %vm96_vm0, %v36_v40, %v883_v43 }
  0x6a   :  { %1040 = vst [vmem:[#allocation1 + $0x2] ss:$9 sm:$0xff] %v898_v54  ;;  %v983_v54 = vsel %vm100_vm1, %v37_v42, %v884_v46 }
  0x6b   :  { %1042 = vst [vmem:[#allocation1 + $0x3] ss:$9 sm:$0xff] %v901_v57  ;;  %v982_v57 = vsel %vm96_vm0, %v37_v42, %v884_v46  ;;  %v1273_v42 = vld [vmem:[%s3059_s0 + $0x14] sm:$0xe] }
  0x6c   :  { %1045 = vst [vmem:[#allocation1 + $0x4] ss:$9 sm:$0xff] %v904_v59  ;;  %v985_v59 = vrot.slane %v983_v54, 1 }
  0x6d   :  { %2223 = vmatmul.msk.bf16.gmra.mxu0 %vm806_vm7, %v799_v56  ;;  %1048 = vst [vmem:[#allocation1 + $0x5] ss:$9 sm:$0xff] %v907_v61  ;;  %v38_v56 = vld [vmem:[%s3059_s0 + $0x2c] sm:$0x7] }
  0x6e   :  { %1050 = vst [vmem:[#allocation1 + $0x6] ss:$9 sm:$0xff] %v910_v0  ;;  %v885_v61 = vrot.slane %v38_v56, 3  ;;  %v886_v0 = vrot.slane %v39_v60, 3 }
  0x6f   :  { %1053 = vst [vmem:[#allocation1 + $0x7] ss:$9 sm:$0xff] %v913_v58 }
  0x70   :  { %v992_v58 = vsel %vm100_vm1, %v38_v56, %v885_v61  ;;  %v995_v2 = vsel %vm104_vm2, %v38_v56, %v885_v61  ;;  %v991_v5 = vsel %vm96_vm0, %v38_v56, %v885_v61  ;;  %v1004_v8 = vsel %vm104_vm2, %v39_v60, %v886_v0  ;;  %v1274_v56 = vld [vmem:[%s3059_s0 + $0x18] sm:$0xe] }
  0x71   :  { %v994_v4 = vrot.slane %v992_v58, 1  ;;  %v997_v7 = vrot.slane %v995_v2, 2  ;;  %v1000_v12 = vsel %vm96_vm0, %v39_v60, %v886_v0  ;;  %v1006_v63 = vrot.slane %v1004_v8, 2  ;;  %v1279_v2 = vld [vmem:[%s3059_s0 + $0x2c] sm:$0xe] }
  0x76   :  { %v1054_v10 = vld [vmem:[#allocation1] sm:$0xff] }
  0x77   :  { %1056 = vst [vmem:[#allocation1] ss:$9 sm:$0xff] %v916_v6  ;;  %2228 = vmatmul.msk.bf16.vlgmr.msra.gmra.mxu1 %vm806_vm7, %v1054_v10  ;;  %v1001_v6 = vsel %vm100_vm1, %v39_v60, %v886_v0  ;;  %v41_v10 = vld [vmem:[%s3059_s0 + $0x38] sm:$0x7] }
  0x78   :  { %1057 = vst [vmem:[#allocation1 + $0x1] ss:$9 sm:$0xff] %v919_v9 }
  0x79   :  { %1059 = vst [vmem:[#allocation1 + $0x2] ss:$9 sm:$0xff] %v922_v11  ;;  %v887_v11 = vrot.slane %v40_v3, 3 }
  0x7a   :  { %1061 = vst [vmem:[#allocation1 + $0x3] ss:$9 sm:$0xff] %v925_v13  ;;  %v1003_v13 = vrot.slane %v1001_v6, 1 }
  0x7b   :  { %1062 = vst [vmem:[#allocation1 + $0x4] ss:$9 sm:$0xff] %v928_v16  ;;  %v1009_v15 = vsel %vm96_vm0, %v40_v3, %v887_v11  ;;  %v42_v16 = vld [vmem:[%s3059_s0 + $0x3c] sm:$0x7]  ;;  %v1013_v18 = vsel %vm104_vm2, %v40_v3, %v887_v11 }
  0x7c   :  { %1064 = vst [vmem:[#allocation1 + $0x5] ss:$9 sm:$0xff] %v931_v14  ;;  %v888_v14 = vrot.slane %v41_v10, 3  ;;  %v1015_v22 = vrot.slane %v1013_v18, 2  ;;  %v1283_v18 = vld [vmem:[%s3059_s0 + $0x3c] sm:$0xe] }
  0x7d   :  { %1066 = vst [vmem:[#allocation1 + $0x6] ss:$9 sm:$0xff] %v934_v17  ;;  %v1010_v17 = vsel %vm100_vm1, %v40_v3, %v887_v11  ;;  %v1281_v11 = vld [vmem:[%s3059_s0 + $0x34] sm:$0xe] }
  0x7e   :  { %1067 = vst [vmem:[#allocation1 + $0x7] ss:$9 sm:$0xff] %v937_v19  ;;  %v889_v19 = vrot.slane %v42_v16, 3  ;;  %v1012_v20 = vrot.slane %v1010_v17, 1  ;;  %v1019_v21 = vsel %vm100_vm1, %v41_v10, %v888_v14  ;;  %v1022_v23 = vsel %vm104_vm2, %v41_v10, %v888_v14  ;;  %v1280_v17 = vld [vmem:[%s3059_s0 + $0x30] sm:$0xe] }
  0x7f   :  { %v1018_v24 = vsel %vm96_vm0, %v41_v10, %v888_v14  ;;  %v1024_v30 = vrot.slane %v1022_v23, 2  ;;  %v2280_v10 = vld [vmem:[%s3058_s2 + $0x10] sm:$0xff] }
  0x80   :  { %v1028_v28 = vsel %vm100_vm1, %v42_v16, %v889_v19  ;;  %1459 = vmatpush.bf16.msra.mxu2 %v2280_v10 }
  0x81   :  { %v1030_v25 = vrot.slane %v1028_v28, 1 }
  0x85   :  { %v1068_v26 = vld [vmem:[#allocation1] sm:$0xff] }
  0x86   :  { %1070 = vst [vmem:[#allocation1] ss:$9 sm:$0xff] %v940_v27  ;;  %v1021_v27 = vrot.slane %v1019_v21, 1 }
  0x87   :  { %1072 = vst [vmem:[#allocation1 + $0x1] ss:$9 sm:$0xff] %v943_v29  ;;  %2229 = vmatmul.msk.bf16.gmra.mxu1 %vm806_vm7, %v1068_v26 }
  0x88   :  { %1073 = vst [vmem:[#allocation1 + $0x2] ss:$9 sm:$0xff] %v946_v31  ;;  %v1031_v31 = vsel %vm104_vm2, %v42_v16, %v889_v19 }
  0x89   :  { %1075 = vst [vmem:[#allocation1 + $0x3] ss:$9 sm:$0xff] %v949_v32  ;;  %v1027_v32 = vsel %vm96_vm0, %v42_v16, %v889_v19  ;;  %v1033_v26 = vrot.slane %v1031_v31, 2  ;;  %vm1860_vm0 = vcmask 128000  }
  0x8a   :  { %1077 = vst [vmem:[#allocation1 + $0x4] ss:$9 sm:$0xff] %v952_v33  ;;  %v1269_v33 = vld [vmem:[%s3059_s0 + $0x4] sm:$0xe] }
  0x8b   :  { %1078 = vst [vmem:[#allocation1 + $0x5] ss:$9 sm:$0xff] %v955_v36  ;;  %v1271_v36 = vld [vmem:[%s3059_s0 + $0xc] sm:$0xe] }
  0x8c   :  { %1080 = vst [vmem:[#allocation1 + $0x6] ss:$9 sm:$0xff] %v958_v38 }
  0x8d   :  { %1082 = vst [vmem:[#allocation1 + $0x7] ss:$9 sm:$0xff] %v961_v39 }
  0x94   :  { %v1083_v51 = vld [vmem:[#allocation1] sm:$0xff] }
  0x95   :  { %1084 = vst [vmem:[#allocation1] ss:$9 sm:$0xff] %v964_v47 }
  0x96   :  { %1086 = vst [vmem:[#allocation1 + $0x1] ss:$9 sm:$0xff] %v967_v48 }
  0x97   :  { %1088 = vst [vmem:[#allocation1 + $0x2] ss:$9 sm:$0xff] %v970_v50  ;;  %2230 = vmatmul.msk.bf16.gmra.mxu1 %vm806_vm7, %v1083_v51  ;;  %v1275_v50 = vld [vmem:[%s3059_s0 + $0x1c] sm:$0xe] }
  0x98   :  { %1089 = vst [vmem:[#allocation1 + $0x3] ss:$9 sm:$0xff] %v973_v52 }
  0x99   :  { %1091 = vst [vmem:[#allocation1 + $0x4] ss:$9 sm:$0xff] %v976_v53 }
  0x9a   :  { %1093 = vst [vmem:[#allocation1 + $0x5] ss:$9 sm:$0xff] %v979_v55 }
  0x9b   :  { %1094 = vst [vmem:[#allocation1 + $0x6] ss:$9 sm:$0xff] %v982_v57  ;;  %v1277_v57 = vld [vmem:[%s3059_s0 + $0x24] sm:$0xe] }
  0x9c   :  { %1096 = vst [vmem:[#allocation1 + $0x7] ss:$9 sm:$0xff] %v985_v59 }
  0xa3   :  { %v1097_v9 = vld [vmem:[#allocation1] sm:$0xff] }
  0xa4   :  { %1099 = vst [vmem:[#allocation1] ss:$9 sm:$0xff] %v988_v1  ;;  %v1276_v1 = vld [vmem:[%s3059_s0 + $0x20] sm:$0xe] }
  0xa5   :  { %1100 = vst [vmem:[#allocation1 + $0x1] ss:$9 sm:$0xff] %v991_v5 }
  0xa6   :  { %1102 = vst [vmem:[#allocation1 + $0x2] ss:$9 sm:$0xff] %v994_v4 }
  0xa7   :  { %1104 = vst [vmem:[#allocation1 + $0x3] ss:$9 sm:$0xff] %v997_v7  ;;  %2231 = vmatmul.msk.bf16.gmra.mxu1 %vm806_vm7, %v1097_v9  ;;  %v1278_v9 = vld [vmem:[%s3059_s0 + $0x28] sm:$0xe] }
  0xa8   :  { %1105 = vst [vmem:[#allocation1 + $0x4] ss:$9 sm:$0xff] %v1000_v12 }
  0xa9   :  { %1107 = vst [vmem:[#allocation1 + $0x5] ss:$9 sm:$0xff] %v1003_v13 }
  0xaa   :  { %1109 = vst [vmem:[#allocation1 + $0x6] ss:$9 sm:$0xff] %v1006_v63 }
  0xab   :  { %1110 = vst [vmem:[#allocation1 + $0x7] ss:$9 sm:$0xff] %v1009_v15 }
  0xb2   :  { %v1111_v29 = vld [vmem:[#allocation1] sm:$0xff] }
  0xb3   :  { %1113 = vst [vmem:[#allocation1] ss:$9 sm:$0xff] %v1012_v20 }
  0xb4   :  { %1115 = vst [vmem:[#allocation1 + $0x1] ss:$9 sm:$0xff] %v1015_v22 }
  0xb5   :  { %1116 = vst [vmem:[#allocation1 + $0x2] ss:$9 sm:$0xff] %v1018_v24 }
  0xb6   :  { %1118 = vst [vmem:[#allocation1 + $0x3] ss:$9 sm:$0xff] %v1021_v27  ;;  %v1282_v27 = vld [vmem:[%s3059_s0 + $0x38] sm:$0xe] }
  0xb7   :  { %1120 = vst [vmem:[#allocation1 + $0x4] ss:$9 sm:$0xff] %v1024_v30  ;;  %2232 = vmatmul.msk.bf16.gmra.mxu1 %vm806_vm7, %v1111_v29 }
  0xb8   :  { %1121 = vst [vmem:[#allocation1 + $0x5] ss:$9 sm:$0xff] %v1027_v32 }
  0xb9   :  { %1123 = vst [vmem:[#allocation1 + $0x6] ss:$9 sm:$0xff] %v1030_v25 }
  0xba   :  { %1125 = vst [vmem:[#allocation1 + $0x7] ss:$9 sm:$0xff] %v1033_v26 }
  0xbb   :  { %1296 = vst [vmem:[#allocation1 + $0x20] sm:$0xff] %v1269_v33 }
  0xc1   :  { %v1126_v35 = vld [vmem:[#allocation1] sm:$0xff] }
  0xc2   :  { %1288 = vst [vmem:[#allocation1] sm:$0xff] %v1268_v34  ;;  %v2711_v38 = vld [vmem:[#allocation1 + $0x21] ss:$4 sm:$0xff]  ;;  %v2713_v39 = vld [vmem:[#allocation1 + $0x22] ss:$4 sm:$0xff] }
  0xc3   :  { %v2715_v40 = vld [vmem:[#allocation1 + $0x23] ss:$4 sm:$0xff] }
  0xc4   :  { %1309 = vst [vmem:[#allocation1 + $0x20] sm:$0xff] %v1271_v36 }
  0xc7   :  { %2233 = vmatmul.msk.bf16.gmra.mxu1 %vm806_vm7, %v1126_v35 }
  0xc9   :  { %v2724_v43 = vld [vmem:[#allocation1 + $0x1] ss:$4 sm:$0xff]  ;;  %v2726_v44 = vld [vmem:[#allocation1 + $0x2] ss:$4 sm:$0xff]  ;;  %v2728_v45 = vld [vmem:[#allocation1 + $0x3] ss:$4 sm:$0xff] }
  0xca   :  { %1304 = vst [vmem:[#allocation1] sm:$0xff] %v1270_v41 }
  0xcb   :  { %v2730_v46 = vld [vmem:[#allocation1 + $0x21] ss:$4 sm:$0xff]  ;;  %v2732_v47 = vld [vmem:[#allocation1 + $0x22] ss:$4 sm:$0xff]  ;;  %v2734_v48 = vld [vmem:[#allocation1 + $0x23] ss:$4 sm:$0xff] }
  0xcc   :  { %1319 = vst [vmem:[#allocation1 + $0x20] sm:$0xff] %v1273_v42  ;;  %v828_v42 = vpop.f32.mrf.mxu0 }
  0xd1   :  { %v2742_v37 = vld [vmem:[#allocation1 + $0x1] ss:$4 sm:$0xff]  ;;  %v2744_v51 = vld [vmem:[#allocation1 + $0x2] ss:$4 sm:$0xff]  ;;  %v2746_v52 = vld [vmem:[#allocation1 + $0x3] ss:$4 sm:$0xff] }
  0xd2   :  { %1314 = vst [vmem:[#allocation1] sm:$0xff] %v1272_v49  ;;  %v2853_v49 = vld [vmem:[%s3060_s3] ss:$0 sm:$0xff] }
  0xd3   :  { %v2748_v53 = vld [vmem:[#allocation1 + $0x21] ss:$4 sm:$0xff]  ;;  %v2750_v54 = vld [vmem:[#allocation1 + $0x22] ss:$4 sm:$0xff]  ;;  %v2752_v55 = vld [vmem:[#allocation1 + $0x23] ss:$4 sm:$0xff] }
  0xd4   :  { %1329 = vst [vmem:[#allocation1 + $0x20] sm:$0xff] %v1275_v50 }
  0xd9   :  { %v2760_v59 = vld [vmem:[#allocation1 + $0x1] ss:$4 sm:$0xff]  ;;  %v2762_v60 = vld [vmem:[#allocation1 + $0x2] ss:$4 sm:$0xff]  ;;  %v2764_v61 = vld [vmem:[#allocation1 + $0x3] ss:$4 sm:$0xff] }
  0xda   :  { %1324 = vst [vmem:[#allocation1] sm:$0xff] %v1274_v56  ;;  %v2863_v56 = vrot.slane %v2853_v49, 4 }
  0xdb   :  { %v2766_v62 = vld [vmem:[#allocation1 + $0x21] ss:$4 sm:$0xff]  ;;  %v2768_v0 = vld [vmem:[#allocation1 + $0x22] ss:$4 sm:$0xff]  ;;  %v2770_v58 = vld [vmem:[#allocation1 + $0x23] ss:$4 sm:$0xff] }
  0xdc   :  { %1339 = vst [vmem:[#allocation1 + $0x20] sm:$0xff] %v1277_v57 }
  0xe1   :  { %v2778_v3 = vld [vmem:[#allocation1 + $0x1] ss:$4 sm:$0xff]  ;;  %v2780_v5 = vld [vmem:[#allocation1 + $0x2] ss:$4 sm:$0xff]  ;;  %v2782_v4 = vld [vmem:[#allocation1 + $0x3] ss:$4 sm:$0xff] }
  0xe2   :  { %1334 = vst [vmem:[#allocation1] sm:$0xff] %v1276_v1 }
  0xe3   :  { %v2784_v6 = vld [vmem:[#allocation1 + $0x21] ss:$4 sm:$0xff]  ;;  %v2786_v7 = vld [vmem:[#allocation1 + $0x22] ss:$4 sm:$0xff]  ;;  %v2788_v8 = vld [vmem:[#allocation1 + $0x23] ss:$4 sm:$0xff] }
  0xe4   :  { %1349 = vst [vmem:[#allocation1 + $0x20] sm:$0xff] %v1279_v2 }
  0xe9   :  { %v1335_v12 = vld [vmem:[#allocation1 + $0x1] ss:$4 sm:$0xff]  ;;  %v1336_v13 = vld [vmem:[#allocation1 + $0x2] ss:$4 sm:$0xff]  ;;  %v1337_v63 = vld [vmem:[#allocation1 + $0x3] ss:$4 sm:$0xff] }
  0xea   :  { %1344 = vst [vmem:[#allocation1] sm:$0xff] %v1278_v9 }
  0xeb   :  { %v2799_v15 = vld [vmem:[#allocation1 + $0x21] ss:$4 sm:$0xff]  ;;  %v2801_v16 = vld [vmem:[#allocation1 + $0x22] ss:$4 sm:$0xff]  ;;  %v2803_v14 = vld [vmem:[#allocation1 + $0x23] ss:$4 sm:$0xff] }
  0xec   :  { %1359 = vst [vmem:[#allocation1 + $0x20] sm:$0xff] %v1281_v11 }
  0xf1   :  { %v1345_v19 = vld [vmem:[#allocation1 + $0x1] ss:$4 sm:$0xff]  ;;  %v1346_v20 = vld [vmem:[#allocation1 + $0x2] ss:$4 sm:$0xff]  ;;  %v1347_v21 = vld [vmem:[#allocation1 + $0x3] ss:$4 sm:$0xff] }
  0xf2   :  { %1354 = vst [vmem:[#allocation1] sm:$0xff] %v1280_v17 }
  0xf3   :  { %v1360_v22 = vld [vmem:[#allocation1 + $0x21] ss:$4 sm:$0xff]  ;;  %v1361_v23 = vld [vmem:[#allocation1 + $0x22] ss:$4 sm:$0xff]  ;;  %v1362_v24 = vld [vmem:[#allocation1 + $0x23] ss:$4 sm:$0xff] }
  0xf4   :  { %1369 = vst [vmem:[#allocation1 + $0x20] sm:$0xff] %v1283_v18 }
  0xf9   :  { %v1355_v28 = vld [vmem:[#allocation1 + $0x1] ss:$4 sm:$0xff]  ;;  %v1356_v29 = vld [vmem:[#allocation1 + $0x2] ss:$4 sm:$0xff]  ;;  %v1357_v30 = vld [vmem:[#allocation1 + $0x3] ss:$4 sm:$0xff] }
  0xfa   :  { %1364 = vst [vmem:[#allocation1] sm:$0xff] %v1282_v27 }
  0xfb   :  { %v1370_v31 = vld [vmem:[#allocation1 + $0x21] ss:$4 sm:$0xff]  ;;  %v1371_v32 = vld [vmem:[#allocation1 + $0x22] ss:$4 sm:$0xff]  ;;  %v1372_v25 = vld [vmem:[#allocation1 + $0x23] ss:$4 sm:$0xff] }
 0x101   :  { %v1365_v26 = vld [vmem:[#allocation1 + $0x1] ss:$4 sm:$0xff]  ;;  %v1366_v33 = vld [vmem:[#allocation1 + $0x2] ss:$4 sm:$0xff]  ;;  %v1367_v34 = vld [vmem:[#allocation1 + $0x3] ss:$4 sm:$0xff] }
 0x102   :  { %1373 = vst [vmem:[#allocation1] ss:$9 sm:$0xff] %v2724_v43  ;;  %v1154_v43 = vpop.f32.mrf.mxu1 }
 0x103   :  { %1375 = vst [vmem:[#allocation1 + $0x1] ss:$9 sm:$0xff] %v2726_v44  ;;  %v830_v44 = vpop.f32.mrf.mxu0 }
 0x104   :  { %1377 = vst [vmem:[#allocation1 + $0x2] ss:$9 sm:$0xff] %v2728_v45 }
 0x105   :  { %1379 = vst [vmem:[#allocation1 + $0x3] ss:$9 sm:$0xff] %v2711_v38 }
 0x106   :  { %1381 = vst [vmem:[#allocation1 + $0x4] ss:$9 sm:$0xff] %v2713_v39 }
 0x107   :  { %1383 = vst [vmem:[#allocation1 + $0x5] ss:$9 sm:$0xff] %v2715_v40 }
 0x108   :  { %1385 = vst [vmem:[#allocation1 + $0x6] ss:$9 sm:$0xff] %v2742_v37 }
 0x109   :  { %1387 = vst [vmem:[#allocation1 + $0x7] ss:$9 sm:$0xff] %v2744_v51 }
 0x10a   :  { %v1156_v45 = vpop.f32.mrf.mxu1 }
 0x10b   :  { %v1157_v2 = vadd.f32 %v1156_v45, %v830_v44 }
 0x10d   :  { %v1201_v10 = vrot.slane %v1157_v2, 6 }
 0x110   :  { %v1388_v35 = vld [vmem:[#allocation1] sm:$0xff] }
 0x111   :  { %2240 = vmatmul.msk.bf16.vlgmr.msra.gmra.mxu2 %vm806_vm7, %v1388_v35  ;;  %1389 = vst [vmem:[#allocation1] ss:$9 sm:$0xff] %v2746_v52 }
 0x112   :  { %1390 = vst [vmem:[#allocation1 + $0x1] ss:$9 sm:$0xff] %v2730_v46  ;;  %v833_v46 = vpop.f32.mrf.mxu0 }
 0x113   :  { %1391 = vst [vmem:[#allocation1 + $0x2] ss:$9 sm:$0xff] %v2732_v47  ;;  %v1159_v47 = vpop.f32.mrf.mxu1 }
 0x114   :  { %1392 = vst [vmem:[#allocation1 + $0x3] ss:$9 sm:$0xff] %v2734_v48  ;;  %v1155_v48 = vadd.f32 %v1154_v43, %v828_v42 }
 0x115   :  { %1393 = vst [vmem:[#allocation1 + $0x4] ss:$9 sm:$0xff] %v2760_v59 }
 0x116   :  { %1394 = vst [vmem:[#allocation1 + $0x5] ss:$9 sm:$0xff] %v2762_v60  ;;  %v1196_v51 = vrot.slane %v1155_v48, 2  ;;  %v1197_v52 = vrot.slane %v1155_v48, 4 }
 0x117   :  { %1395 = vst [vmem:[#allocation1 + $0x6] ss:$9 sm:$0xff] %v2764_v61 }
 0x118   :  { %1396 = vst [vmem:[#allocation1 + $0x7] ss:$9 sm:$0xff] %v2748_v53  ;;  %v1198_v53 = vrot.slane %v1155_v48, 6 }
 0x11a   :  { %v2855_v50 = vpop.f32.mrf.mxu0 }
 0x11b   :  { %v2857_v37 = vpop.f32.mrf.mxu1 }
 0x11c   :  { %v1162_v43 = vadd.f32 %v2857_v37, %v2855_v50 }
 0x11f   :  { %v1397_v36 = vld [vmem:[#allocation1] sm:$0xff] }
 0x120   :  { %1398 = vst [vmem:[#allocation1] ss:$9 sm:$0xff] %v2750_v54 }
 0x121   :  { %2241 = vmatmul.msk.bf16.gmra.mxu2 %vm806_vm7, %v1397_v36  ;;  %1399 = vst [vmem:[#allocation1 + $0x1] ss:$9 sm:$0xff] %v2752_v55  ;;  %v2860_v55 = vrot.slane %v2853_v49, 2 }
 0x122   :  { %1400 = vst [vmem:[#allocation1 + $0x2] ss:$9 sm:$0xff] %v2778_v3  ;;  %v2869_v11 = vpop.f32.mrf.mxu0 }
 0x123   :  { %1401 = vst [vmem:[#allocation1 + $0x3] ss:$9 sm:$0xff] %v2780_v5 }
 0x124   :  { %1402 = vst [vmem:[#allocation1 + $0x4] ss:$9 sm:$0xff] %v2782_v4 }
 0x125   :  { %1403 = vst [vmem:[#allocation1 + $0x5] ss:$9 sm:$0xff] %v2766_v62 }
 0x126   :  { %1404 = vst [vmem:[#allocation1 + $0x6] ss:$9 sm:$0xff] %v2768_v0 }
 0x127   :  { %1405 = vst [vmem:[#allocation1 + $0x7] ss:$9 sm:$0xff] %v2770_v58 }
 0x12e   :  { %v1406_v38 = vld [vmem:[#allocation1] sm:$0xff] }
 0x12f   :  { %1407 = vst [vmem:[#allocation1] ss:$9 sm:$0xff] %v1335_v12  ;;  %v2871_v12 = vpop.f32.mrf.mxu1 }
 0x130   :  { %1408 = vst [vmem:[#allocation1 + $0x1] ss:$9 sm:$0xff] %v1336_v13  ;;  %v1199_v13 = vrot.slane %v1157_v2, 2 }
 0x131   :  { %2242 = vmatmul.msk.bf16.gmra.mxu2 %vm806_vm7, %v1406_v38  ;;  %1409 = vst [vmem:[#allocation1 + $0x2] ss:$9 sm:$0xff] %v1337_v63  ;;  %v1200_v63 = vrot.slane %v1157_v2, 4 }
 0x132   :  { %1410 = vst [vmem:[#allocation1 + $0x3] ss:$9 sm:$0xff] %v2784_v6 }
 0x133   :  { %1411 = vst [vmem:[#allocation1 + $0x4] ss:$9 sm:$0xff] %v2786_v7 }
 0x134   :  { %1412 = vst [vmem:[#allocation1 + $0x5] ss:$9 sm:$0xff] %v2788_v8 }
 0x135   :  { %1413 = vst [vmem:[#allocation1 + $0x6] ss:$9 sm:$0xff] %v1345_v19  ;;  %v1160_v19 = vadd.f32 %v1159_v47, %v833_v46 }
 0x136   :  { %1414 = vst [vmem:[#allocation1 + $0x7] ss:$9 sm:$0xff] %v1346_v20 }
 0x13d   :  { %v1415_v39 = vld [vmem:[#allocation1] sm:$0xff] }
 0x13e   :  { %1416 = vst [vmem:[#allocation1] ss:$9 sm:$0xff] %v1347_v21 }
 0x13f   :  { %1417 = vst [vmem:[#allocation1 + $0x1] ss:$9 sm:$0xff] %v2799_v15 }
 0x140   :  { %1418 = vst [vmem:[#allocation1 + $0x2] ss:$9 sm:$0xff] %v2801_v16 }
 0x141   :  { %2243 = vmatmul.msk.bf16.gmra.mxu2 %vm806_vm7, %v1415_v39  ;;  %1419 = vst [vmem:[#allocation1 + $0x3] ss:$9 sm:$0xff] %v2803_v14  ;;  %v2879_v39 = vpop.f32.mrf.mxu0 }
 0x142   :  { %1420 = vst [vmem:[#allocation1 + $0x4] ss:$9 sm:$0xff] %v1355_v28 }
 0x143   :  { %1421 = vst [vmem:[#allocation1 + $0x5] ss:$9 sm:$0xff] %v1356_v29 }
 0x144   :  { %1422 = vst [vmem:[#allocation1 + $0x6] ss:$9 sm:$0xff] %v1357_v30  ;;  %v1202_v30 = vrot.slane %v1160_v19, 2 }
 0x145   :  { %1423 = vst [vmem:[#allocation1 + $0x7] ss:$9 sm:$0xff] %v1360_v22 }
 0x14c   :  { %v1424_v40 = vld [vmem:[#allocation1] sm:$0xff] }
 0x14d   :  { %1425 = vst [vmem:[#allocation1] ss:$9 sm:$0xff] %v1361_v23 }
 0x14e   :  { %1426 = vst [vmem:[#allocation1 + $0x1] ss:$9 sm:$0xff] %v1362_v24 }
 0x14f   :  { %1427 = vst [vmem:[#allocation1 + $0x2] ss:$9 sm:$0xff] %v1365_v26  ;;  %v1203_v26 = vrot.slane %v1160_v19, 4 }
 0x150   :  { %1428 = vst [vmem:[#allocation1 + $0x3] ss:$9 sm:$0xff] %v1366_v33  ;;  %v1204_v33 = vrot.slane %v1160_v19, 6 }
 0x151   :  { %2244 = vmatmul.msk.bf16.gmra.mxu2 %vm806_vm7, %v1424_v40  ;;  %1429 = vst [vmem:[#allocation1 + $0x4] ss:$9 sm:$0xff] %v1367_v34  ;;  %v1166_v40 = vpop.f32.mrf.mxu1 }
 0x152   :  { %1430 = vst [vmem:[#allocation1 + $0x5] ss:$9 sm:$0xff] %v1370_v31 }
 0x153   :  { %1431 = vst [vmem:[#allocation1 + $0x6] ss:$9 sm:$0xff] %v1371_v32 }
 0x154   :  { %1432 = vst [vmem:[#allocation1 + $0x7] ss:$9 sm:$0xff] %v1372_v25 }
 0x15b   :  { %v1433_v41 = vld [vmem:[#allocation1] sm:$0xff] }
 0x161   :  { %2245 = vmatmul.msk.bf16.gmra.mxu2 %vm806_vm7, %v1433_v41 }
 0x194   :  { %v1461_v54 = vpop.f32.mrf.mxu2 }
 0x195   :  { %v1503_v57 = vrot.slane %v1461_v54, 2  ;;  %v1504_v59 = vrot.slane %v1461_v54, 4  ;;  %v1505_v60 = vrot.slane %v1461_v54, 6  ;;  %v1575_v61 = vadd.f32 %v1461_v54, %v1155_v48 }
 0x196   :  { %v1205_v54 = vrot.slane %v1162_v43, 2 }
 0x197   :  { %v1576_v62 = vadd.f32 %v1503_v57, %v1196_v51  ;;  %v1577_v0 = vadd.f32 %v1504_v59, %v1197_v52  ;;  %v1578_v58 = vadd.f32 %v1505_v60, %v1198_v53  ;;  %v1631_v1 = vadd.f32 %v2853_v49, %v1575_v61 }
 0x198   :  { %v1206_v57 = vrot.slane %v1162_v43, 4  ;;  %v1207_v60 = vrot.slane %v1162_v43, 6 }
 0x199   :  { %v1632_v3 = vadd.f32 %v2860_v55, %v1576_v62  ;;  %v1633_v5 = vadd.f32 %v2863_v56, %v1577_v0  ;;  %v1634_v4 = vadd.f32 %v2853_v49, %v1578_v58  ;;  %v1679_v6 = vmax.f32 %v1631_v1, 0.0 }
 0x19b   :  { %v1680_v7 = vmax.f32 %v1632_v3, 0.0  ;;  %v1681_v8 = vmax.f32 %v1633_v5, 0.0  ;;  %v1682_v9 = vmax.f32 %v1634_v4, 0.0  ;;  %1775 = vst [vmem:[#allocation1] ss:$4 sm:$0xff] %v1679_v6  ;;  %v1165_v3 = vadd.f32 %v2871_v12, %v2869_v11 }
 0x19c   :  { %v1463_v15 = vpop.f32.mrf.mxu2 }
 0x19d   :  { %1777 = vst [vmem:[#allocation1 + $0x1] ss:$4 sm:$0xff] %v1680_v7  ;;  %v1506_v16 = vrot.slane %v1463_v15, 2  ;;  %v1507_v14 = vrot.slane %v1463_v15, 4  ;;  %v1508_v17 = vrot.slane %v1463_v15, 6  ;;  %v1579_v18 = vadd.f32 %v1463_v15, %v1157_v2 }
 0x19e   :  { %1779 = vst [vmem:[#allocation1 + $0x2] ss:$4 sm:$0xff] %v1681_v8  ;;  %v843_v8 = vpop.f32.mrf.mxu0  ;;  %v1210_v11 = vrot.slane %v1165_v3, 6 }
 0x19f   :  { %1782 = vst [vmem:[#allocation1 + $0x20] ss:$4 sm:$0xff] %v1682_v9  ;;  %v1580_v20 = vadd.f32 %v1506_v16, %v1199_v13  ;;  %v1581_v21 = vadd.f32 %v1507_v14, %v1200_v63  ;;  %v1582_v22 = vadd.f32 %v1508_v17, %v1201_v10  ;;  %v1635_v23 = vadd.f32 %v2860_v55, %v1579_v18  ;;  %v1169_v9 = vpop.f32.mrf.mxu1 }
 0x1a0   :  { %v1208_v16 = vrot.slane %v1165_v3, 2  ;;  %v1209_v14 = vrot.slane %v1165_v3, 4 }
 0x1a1   :  { %v1636_v24 = vadd.f32 %v2863_v56, %v1580_v20  ;;  %v1637_v27 = vadd.f32 %v2853_v49, %v1581_v21  ;;  %v1638_v28 = vadd.f32 %v2860_v55, %v1582_v22  ;;  %v1683_v29 = vmax.f32 %v1635_v23, 0.0 }
 0x1a3   :  { %v1684_v31 = vmax.f32 %v1636_v24, 0.0  ;;  %v1685_v32 = vmax.f32 %v1637_v27, 0.0  ;;  %v1686_v25 = vmax.f32 %v1638_v28, 0.0  ;;  %1784 = vst [vmem:[#allocation1 + $0x21] ss:$4 sm:$0xff] %v1683_v29 }
 0x1a4   :  { %v1466_v34 = vpop.f32.mrf.mxu2 }
 0x1a5   :  { %v2877_v35 = vld.sshfl [vmem:[#allocation1] sm:$0xff pattern:$0x73625140]  ;;  %1786 = vst [vmem:[#allocation1 + $0x22] ss:$4 sm:$0xff] %v1684_v31  ;;  %v1509_v36 = vrot.slane %v1466_v34, 2  ;;  %v1583_v38 = vadd.f32 %v1466_v34, %v1160_v19 }
 0x1a6   :  { %1788 = vst [vmem:[#allocation1] ss:$4 sm:$0xff] %v1685_v32  ;;  %v1510_v41 = vrot.slane %v1466_v34, 4  ;;  %v1511_v42 = vrot.slane %v1466_v34, 6  ;;  %v1167_v32 = vadd.f32 %v1166_v40, %v2879_v39 }
 0x1a7   :  { %1789 = vst [vmem:[#allocation1 + $0x1] ss:$4 sm:$0xff] %v1686_v25  ;;  %v1584_v44 = vadd.f32 %v1509_v36, %v1202_v30  ;;  %v1639_v45 = vadd.f32 %v2863_v56, %v1583_v38  ;;  %v845_v36 = vpop.f32.mrf.mxu0  ;;  %v1171_v38 = vpop.f32.mrf.mxu1 }
 0x1a8   :  { %v1585_v46 = vadd.f32 %v1510_v41, %v1203_v26  ;;  %v1586_v47 = vadd.f32 %v1511_v42, %v1204_v33  ;;  %v1212_v40 = vrot.slane %v1167_v32, 4 }
 0x1a9   :  { %v1640_v48 = vadd.f32 %v2853_v49, %v1584_v44  ;;  %v1687_v51 = vmax.f32 %v1639_v45, 0.0  ;;  %v1211_v44 = vrot.slane %v1167_v32, 2 }
 0x1aa   :  { %v1641_v52 = vadd.f32 %v2860_v55, %v1585_v46  ;;  %v1642_v53 = vadd.f32 %v2863_v56, %v1586_v47 }
 0x1ab   :  { %v1688_v59 = vmax.f32 %v1640_v48, 0.0  ;;  %1790 = vst [vmem:[#allocation1 + $0x2] ss:$4 sm:$0xff] %v1687_v51  ;;  %v1213_v48 = vrot.slane %v1167_v32, 6 }
 0x1ac   :  { %v1689_v61 = vmax.f32 %v1641_v52, 0.0  ;;  %v1690_v62 = vmax.f32 %v1642_v53, 0.0  ;;  %v2887_v50 = vld.sshfl [vmem:[#allocation1 + $0x20] sm:$0xff pattern:$0x73625140]  ;;  %v1468_v37 = vpop.f32.mrf.mxu2  ;;  %v1170_v53 = vadd.f32 %v1169_v9, %v843_v8 }
 0x1ad   :  { %1792 = vst [vmem:[#allocation1 + $0x20] ss:$4 sm:$0xff] %v1688_v59  ;;  %v1512_v0 = vrot.slane %v1468_v37, 2  ;;  %v1513_v58 = vrot.slane %v1468_v37, 4  ;;  %v1514_v1 = vrot.slane %v1468_v37, 6  ;;  %v1587_v2 = vadd.f32 %v1468_v37, %v1162_v43 }
 0x1ae   :  { %1793 = vst [vmem:[#allocation1 + $0x21] ss:$4 sm:$0xff] %v1689_v61 }
 0x1af   :  { %1794 = vst [vmem:[#allocation1 + $0x22] ss:$4 sm:$0xff] %v1690_v62  ;;  %v1588_v5 = vadd.f32 %v1512_v0, %v1205_v54  ;;  %v1589_v4 = vadd.f32 %v1513_v58, %v1206_v57  ;;  %v1590_v6 = vadd.f32 %v1514_v1, %v1207_v60  ;;  %v1643_v7 = vadd.f32 %v2853_v49, %v1587_v2 }
 0x1b0   :  { %v1214_v58 = vrot.slane %v1170_v53, 2  ;;  %v1215_v1 = vrot.slane %v1170_v53, 4  ;;  %v1216_v2 = vrot.slane %v1170_v53, 6 }
 0x1b1   :  { %v1644_v13 = vadd.f32 %v2860_v55, %v1588_v5  ;;  %v1645_v63 = vadd.f32 %v2863_v56, %v1589_v4  ;;  %v1646_v10 = vadd.f32 %v2853_v49, %v1590_v6  ;;  %v1691_v15 = vmax.f32 %v1643_v7, 0.0  ;;  %v848_v5 = vpop.f32.mrf.mxu0  ;;  %v1174_v4 = vpop.f32.mrf.mxu1 }
 0x1b2   :  { %v2895_v17 = vld.sshfl [vmem:[#allocation1] sm:$0xff pattern:$0x73625140] }
 0x1b3   :  { %v1692_v12 = vmax.f32 %v1644_v13, 0.0  ;;  %v1693_v18 = vmax.f32 %v1645_v63, 0.0  ;;  %v1694_v19 = vmax.f32 %v1646_v10, 0.0  ;;  %1796 = vst [vmem:[#allocation1] ss:$4 sm:$0xff] %v1691_v15 }
 0x1b4   :  { %v1471_v20 = vpop.f32.mrf.mxu2 }
 0x1b5   :  { %1797 = vst [vmem:[#allocation1 + $0x1] ss:$4 sm:$0xff] %v1692_v12  ;;  %v1515_v21 = vrot.slane %v1471_v20, 2  ;;  %v1516_v22 = vrot.slane %v1471_v20, 4  ;;  %v1517_v23 = vrot.slane %v1471_v20, 6  ;;  %v1591_v24 = vadd.f32 %v1471_v20, %v1165_v3 }
 0x1b6   :  { %v2897_v27 = vld.sshfl [vmem:[#allocation1 + $0x20] sm:$0xff pattern:$0x73625140]  ;;  %1798 = vst [vmem:[#allocation1 + $0x2] ss:$4 sm:$0xff] %v1693_v18  ;;  %v1868_v20 = vsel %vm1860_vm0, %v2887_v50, -inf }
 0x1b7   :  { %1800 = vst [vmem:[#allocation1 + $0x20] ss:$4 sm:$0xff] %v1694_v19  ;;  %v1592_v28 = vadd.f32 %v1515_v21, %v1208_v16  ;;  %v1593_v29 = vadd.f32 %v1516_v22, %v1209_v14  ;;  %v1594_v30 = vadd.f32 %v1517_v23, %v1210_v11  ;;  %v1647_v31 = vadd.f32 %v2860_v55, %v1591_v24 }
 0x1b8   :  { %v1861_v16 = vsel %vm1860_vm0, %v2877_v35, -inf  ;;  %v1172_v19 = vadd.f32 %v1171_v38, %v845_v36 }
 0x1b9   :  { %v1648_v25 = vadd.f32 %v2863_v56, %v1592_v28  ;;  %v1649_v26 = vadd.f32 %v2853_v49, %v1593_v29  ;;  %v1650_v33 = vadd.f32 %v2860_v55, %v1594_v30  ;;  %v1695_v34 = vmax.f32 %v1647_v31, 0.0 }
 0x1ba   :  { %v1862_v35 = vrot.slane %v1861_v16, 4 }
 0x1bb   :  { %v1696_v41 = vmax.f32 %v1648_v25, 0.0  ;;  %v1697_v42 = vmax.f32 %v1649_v26, 0.0  ;;  %v1698_v43 = vmax.f32 %v1650_v33, 0.0  ;;  %1801 = vst [vmem:[#allocation1 + $0x21] ss:$4 sm:$0xff] %v1695_v34  ;;  %v1218_v25 = vrot.slane %v1172_v19, 4 }
 0x1bc   :  { %v1473_v45 = vpop.f32.mrf.mxu2  ;;  %v1219_v26 = vrot.slane %v1172_v19, 6  ;;  %v1869_v34 = vrot.slane %v1868_v20, 4 }
 0x1bd   :  { %v2904_v46 = vld.sshfl [vmem:[#allocation1] sm:$0xff pattern:$0x73625140]  ;;  %1802 = vst [vmem:[#allocation1 + $0x22] ss:$4 sm:$0xff] %v1696_v41  ;;  %v1518_v47 = vrot.slane %v1473_v45, 2  ;;  %v1595_v39 = vadd.f32 %v1473_v45, %v1167_v32 }
 0x1be   :  { %1804 = vst [vmem:[#allocation1] ss:$4 sm:$0xff] %v1697_v42  ;;  %v1519_v51 = vrot.slane %v1473_v45, 4  ;;  %v1520_v52 = vrot.slane %v1473_v45, 6  ;;  %v1217_v32 = vrot.slane %v1172_v19, 2  ;;  %v850_v42 = vpop.f32.mrf.mxu0  ;;  %v1175_v45 = vadd.f32 %v1174_v4, %v848_v5 }
 0x1bf   :  { %1805 = vst [vmem:[#allocation1 + $0x1] ss:$4 sm:$0xff] %v1698_v43  ;;  %v1596_v54 = vadd.f32 %v1518_v47, %v1211_v44  ;;  %v1651_v57 = vadd.f32 %v2863_v56, %v1595_v39  ;;  %v1176_v43 = vpop.f32.mrf.mxu1  ;;  %v1863_v47 = vmax.f32 %v1861_v16, %v1862_v35  ;;  %v1875_v39 = vsel %vm1860_vm0, %v2895_v17, -inf  ;;  %v2248_v5 = vld [vmem:[%s3061_s5] sm:$0xf] }
 0x1c0   :  { %v1597_v59 = vadd.f32 %v1519_v51, %v1212_v40  ;;  %v1598_v60 = vadd.f32 %v1520_v52, %v1213_v48  ;;  %v2287_v4 = vld [vmem:[%s3061_s5 + $0x4] sm:$0xf0] }
 0x1c1   :  { %v1652_v61 = vadd.f32 %v2853_v49, %v1596_v54  ;;  %v1699_v62 = vmax.f32 %v1651_v57, 0.0 }
 0x1c2   :  { %v1653_v37 = vadd.f32 %v2860_v55, %v1597_v59  ;;  %v1654_v0 = vadd.f32 %v2863_v56, %v1598_v60  ;;  %v1220_v60 = vrot.slane %v1175_v45, 2 }
 0x1c3   :  { %v1700_v3 = vmax.f32 %v1652_v61, 0.0  ;;  %1806 = vst [vmem:[#allocation1 + $0x2] ss:$4 sm:$0xff] %v1699_v62  ;;  %v1864_v61 = vrot.slane %v1863_v47, 2  ;;  %v1870_v62 = vmax.f32 %v1868_v20, %v1869_v34 }
 0x1c4   :  { %v1701_v6 = vmax.f32 %v1653_v37, 0.0  ;;  %v1702_v7 = vmax.f32 %v1654_v0, 0.0  ;;  %v2910_v8 = vld.sshfl [vmem:[#allocation1 + $0x20] sm:$0xff pattern:$0x73625140]  ;;  %v1476_v9 = vpop.f32.mrf.mxu2  ;;  %v1876_v37 = vrot.slane %v1875_v39, 4 }
 0x1c5   :  { %1808 = vst [vmem:[#allocation1 + $0x20] ss:$4 sm:$0xff] %v1700_v3  ;;  %v1521_v13 = vrot.slane %v1476_v9, 2  ;;  %v1522_v63 = vrot.slane %v1476_v9, 4  ;;  %v1523_v10 = vrot.slane %v1476_v9, 6  ;;  %v1599_v15 = vadd.f32 %v1476_v9, %v1170_v53 }
 0x1c6   :  { %1809 = vst [vmem:[#allocation1 + $0x21] ss:$4 sm:$0xff] %v1701_v6  ;;  %v1221_v0 = vrot.slane %v1175_v45, 4  ;;  %v1882_v6 = vsel %vm1860_vm0, %v2897_v27, -inf }
 0x1c7   :  { %1810 = vst [vmem:[#allocation1 + $0x22] ss:$4 sm:$0xff] %v1702_v7  ;;  %v1600_v14 = vadd.f32 %v1521_v13, %v1214_v58  ;;  %v1601_v11 = vadd.f32 %v1522_v63, %v1215_v1  ;;  %v1602_v12 = vadd.f32 %v1523_v10, %v1216_v2  ;;  %v1655_v18 = vadd.f32 %v2853_v49, %v1599_v15 }
 0x1c8   :  { %v1222_v58 = vrot.slane %v1175_v45, 6  ;;  %v1177_v10 = vadd.f32 %v1176_v43, %v850_v42  ;;  %v2249_v15 = vor.u32 %v2287_v4, %v2248_v5  ;;  %v1883_v27 = vrot.slane %v1882_v6, 4 }
 0x1c9   :  { %v1656_v21 = vadd.f32 %v2860_v55, %v1600_v14  ;;  %v1657_v22 = vadd.f32 %v2863_v56, %v1601_v11  ;;  %v1658_v23 = vadd.f32 %v2853_v49, %v1602_v12  ;;  %v1703_v24 = vmax.f32 %v1655_v18, 0.0 }
 0x1ca   :  { %v2920_v28 = vld.sshfl [vmem:[#allocation1] sm:$0xff pattern:$0x73625140]  ;;  %v1871_v14 = vrot.slane %v1870_v62, 2  ;;  %v1877_v11 = vmax.f32 %v1875_v39, %v1876_v37  ;;  %2068 = vmatpush.bf16.msra.mxu3 %v2249_v15  ;;  %v1884_v43 = vmax.f32 %v1882_v6, %v1883_v27  ;;  %v1896_v37 = vsel %vm1860_vm0, %v2910_v8, -inf }
 0x1cb   :  { %v1704_v29 = vmax.f32 %v1656_v21, 0.0  ;;  %v1705_v30 = vmax.f32 %v1657_v22, 0.0  ;;  %v1706_v31 = vmax.f32 %v1658_v23, 0.0  ;;  %1812 = vst [vmem:[#allocation1] ss:$4 sm:$0xff] %v1703_v24  ;;  %v853_v21 = vpop.f32.mrf.mxu0  ;;  %v1179_v22 = vpop.f32.mrf.mxu1 }
 0x1cc   :  { %v1478_v33 = vpop.f32.mrf.mxu2 }
 0x1cd   :  { %v1524_v50 = vrot.slane %v1478_v33, 2  ;;  %v1525_v36 = vrot.slane %v1478_v33, 4  ;;  %v1526_v38 = vrot.slane %v1478_v33, 6  ;;  %v1603_v41 = vadd.f32 %v1478_v33, %v1172_v19  ;;  %1813 = vst [vmem:[#allocation1 + $0x1] ss:$4 sm:$0xff] %v1704_v29 }
 0x1ce   :  { %v2922_v44 = vld.sshfl [vmem:[#allocation1 + $0x20] sm:$0xff pattern:$0x73625140]  ;;  %1814 = vst [vmem:[#allocation1 + $0x2] ss:$4 sm:$0xff] %v1705_v30  ;;  %v1223_v30 = vrot.slane %v1177_v10, 2 }
 0x1cf   :  { %1816 = vst [vmem:[#allocation1 + $0x20] ss:$4 sm:$0xff] %v1706_v31  ;;  %v1604_v40 = vadd.f32 %v1524_v50, %v1217_v32  ;;  %v1605_v48 = vadd.f32 %v1525_v36, %v1218_v25  ;;  %v1606_v51 = vadd.f32 %v1526_v38, %v1219_v26  ;;  %v1659_v52 = vadd.f32 %v2860_v55, %v1603_v41 }
 0x1d0   :  { %v1865_v31 = vmax.f32 %v1863_v47, %v1864_v61  ;;  %v2944_v32 = vmax.f32 %v1870_v62, %v1871_v14  ;;  %v1878_v25 = vrot.slane %v1877_v11, 2  ;;  %v1224_v26 = vrot.slane %v1177_v10, 4 }
 0x1d1   :  { %v1660_v53 = vadd.f32 %v2863_v56, %v1604_v40  ;;  %v1661_v54 = vadd.f32 %v2853_v49, %v1605_v48  ;;  %v1662_v57 = vadd.f32 %v2860_v55, %v1606_v51  ;;  %v1707_v59 = vmax.f32 %v1659_v52, 0.0 }
 0x1d2   :  { %v1225_v36 = vrot.slane %v1177_v10, 6  ;;  %v1180_v41 = vadd.f32 %v1179_v22, %v853_v21  ;;  %v1866_v51 = vrot.slane %v1865_v31, 1  ;;  %v1873_v52 = vrot.slane %v2944_v32, 1 }
 0x1d3   :  { %v1708_v17 = vmax.f32 %v1660_v53, 0.0  ;;  %v1709_v1 = vmax.f32 %v1661_v54, 0.0  ;;  %1817 = vst [vmem:[#allocation1 + $0x21] ss:$4 sm:$0xff] %v1707_v59  ;;  %v1710_v2 = vmax.f32 %v1662_v57, 0.0  ;;  %v2949_v53 = vmax.f32 %v1877_v11, %v1878_v25 }
 0x1d4   :  { %v1481_v3 = vpop.f32.mrf.mxu2  ;;  %v1226_v61 = vrot.slane %v1180_v41, 2  ;;  %v1885_v62 = vrot.slane %v1884_v43, 2  ;;  %v1227_v5 = vrot.slane %v1180_v41, 4  ;;  %v1228_v4 = vrot.slane %v1180_v41, 6 }
 0x1d5   :  { %1818 = vst [vmem:[#allocation1 + $0x22] ss:$4 sm:$0xff] %v1708_v17  ;;  %v1527_v7 = vrot.slane %v1481_v3, 2  ;;  %v1528_v9 = vrot.slane %v1481_v3, 4  ;;  %v1529_v13 = vrot.slane %v1481_v3, 6  ;;  %v1607_v63 = vadd.f32 %v1481_v3, %v1175_v45  ;;  %v1181_v3 = vpop.f32.mrf.mxu1 }
 0x1d6   :  { %v2938_v16 = vld.sshfl [vmem:[#allocation1] sm:$0xff pattern:$0x73625140]  ;;  %v1889_v45 = vsel %vm1860_vm0, %v2904_v46, -inf  ;;  %v1897_v14 = vrot.slane %v1896_v37, 4  ;;  %v2962_v27 = vmax.f32 %v1865_v31, %v1866_v51  ;;  %v1903_v51 = vsel %vm1860_vm0, %v2920_v28, -inf }
 0x1d7   :  { %v1608_v12 = vadd.f32 %v1527_v7, %v1220_v60  ;;  %v1609_v18 = vadd.f32 %v1528_v9, %v1221_v0  ;;  %v1610_v19 = vadd.f32 %v1529_v13, %v1222_v58  ;;  %v1663_v20 = vadd.f32 %v2863_v56, %v1607_v63  ;;  %1820 = vst [vmem:[#allocation1] ss:$4 sm:$0xff] %v1709_v1 }
 0x1d8   :  { %1821 = vst [vmem:[#allocation1 + $0x1] ss:$4 sm:$0xff] %v1710_v2  ;;  %v1890_v46 = vrot.slane %v1889_v45, 4  ;;  %v855_v2 = vpop.f32.mrf.mxu0  ;;  %v1880_v7 = vrot.slane %v2949_v53, 1  ;;  %v1917_v11 = vsel %vm1860_vm0, %v2938_v16, -inf }
 0x1d9   :  { %v1664_v23 = vadd.f32 %v2853_v49, %v1608_v12  ;;  %v1665_v24 = vadd.f32 %v2860_v55, %v1609_v18  ;;  %v1666_v35 = vadd.f32 %v2863_v56, %v1610_v19  ;;  %v1711_v29 = vmax.f32 %v1663_v20, 0.0 }
 0x1db   :  { %v1712_v33 = vmax.f32 %v1664_v23, 0.0  ;;  %v1713_v34 = vmax.f32 %v1665_v24, 0.0  ;;  %v1714_v50 = vmax.f32 %v1666_v35, 0.0  ;;  %1822 = vst [vmem:[#allocation1 + $0x2] ss:$4 sm:$0xff] %v1711_v29  ;;  %v2964_v23 = vmax.f32 %v1884_v43, %v1885_v62 }
 0x1dc   :  { %v1819_v38 = vld.sshfl [vmem:[#allocation1 + $0x20] sm:$0xff pattern:$0x73625140]  ;;  %v1483_v42 = vpop.f32.mrf.mxu2  ;;  %v2966_v24 = vmax.f32 %v1889_v45, %v1890_v46 }
 0x1dd   :  { %1824 = vst [vmem:[#allocation1 + $0x20] ss:$4 sm:$0xff] %v1712_v33  ;;  %v1530_v39 = vrot.slane %v1483_v42, 2  ;;  %v1531_v40 = vrot.slane %v1483_v42, 4  ;;  %v1532_v47 = vrot.slane %v1483_v42, 6  ;;  %v1611_v48 = vadd.f32 %v1483_v42, %v1177_v10 }
 0x1de   :  { %1825 = vst [vmem:[#allocation1 + $0x21] ss:$4 sm:$0xff] %v1713_v34  ;;  %v1924_v8 = vsel %vm1860_vm0, %v1819_v38, -inf  ;;  %v1182_v10 = vadd.f32 %v1181_v3, %v855_v2  ;;  %v1918_v33 = vrot.slane %v1917_v11, 4 }
 0x1df   :  { %1826 = vst [vmem:[#allocation1 + $0x22] ss:$4 sm:$0xff] %v1714_v50  ;;  %v1612_v54 = vadd.f32 %v1530_v39, %v1223_v30  ;;  %v1613_v57 = vadd.f32 %v1531_v40, %v1224_v26  ;;  %v1614_v59 = vadd.f32 %v1532_v47, %v1225_v36  ;;  %v1667_v60 = vadd.f32 %v2853_v49, %v1611_v48 }
 0x1e0   :  { %v1925_v35 = vrot.slane %v1924_v8, 4  ;;  %v1229_v26 = vrot.slane %v1182_v10, 2  ;;  %v1230_v42 = vrot.slane %v1182_v10, 4  ;;  %v1231_v43 = vrot.slane %v1182_v10, 6 }
 0x1e1   :  { %v1668_v0 = vadd.f32 %v2860_v55, %v1612_v54  ;;  %v1669_v58 = vadd.f32 %v2863_v56, %v1613_v57  ;;  %v1670_v17 = vadd.f32 %v2853_v49, %v1614_v59  ;;  %v1715_v1 = vmax.f32 %v1667_v60, 0.0 }
 0x1e2   :  { %v1823_v6 = vld.sshfl [vmem:[#allocation1] sm:$0xff pattern:$0x73625140]  ;;  %v1926_v45 = vmax.f32 %v1924_v8, %v1925_v35  ;;  %v1898_v48 = vmax.f32 %v1896_v37, %v1897_v14  ;;  %v1910_v59 = vsel %vm1860_vm0, %v2922_v44, -inf  ;;  %v1919_v60 = vmax.f32 %v1917_v11, %v1918_v33 }
 0x1e3   :  { %v1716_v9 = vmax.f32 %v1668_v0, 0.0  ;;  %v1717_v13 = vmax.f32 %v1669_v58, 0.0  ;;  %v1718_v63 = vmax.f32 %v1670_v17, 0.0  ;;  %1828 = vst [vmem:[#allocation1] ss:$4 sm:$0xff] %v1715_v1  ;;  %v1931_v12 = vsel %vm1860_vm0, %v1823_v6, -inf }
 0x1e4   :  { %v1486_v15 = vpop.f32.mrf.mxu2  ;;  %v1932_v34 = vrot.slane %v1931_v12, 4  ;;  %v1904_v1 = vrot.slane %v1903_v51, 4  ;;  %v1927_v2 = vrot.slane %v1926_v45, 2  ;;  %v1911_v44 = vrot.slane %v1910_v59, 4 }
 0x1e5   :  { %v1533_v18 = vrot.slane %v1486_v15, 2  ;;  %v1534_v19 = vrot.slane %v1486_v15, 4  ;;  %v1535_v20 = vrot.slane %v1486_v15, 6  ;;  %v1615_v21 = vadd.f32 %v1486_v15, %v1180_v41  ;;  %1829 = vst [vmem:[#allocation1 + $0x1] ss:$4 sm:$0xff] %v1716_v9 }
 0x1e6   :  { %v1827_v22 = vld.sshfl [vmem:[#allocation1 + $0x20] sm:$0xff pattern:$0x73625140]  ;;  %1830 = vst [vmem:[#allocation1 + $0x2] ss:$4 sm:$0xff] %v1717_v13  ;;  %v1920_v9 = vrot.slane %v1919_v60, 2  ;;  %v1912_v33 = vmax.f32 %v1910_v59, %v1911_v44 }
 0x1e7   :  { %v1616_v29 = vadd.f32 %v1533_v18, %v1226_v61  ;;  %v1617_v30 = vadd.f32 %v1534_v19, %v1227_v5  ;;  %v1618_v25 = vadd.f32 %v1535_v20, %v1228_v4  ;;  %v1671_v16 = vadd.f32 %v2860_v55, %v1615_v21  ;;  %1832 = vst [vmem:[#allocation1 + $0x20] ss:$4 sm:$0xff] %v1718_v63 }
 0x1e8   :  { %v1938_v50 = vsel %vm1860_vm0, %v1827_v22, -inf  ;;  %v1933_v61 = vmax.f32 %v1931_v12, %v1932_v34  ;;  %v1892_v11 = vrot.slane %v2966_v24, 2  ;;  %v1899_v12 = vrot.slane %v1898_v48, 2 }
 0x1e9   :  { %v1672_v36 = vadd.f32 %v2863_v56, %v1616_v29  ;;  %v1673_v31 = vadd.f32 %v2853_v49, %v1617_v30  ;;  %v1674_v38 = vadd.f32 %v2860_v55, %v1618_v25  ;;  %v1719_v41 = vmax.f32 %v1671_v16, 0.0 }
 0x1ea   :  { %v1939_v39 = vrot.slane %v1938_v50, 4  ;;  %v1934_v13 = vrot.slane %v1933_v61, 2  ;;  %v1905_v18 = vmax.f32 %v1903_v51, %v1904_v1  ;;  %v1928_v22 = vmax.f32 %v1926_v45, %v1927_v2 }
 0x1eb   :  { %v1720_v40 = vmax.f32 %v1672_v36, 0.0  ;;  %v1721_v47 = vmax.f32 %v1673_v31, 0.0  ;;  %1833 = vst [vmem:[#allocation1 + $0x21] ss:$4 sm:$0xff] %v1719_v41  ;;  %v1722_v54 = vmax.f32 %v1674_v38, 0.0  ;;  %v1921_v34 = vmax.f32 %v1919_v60, %v1920_v9 }
 0x1ec   :  { %v1488_v57 = vpop.f32.mrf.mxu2  ;;  %v1940_v3 = vmax.f32 %v1938_v50, %v1939_v39  ;;  %v1935_v30 = vmax.f32 %v1933_v61, %v1934_v13  ;;  %v1893_v36 = vmax.f32 %v2966_v24, %v1892_v11  ;;  %v1900_v31 = vmax.f32 %v1898_v48, %v1899_v12 }
 0x1ed   :  { %v1536_v62 = vrot.slane %v1488_v57, 2  ;;  %v1537_v46 = vrot.slane %v1488_v57, 4  ;;  %v1538_v0 = vrot.slane %v1488_v57, 6  ;;  %v1619_v58 = vadd.f32 %v1488_v57, %v1182_v10  ;;  %v1831_v17 = vld.sshfl [vmem:[#allocation1] sm:$0xff pattern:$0x73625140] }
 0x1ee   :  { %1834 = vst [vmem:[#allocation1 + $0x22] ss:$4 sm:$0xff] %v1720_v40  ;;  %v1945_v37 = vsel %vm1860_vm0, %v1831_v17, -inf  ;;  %v1941_v35 = vrot.slane %v1940_v3, 2  ;;  %v1906_v38 = vrot.slane %v1905_v18, 2  ;;  %v1929_v41 = vrot.slane %v1928_v22, 1 }
 0x1ef   :  { %v1620_v5 = vadd.f32 %v1536_v62, %v1229_v26  ;;  %v1621_v28 = vadd.f32 %v1537_v46, %v1230_v42  ;;  %v1622_v4 = vadd.f32 %v1538_v0, %v1231_v43  ;;  %v1675_v6 = vadd.f32 %v2863_v56, %v1619_v58  ;;  %1836 = vst [vmem:[#allocation1] ss:$4 sm:$0xff] %v1721_v47 }
 0x1f0   :  { %1837 = vst [vmem:[#allocation1 + $0x1] ss:$4 sm:$0xff] %v1722_v54  ;;  %v1946_v63 = vrot.slane %v1945_v37, 4  ;;  %v1887_v26 = vrot.slane %v2964_v23, 1  ;;  %v1942_v42 = vmax.f32 %v1940_v3, %v1941_v35  ;;  %v1874_v45 = vmax.f32 %v2944_v32, %v1873_v52 }
 0x1f1   :  { %v1676_v8 = vadd.f32 %v2853_v49, %v1620_v5  ;;  %v1677_v10 = vadd.f32 %v2860_v55, %v1621_v28  ;;  %v1678_v15 = vadd.f32 %v2863_v56, %v1622_v4  ;;  %v1723_v14 = vmax.f32 %v1675_v6, 0.0  ;;  %v2286_v55 = vld [vmem:[%s3061_s5 + $0x4] sm:$0xf]  ;;  %v2250_v56 = vld [vmem:[%s3061_s5 + $0x8] sm:$0xf0] }
 0x1f2   :  { %v1947_v19 = vmax.f32 %v1945_v37, %v1946_v63  ;;  %v1979_v49 = vpack.c.bf16 %v2962_v27, %v2962_v27  ;;  %v2253_v50 = vor.u32 %v2286_v55, %v2250_v56  ;;  %v1936_v39 = vrot.slane %v1935_v30, 1 }
 0x1f3   :  { %v1724_v20 = vmax.f32 %v1676_v8, 0.0  ;;  %v1725_v21 = vmax.f32 %v1677_v10, 0.0  ;;  %1838 = vst [vmem:[#allocation1 + $0x2] ss:$4 sm:$0xff] %v1723_v14  ;;  %v1726_v29 = vmax.f32 %v1678_v15, 0.0  ;;  %v1881_v24 = vmax.f32 %v2949_v53, %v1880_v7 }
 0x1f4   :  { %v1948_v25 = vrot.slane %v1947_v19, 2  ;;  %2082 = vmatpush.bf16.msrb.mxu3 %v2253_v50  ;;  %v2997_v47 = vunpack.c.l.b16 %v1979_v49  ;;  %v1913_v48 = vrot.slane %v1912_v33, 2  ;;  %v1922_v51 = vrot.slane %v1921_v34, 1 }
 0x1f5   :  { %v1835_v16 = vld.sshfl [vmem:[#allocation1 + $0x20] sm:$0xff pattern:$0x73625140]  ;;  %v1888_v59 = vmax.f32 %v2964_v23, %v1887_v26  ;;  %v1894_v60 = vrot.slane %v1893_v36, 1  ;;  %v1901_v61 = vrot.slane %v1900_v31, 1  ;;  %v1907_v62 = vmax.f32 %v1905_v18, %v1906_v38 }
 0x1f6   :  { %1840 = vst [vmem:[#allocation1 + $0x20] ss:$4 sm:$0xff] %v1724_v20  ;;  %v1952_v27 = vsel %vm1860_vm0, %v1835_v16, -inf  ;;  %v1949_v40 = vmax.f32 %v1947_v19, %v1948_v25  ;;  %v1930_v46 = vmax.f32 %v1928_v22, %v1929_v41  ;;  %v1943_v0 = vrot.slane %v1942_v42, 1 }
 0x1f7   :  { %1841 = vst [vmem:[#allocation1 + $0x21] ss:$4 sm:$0xff] %v1725_v21  ;;  %v1953_v43 = vrot.slane %v1952_v27, 4  ;;  %v1937_v58 = vmax.f32 %v1935_v30, %v1936_v39  ;;  %v1980_v2 = vpack.c.bf16 %v1874_v45, %v1874_v45  ;;  %v1914_v3 = vmax.f32 %v1912_v33, %v1913_v48 }
 0x1f8   :  { %1842 = vst [vmem:[#allocation1 + $0x22] ss:$4 sm:$0xff] %v1726_v29  ;;  %v1950_v17 = vrot.slane %v1949_v40, 1  ;;  %v1923_v53 = vmax.f32 %v1921_v34, %v1922_v51  ;;  %v1981_v37 = vpack.c.bf16 %v1881_v24, %v1881_v24  ;;  %v1895_v5 = vmax.f32 %v1893_v36, %v1894_v60 }
 0x1f9   :  { %v1954_v54 = vmax.f32 %v1952_v27, %v1953_v43  ;;  %v1908_v28 = vrot.slane %v1907_v62, 1  ;;  %v1982_v23 = vpack.c.bf16 %v1888_v59, %v1888_v59  ;;  %v1902_v44 = vmax.f32 %v1900_v31, %v1901_v61 }
 0x1fa   :  { %v1839_v57 = vld.sshfl [vmem:[#allocation1] sm:$0xff pattern:$0x73625140]  ;;  %v1944_v9 = vmax.f32 %v1942_v42, %v1943_v0  ;;  %v1988_v63 = vpack.c.bf16 %v1930_v46, %v1930_v46  ;;  %v1951_v8 = vmax.f32 %v1949_v40, %v1950_v17  ;;  %v1989_v14 = vpack.c.bf16 %v1937_v58, %v1937_v58 }
 0x1fb   :  { %v1955_v32 = vrot.slane %v1954_v54, 2  ;;  %v1959_v52 = vsel %vm1860_vm0, %v1839_v57, -inf  ;;  %v1915_v11 = vrot.slane %v1914_v3, 1  ;;  %v1987_v19 = vpack.c.bf16 %v1923_v53, %v1923_v53 }
 0x1fc   :  { %v1960_v1 = vrot.slane %v1959_v52, 4  ;;  %v1909_v20 = vmax.f32 %v1907_v62, %v1908_v28  ;;  %v1983_v22 = vpack.c.bf16 %v1895_v5, %v1895_v5  ;;  %v2014_v35 = vunpack.c.l.b16 %v1980_v2 }
 0x1fd   :  { %v1956_v7 = vmax.f32 %v1954_v54, %v1955_v32  ;;  %v1990_v30 = vpack.c.bf16 %v1944_v9, %v1944_v9  ;;  %v2015_v25 = vunpack.c.l.b16 %v1981_v37  ;;  %v2022_v49 = vunpack.c.l.b16 %v1988_v63  ;;  %v2285_v37 = vld [vmem:[%s3062_s4 + $0x14] sm:$0xf0]  ;;  %v2283_v9 = vld [vmem:[%s3062_s4 + $0x4] sm:$0xf0]  ;;  %v2284_v63 = vld [vmem:[%s3062_s4 + $0x14] sm:$0xf] }
 0x1fe   :  { %v1961_v4 = vmax.f32 %v1959_v52, %v1960_v1  ;;  %v1984_v56 = vpack.c.bf16 %v1902_v44, %v1902_v44  ;;  %v1991_v16 = vpack.c.bf16 %v1951_v8, %v1951_v8  ;;  %v2023_v26 = vunpack.c.l.b16 %v1989_v14  ;;  %v2262_v44 = vld [vmem:[%s3062_s4] sm:$0xf]  ;;  %v2272_v8 = vld [vmem:[%s3062_s4 + $0x18] sm:$0xf0]  ;;  %v2264_v14 = vld [vmem:[%s3062_s4 + $0x8] sm:$0xf0] }
 0x1ff   :  { %v1843_v6 = vld.sshfl [vmem:[#allocation1 + $0x20] sm:$0xff pattern:$0x73625140]  ;;  %v1957_v13 = vrot.slane %v1956_v7, 1  ;;  %v1916_v33 = vmax.f32 %v1914_v3, %v1915_v11  ;;  %v2021_v36 = vunpack.c.l.b16 %v1987_v19  ;;  %v1985_v38 = vpack.c.bf16 %v1909_v20, %v1909_v20 }
 0x200   :  { %v1962_v10 = vrot.slane %v1961_v4, 2  ;;  %v1966_v15 = vsel %vm1860_vm0, %v1843_v6, -inf  ;;  %v2016_v27 = vunpack.c.l.b16 %v1982_v23  ;;  %v2017_v41 = vunpack.c.l.b16 %v1983_v22  ;;  %v2146_v22 = vld [vmem:[%s3064_s6] sm:$0x3] }
 0x201   :  { %v1958_v12 = vmax.f32 %v1956_v7, %v1957_v13  ;;  %v1967_v18 = vrot.slane %v1966_v15, 4  ;;  %v2024_v43 = vunpack.c.l.b16 %v1990_v30  ;;  %v2029_v45 = vsel %vm100_vm1, %v2014_v35, %v2997_v47  ;;  %v2270_v7 = vld [vmem:[%s3062_s4 + $0x10] sm:$0xf] }
 0x202   :  { %v1963_v21 = vmax.f32 %v1961_v4, %v1962_v10  ;;  %v2040_v39 = vsel %vm100_vm1, %v2022_v49, %v2021_v36  ;;  %v2025_v24 = vunpack.c.l.b16 %v1991_v16  ;;  %v2030_v48 = vsel %vm104_vm2, %v2015_v25, %v2029_v45 }
 0x203   :  { %v1968_v29 = vmax.f32 %v1966_v15, %v1967_v18  ;;  %v1992_v50 = vpack.c.bf16 %v1958_v12, %v1958_v12  ;;  %v2041_v51 = vsel %vm104_vm2, %v2023_v26, %v2040_v39  ;;  %v1986_v57 = vpack.c.bf16 %v1916_v33, %v1916_v33  ;;  %v2282_v15 = vld [vmem:[%s3062_s4 + $0x4] sm:$0xf] }
 0x204   :  { %v1964_v55 = vrot.slane %v1963_v21, 1  ;;  %v2018_v59 = vunpack.c.l.b16 %v1984_v56  ;;  %v2019_v61 = vunpack.c.l.b16 %v1985_v38  ;;  %v2031_v0 = vsel %vm108_vm3, %v2016_v27, %v2030_v48  ;;  %v2281_v12 = vld [vmem:[%s3063_s1] sm:$0xff] }
 0x205   :  { %v1969_v34 = vrot.slane %v1968_v29, 2  ;;  %v2026_v60 = vunpack.c.l.b16 %v1992_v50  ;;  %v2042_v47 = vsel %vm108_vm3, %v2024_v43, %v2041_v51  ;;  %v2033_v32 = vsel %vm2032_vm8, %v2017_v41, %v2031_v0 }
 0x206   :  { %v1965_v31 = vmax.f32 %v1963_v21, %v1964_v55  ;;  %v2043_v52 = vsel %vm2032_vm8, %v2025_v24, %v2042_v47  ;;  %v2020_v17 = vunpack.c.l.b16 %v1986_v57  ;;  %v2035_v1 = vsel %vm2034_vm9, %v2018_v59, %v2033_v32 }
 0x207   :  { %v1970_v42 = vmax.f32 %v1968_v29, %v1969_v34  ;;  %v2044_v2 = vsel %vm2034_vm9, %v2026_v60, %v2043_v52  ;;  %v2037_v3 = vsel %vm2036_vm10, %v2019_v61, %v2035_v1  ;;  %vm2038_vm1 = vcmask 1047559  }
 0x208   :  { %v1993_v40 = vpack.c.bf16 %v1965_v31, %v1965_v31  ;;  %v2039_v28 = vsel %vm2038_vm1, %v2020_v17, %v2037_v3  ;;  %v2271_v23 = vor.u32 %v2285_v37, %v2270_v7  ;;  %v2263_v13 = vor.u32 %v2283_v9, %v2262_v44 }
 0x209   :  { %v1971_v54 = vrot.slane %v1970_v42, 1  ;;  %v2275_v10 = vor.u32 %v2284_v63, %v2272_v8  ;;  %v2267_v11 = vor.u32 %v2282_v15, %v2264_v14  ;;  %vm2114_vm2 = vcmask 261120  }
 0x20a   :  { %v2027_v62 = vunpack.c.l.b16 %v1993_v40  ;;  %v2148_v35 = vperm.slane %v2146_v22, 0  ;;  %v2149_v16 = vperm.slane %v2146_v22, 1 }
 0x20b   :  { %v1972_v46 = vmax.f32 %v1970_v42, %v1971_v54 }
 0x20c   :  { %v2045_v53 = vsel %vm2036_vm10, %v2027_v62, %v2044_v2 }
 0x20d   :  { %v1994_v58 = vpack.c.bf16 %v1972_v46, %v1972_v46 }
 0x20f   :  { %v2028_v5 = vunpack.c.l.b16 %v1994_v58 }
 0x211   :  { %v2046_v4 = vsel %vm2038_vm1, %v2028_v5, %v2045_v53 }
 0x212   :  { %v2047_v6 = vpack.c.b16 %v2046_v4, %v2039_v28 }
 0x214   :  { %2254 = vmatmul.msk.bf16.vlgmr.msra.gmra.mxu3 %vm806_vm7, %v2047_v6 }
 0x215   :  { %2124 = vmatpush.bf16.msra.mxu3 %v2271_v23 }
 0x219   :  { %2125 = vmatpush.bf16.msra.mxu3 %v2263_v13 }
 0x224   :  { %2255 = vmatmul.msk.bf16.vlgmr.msrb.gmra.mxu3 %vm806_vm7, %v2047_v6 }
 0x225   :  { %2138 = vmatpush.bf16.msrb.mxu3 %v2275_v10 }
 0x229   :  { %2139 = vmatpush.bf16.msrb.mxu3 %v2267_v11 }
 0x234   :  { %2276 = vmatmul.msk.bf16.vlgmr.msra.gmra.mxu3 %vm2114_vm2, %v2281_v12 }
 0x244   :  { %2277 = vmatmul.msk.bf16.vlgmr.msrb.gmra.mxu3 %vm2114_vm2, %v2281_v12 }
 0x297   :  { %v2070_v18 = vpop.f32.mrf.mxu3 }
 0x29f   :  { %v2072_v19 = vpop.f32.mrf.mxu3 }
 0x2a7   :  { %v2084_v20 = vpop.f32.mrf.mxu3 }
 0x2af   :  { %v2086_v21 = vpop.f32.mrf.mxu3 }
 0x2b7   :  { %v2127_v29 = vpop.f32.mrf.mxu3 }
 0x2b8   :  { %v2128_v30 = vadd.f32 %v2127_v29, %v2070_v18 }
 0x2ba   :  { %v2152_v25 = vadd.f32 %v2148_v35, %v2128_v30 }
 0x2bc   :  { %2156 = vst [vmem:[%s3065_s7] sm:$0xff] %v2152_v25 }
 0x2bf   :  { %v2129_v49 = vpop.f32.mrf.mxu3 }
 0x2c0   :  { %v2130_v55 = vadd.f32 %v2129_v49, %v2072_v19 }
 0x2c2   :  { %v2154_v56 = vadd.f32 %v2148_v35, %v2130_v55 }
 0x2c4   :  { %2158 = vst [vmem:[%s3065_s7 + $0x10] sm:$0xff] %v2154_v56 }
 0x2c7   :  { %v2141_v26 = vpop.f32.mrf.mxu3 }
 0x2c8   :  { %v2142_v33 = vadd.f32 %v2141_v26, %v2084_v20 }
 0x2ca   :  { %v2153_v34 = vadd.f32 %v2149_v16, %v2142_v33 }
 0x2cc   :  { %2157 = vst [vmem:[%s3065_s7 + $0x8] sm:$0xff] %v2153_v34 }
 0x2cf   :  { %v2143_v50 = vpop.f32.mrf.mxu3 }
 0x2d0   :  { %v2144_v36 = vadd.f32 %v2143_v50, %v2086_v21 }
 0x2d2   :  { %v2155_v31 = vadd.f32 %v2149_v16, %v2144_v36 }
 0x2d4   :  { %2159 = vst [vmem:[%s3065_s7 + $0x18] sm:$0xff] %v2155_v31 }

</bundles_post_ra>
